<compile_context>
chip_gen: v7x
topology: tpu7x:2x2x1
jax: 0.10.0
libtpu: 0.0.40
codegen_flags: <defaults>
</compile_context>

<pallas_src>
import functools

import jax
import jax.numpy as jnp
from jax import lax
from jax.experimental import pallas as pl
from jax.experimental.pallas import tpu as pltpu

# ----- synthetic small config (DINOv2 asserts PATCH_SIZE == 14) -----
PATCH = 14
IMG = 28                          # -> 2x2 = 4 patches
NUM_PATCHES = (IMG // PATCH) ** 2
PATCH_IN = 3 * PATCH * PATCH      # 588 (C * kh * kw)
EMBED = 32
HEADS = 2
HEAD_DIM = EMBED // HEADS
MLP_DIM = 4 * EMBED
DEPTH = 4
BLOCK_IDS = [1, 3]                # cfg.MODEL.MULTISCALE given as a list of block indices
LN_EPS = 1e-6                     # DINOv2 LayerNorm eps
N_TOK = 1 + NUM_PATCHES           # 5 real tokens (cls + patches)
N_PAD = 8                         # padded to one full sublane group


def _layernorm(x, w, b):
    mu = jnp.mean(x, axis=-1, keepdims=True)
    var = jnp.mean(jnp.square(x - mu), axis=-1, keepdims=True)
    return (x - mu) * lax.rsqrt(var + LN_EPS) * w + b


def _erf(x):
    # Abramowitz & Stegun 7.1.26 (|abs err| < 1.5e-7): exact-erf GELU without
    # depending on a lax.erf lowering inside Mosaic (exp runs on the EUP).
    sgn = jnp.where(x >= 0.0, 1.0, -1.0)
    a = jnp.abs(x)
    t = 1.0 / (1.0 + 0.3275911 * a)
    poly = ((((1.061405429 * t - 1.453152027) * t + 1.421413741) * t
             - 0.284496736) * t + 0.254829592) * t
    return sgn * (1.0 - poly * jnp.exp(-a * a))


def _gelu_exact(x):
    # matches torch.nn.GELU() default (exact erf form) to ~1e-7
    return 0.5 * x * (1.0 + _erf(x * 0.7071067811865476))


# ---------------- fused forward kernel (one grid step = one image) ----------------
def dinov2_fused_kernel(patches_ref, w_patch_ref, cls_row_ref, pos_rest_ref,
                        ln1w_ref, ln1b_ref, wqkv_ref, bqkv_ref,
                        wproj_ref, bproj_ref, g1_ref, ln2w_ref, ln2b_ref,
                        wfc1_ref, bfc1_ref, wfc2_ref, bfc2_ref, g2_ref,
                        normw_ref, normb_ref, out_ref, *, apply_norm=True):
    f32 = jnp.float32

    # ---- patch embed: 14x14/stride-14 conv == per-patch matmul ----
    # (patch-embed bias is pre-folded into pos_rest in the wrapper)
    patches = patches_ref[0]                                       # (P, PATCH_IN)
    tok = (jnp.dot(patches, w_patch_ref[...], preferred_element_type=f32)
           + pos_rest_ref[...])                                    # (P, D)

    # ---- prepend cls token (cls + pos[0] pre-folded), pad N_TOK -> N_PAD rows ----
    x = jnp.concatenate(
        [cls_row_ref[...],                                         # (1, D)
         tok,                                                      # (P, D)
         jnp.zeros((N_PAD - N_TOK, EMBED), f32)],
        axis=0)                                                    # (N_PAD, D)

    # mask: padded key columns never receive attention weight -> results
    # for the real rows are identical to the unpadded computation.
    col = lax.broadcasted_iota(jnp.int32, (1, N_PAD), 1)
    key_bias = jnp.where(col < N_TOK, 0.0, -1e30).astype(f32)      # (1, N_PAD)

    out_slot = 0
    for d in range(DEPTH):                                         # static unroll
        # --- attention branch (pre-LN, LayerScale, residual) ---
        h = _layernorm(x, ln1w_ref[d], ln1b_ref[d])
        qkv = (jnp.dot(h, wqkv_ref[d], preferred_element_type=f32)
               + bqkv_ref[d])                                      # (N_PAD, 3D)
        q = qkv[:, 0 * EMBED:1 * EMBED]                            # scale folded in W/b
        k = qkv[:, 1 * EMBED:2 * EMBED]
        v = qkv[:, 2 * EMBED:3 * EMBED]
        heads = []
        for hi in range(HEADS):                                    # HEADS=2, unrolled
            sl = slice(hi * HEAD_DIM, (hi + 1) * HEAD_DIM)
            # q @ k^T without materializing a transpose
            s = lax.dot_general(q[:, sl], k[:, sl],
                                (((1,), (1,)), ((), ())),
                                preferred_element_type=f32)        # (N_PAD, N_PAD)
            s = s + key_bias
            s = s - jnp.max(s, axis=-1, keepdims=True)
            p = jnp.exp(s)
            p = p * pl.reciprocal(jnp.sum(p, axis=-1, keepdims=True), approx=True)
            heads.append(jnp.dot(p, v[:, sl], preferred_element_type=f32))
        attn = jnp.concatenate(heads, axis=-1)                     # (N_PAD, D)
        attn = (jnp.dot(attn, wproj_ref[d], preferred_element_type=f32)
                + bproj_ref[d])
        x = x + g1_ref[d] * attn                                   # LayerScale + residual

        # --- MLP branch (pre-LN, LayerScale, residual) ---
        h = _layernorm(x, ln2w_ref[d], ln2b_ref[d])
        h = jnp.dot(h, wfc1_ref[d], preferred_element_type=f32) + bfc1_ref[d]
        h = _gelu_exact(h)
        h = jnp.dot(h, wfc2_ref[d], preferred_element_type=f32) + bfc2_ref[d]
        x = x + g2_ref[d] * h                                      # LayerScale + residual

        # --- collect intermediate layer output (norm + strip cls/padding) ---
        if d in BLOCK_IDS:
            y = _layernorm(x, normw_ref[...], normb_ref[...]) if apply_norm else x
            out_ref[out_slot, 0, :, :] = y[1:1 + NUM_PATCHES].astype(out_ref.dtype)
            out_slot += 1


# ---------------- forward (== DINOv2NetMultiScale.forward) ----------------
def dinov2_multiscale_forward(x, params, norm=True):
    B, C, H, W = x.shape
    ph, pw = H // PATCH, W // PATCH
    P = ph * pw
    assert P == NUM_PATCHES and C * PATCH * PATCH == PATCH_IN
    # unfold NCHW into per-patch rows flattened in (C, kh, kw) order (matches conv
    # weight flattening); pos_embed grid equals the input patch grid, so
    # interpolate_pos_encoding is the identity.
    patches = x.reshape(B, C, ph, PATCH, pw, PATCH)
    patches = patches.transpose(0, 2, 4, 1, 3, 5).reshape(B, P, PATCH_IN)

    # parameter-only folds (tiny, done once outside the kernel):
    #   cls_row  = cls_token + pos_embed[0]
    #   pos_rest = pos_embed[1:] + patch_embed_bias
    #   qkv q-third pre-scaled by head_dim**-0.5
    scale = jnp.float32(HEAD_DIM ** -0.5)
    cls_row = params["cls_token"] + params["pos_embed"][:1]        # (1, D)
    pos_rest = params["pos_embed"][1:] + params["b_patch"]         # (P, D)
    wqkv = params["wqkv"].at[:, :, :EMBED].multiply(scale)
    bqkv = params["bqkv"].at[:, :, :EMBED].multiply(scale)

    inputs = [patches, params["w_patch"], cls_row, pos_rest,
              params["ln1w"], params["ln1b"], wqkv, bqkv,
              params["wproj"], params["bproj"], params["g1"],
              params["ln2w"], params["ln2b"], params["wfc1"], params["bfc1"],
              params["wfc2"], params["bfc2"], params["g2"],
              params["norm_w"], params["norm_b"]]

    in_specs = [pl.BlockSpec((1, P, PATCH_IN), lambda b: (b, 0, 0))]
    for w in inputs[1:]:
        # whole-tensor blocks whose index never changes across the grid -> DMA'd
        # once, kept resident in VMEM for all grid steps.
        in_specs.append(pl.BlockSpec(w.shape, lambda b, _n=w.ndim: (0,) * _n))

    n_out = len(BLOCK_IDS)
    out = pl.pallas_call(
        functools.partial(dinov2_fused_kernel, apply_norm=norm),
        out_shape=jax.ShapeDtypeStruct((n_out, B, P, EMBED), jnp.float32),
        grid=(B,),
        in_specs=in_specs,
        out_specs=pl.BlockSpec((n_out, 1, P, EMBED), lambda b: (0, b, 0, 0)),
        compiler_params=pltpu.CompilerParams(
            dimension_semantics=("parallel",)),
    )(*inputs)
    return tuple(out[j] for j in range(n_out))


# ---------------- pure-JAX reference (mirrors the PyTorch math) ----------------
def dinov2_multiscale_reference(x, params, norm=True):
    B, C, H, W = x.shape
    ph, pw = H // PATCH, W // PATCH
    P = ph * pw
    patches = x.reshape(B, C, ph, PATCH, pw, PATCH)
    patches = patches.transpose(0, 2, 4, 1, 3, 5).reshape(B, P, PATCH_IN)

    def ln(v, w, b):
        mu = v.mean(-1, keepdims=True)
        var = ((v - mu) ** 2).mean(-1, keepdims=True)
        return (v - mu) / jnp.sqrt(var + LN_EPS) * w + b

    tok = patches @ params["w_patch"] + params["b_patch"]
    cls = jnp.broadcast_to(params["cls_token"], (B, 1, EMBED))
    xt = jnp.concatenate([cls, tok], axis=1) + params["pos_embed"][None]

    outs = []
    scale = HEAD_DIM ** -0.5
    for d in range(DEPTH):
        h = ln(xt, params["ln1w"][d], params["ln1b"][d])
        qkv = h @ params["wqkv"][d] + params["bqkv"][d]
        q, k, v = (qkv[..., :EMBED], qkv[..., EMBED:2 * EMBED], qkv[..., 2 * EMBED:])
        q = q.reshape(B, N_TOK, HEADS, HEAD_DIM).transpose(0, 2, 1, 3) * scale
        k = k.reshape(B, N_TOK, HEADS, HEAD_DIM).transpose(0, 2, 1, 3)
        v = v.reshape(B, N_TOK, HEADS, HEAD_DIM).transpose(0, 2, 1, 3)
        p = jax.nn.softmax(q @ k.transpose(0, 1, 3, 2), axis=-1)
        a = (p @ v).transpose(0, 2, 1, 3).reshape(B, N_TOK, EMBED)
        a = a @ params["wproj"][d] + params["bproj"][d]
        xt = xt + params["g1"][d] * a
        h = ln(xt, params["ln2w"][d], params["ln2b"][d])
        h = h @ params["wfc1"][d] + params["bfc1"][d]
        h = 0.5 * h * (1.0 + jax.scipy.special.erf(h * 0.7071067811865476))
        h = h @ params["wfc2"][d] + params["bfc2"][d]
        xt = xt + params["g2"][d] * h
        if d in BLOCK_IDS:
            y = ln(xt, params["norm_w"], params["norm_b"]) if norm else xt
            outs.append(y[:, 1:])
    return tuple(outs)


# ---------------- deterministic synthetic parameters ----------------
# TODO(synk): real DINOv2 weights come from torch.hub; synthetic params stand in here.
def init_params(key):
    def nrm(k, shape, scale=0.02):
        return scale * jax.random.normal(k, shape, jnp.float32)

    keys = jax.random.split(key, 12)
    params = dict(
        w_patch=nrm(keys[0], (PATCH_IN, EMBED)),
        b_patch=nrm(keys[1], (1, EMBED)),
        cls_token=nrm(keys[2], (1, EMBED)),
        pos_embed=nrm(keys[3], (1 + NUM_PATCHES, EMBED)),
        norm_w=jnp.ones((1, EMBED), jnp.float32),
        norm_b=jnp.zeros((1, EMBED), jnp.float32),
        # per-block weights stacked along a leading DEPTH axis
        ln1w=jnp.ones((DEPTH, 1, EMBED), jnp.float32),
        ln1b=jnp.zeros((DEPTH, 1, EMBED), jnp.float32),
        wqkv=nrm(keys[4], (DEPTH, EMBED, 3 * EMBED)),
        bqkv=nrm(keys[5], (DEPTH, 1, 3 * EMBED)),
        wproj=nrm(keys[6], (DEPTH, EMBED, EMBED)),
        bproj=nrm(keys[7], (DEPTH, 1, EMBED)),
        g1=jnp.ones((DEPTH, 1, EMBED), jnp.float32),      # LayerScale gamma (attn)
        ln2w=jnp.ones((DEPTH, 1, EMBED), jnp.float32),
        ln2b=jnp.zeros((DEPTH, 1, EMBED), jnp.float32),
        wfc1=nrm(keys[8], (DEPTH, EMBED, MLP_DIM)),
        bfc1=nrm(keys[9], (DEPTH, 1, MLP_DIM)),
        wfc2=nrm(keys[10], (DEPTH, MLP_DIM, EMBED)),
        bfc2=nrm(keys[11], (DEPTH, 1, EMBED)),
        g2=jnp.ones((DEPTH, 1, EMBED), jnp.float32),      # LayerScale gamma (mlp)
    )
    return params


if __name__ == "__main__":
    key = jax.random.PRNGKey(0)
    kx, kp = jax.random.split(key)
    B = 2
    x = jax.random.normal(kx, (B, 3, IMG, IMG), jnp.float32)    # NCHW, like PyTorch
    params = init_params(kp)

    fwd = jax.jit(dinov2_multiscale_forward, static_argnames=("norm",))
    outs = fwd(x, params, norm=True)
    outs = jax.block_until_ready(outs)

    refs = dinov2_multiscale_reference(x, params, norm=True)

    assert len(outs) == len(BLOCK_IDS)
    for o, r in zip(outs, refs):
        assert o.shape == (B, NUM_PATCHES, EMBED), o.shape
        assert o.dtype == jnp.float32
        assert bool(jnp.all(jnp.isfinite(o)))
        # approx-reciprocal softmax + A&S erf vs exact reference -> loose tolerance
        assert bool(jnp.allclose(o, r, atol=5e-3, rtol=5e-3)), \
            float(jnp.max(jnp.abs(o - r)))
    print("KERNEL_OK")
</pallas_src>

<mosaic_0001>
module attributes {stable_mosaic.version = 11 : i64} {
  func.func @dinov2_fused_kernel(%arg0: i32, %arg1: memref<1x4x588xf32, #tpu.memory_space<vmem>>, %arg2: memref<588x32xf32, #tpu.memory_space<vmem>>, %arg3: memref<1x32xf32, #tpu.memory_space<vmem>>, %arg4: memref<4x32xf32, #tpu.memory_space<vmem>>, %arg5: memref<4x1x32xf32, #tpu.memory_space<vmem>>, %arg6: memref<4x1x32xf32, #tpu.memory_space<vmem>>, %arg7: memref<4x32x96xf32, #tpu.memory_space<vmem>>, %arg8: memref<4x1x96xf32, #tpu.memory_space<vmem>>, %arg9: memref<4x32x32xf32, #tpu.memory_space<vmem>>, %arg10: memref<4x1x32xf32, #tpu.memory_space<vmem>>, %arg11: memref<4x1x32xf32, #tpu.memory_space<vmem>>, %arg12: memref<4x1x32xf32, #tpu.memory_space<vmem>>, %arg13: memref<4x1x32xf32, #tpu.memory_space<vmem>>, %arg14: memref<4x32x128xf32, #tpu.memory_space<vmem>>, %arg15: memref<4x1x128xf32, #tpu.memory_space<vmem>>, %arg16: memref<4x128x32xf32, #tpu.memory_space<vmem>>, %arg17: memref<4x1x32xf32, #tpu.memory_space<vmem>>, %arg18: memref<4x1x32xf32, #tpu.memory_space<vmem>>, %arg19: memref<1x32xf32, #tpu.memory_space<vmem>>, %arg20: memref<1x32xf32, #tpu.memory_space<vmem>>, %arg21: memref<2x1x4x32xf32, #tpu.memory_space<vmem>>) attributes {dimension_semantics = [#tpu.dimension_semantics<parallel>], iteration_bounds = array<i64: 2>, scalar_prefetch = 0 : i64, scratch_operands = 0 : i64, tpu.core_type = #tpu.core_type<tc>, window_params = [{transform_indices = @transform_0, window_bounds = array<i64: 1, 4, 588>}, {pipeline_mode = #tpu.pipeline_mode<synchronous>, transform_indices = @transform_1, window_bounds = array<i64: 588, 32>}, {pipeline_mode = #tpu.pipeline_mode<synchronous>, transform_indices = @transform_2, window_bounds = array<i64: 1, 32>}, {pipeline_mode = #tpu.pipeline_mode<synchronous>, transform_indices = @transform_3, window_bounds = array<i64: 4, 32>}, {pipeline_mode = #tpu.pipeline_mode<synchronous>, transform_indices = @transform_4, window_bounds = array<i64: 4, 1, 32>}, {pipeline_mode = #tpu.pipeline_mode<synchronous>, transform_indices = @transform_5, window_bounds = array<i64: 4, 1, 32>}, {pipeline_mode = #tpu.pipeline_mode<synchronous>, transform_indices = @transform_6, window_bounds = array<i64: 4, 32, 96>}, {pipeline_mode = #tpu.pipeline_mode<synchronous>, transform_indices = @transform_7, window_bounds = array<i64: 4, 1, 96>}, {pipeline_mode = #tpu.pipeline_mode<synchronous>, transform_indices = @transform_8, window_bounds = array<i64: 4, 32, 32>}, {pipeline_mode = #tpu.pipeline_mode<synchronous>, transform_indices = @transform_9, window_bounds = array<i64: 4, 1, 32>}, {pipeline_mode = #tpu.pipeline_mode<synchronous>, transform_indices = @transform_10, window_bounds = array<i64: 4, 1, 32>}, {pipeline_mode = #tpu.pipeline_mode<synchronous>, transform_indices = @transform_11, window_bounds = array<i64: 4, 1, 32>}, {pipeline_mode = #tpu.pipeline_mode<synchronous>, transform_indices = @transform_12, window_bounds = array<i64: 4, 1, 32>}, {pipeline_mode = #tpu.pipeline_mode<synchronous>, transform_indices = @transform_13, window_bounds = array<i64: 4, 32, 128>}, {pipeline_mode = #tpu.pipeline_mode<synchronous>, transform_indices = @transform_14, window_bounds = array<i64: 4, 1, 128>}, {pipeline_mode = #tpu.pipeline_mode<synchronous>, transform_indices = @transform_15, window_bounds = array<i64: 4, 128, 32>}, {pipeline_mode = #tpu.pipeline_mode<synchronous>, transform_indices = @transform_16, window_bounds = array<i64: 4, 1, 32>}, {pipeline_mode = #tpu.pipeline_mode<synchronous>, transform_indices = @transform_17, window_bounds = array<i64: 4, 1, 32>}, {pipeline_mode = #tpu.pipeline_mode<synchronous>, transform_indices = @transform_18, window_bounds = array<i64: 1, 32>}, {pipeline_mode = #tpu.pipeline_mode<synchronous>, transform_indices = @transform_19, window_bounds = array<i64: 1, 32>}, {transform_indices = @transform_20, window_bounds = array<i64: 2, 1, 4, 32>}]} {
    %c0 = arith.constant 0 : index
    %c0_0 = arith.constant 0 : index
    %c0_1 = arith.constant 0 : index
    %0 = vector.load %arg1[%c0, %c0_0, %c0_1] : memref<1x4x588xf32, #tpu.memory_space<vmem>>, vector<1x4x588xf32>
    %1 = vector.shape_cast %0 : vector<1x4x588xf32> to vector<4x588xf32>
    %c0_2 = arith.constant 0 : index
    %c0_3 = arith.constant 0 : index
    %2 = vector.load %arg2[%c0_2, %c0_3] : memref<588x32xf32, #tpu.memory_space<vmem>>, vector<588x32xf32>
    %cst = arith.constant dense<0.000000e+00> : vector<4x32xf32>
    %3 = tpu.matmul %1, %2, %cst {dimension_numbers = #tpu.dot_dimension_numbers<[1], [0], [0], [1], [0, 0, 1, 1], [], []>} : vector<4x588xf32>, vector<588x32xf32>, vector<4x32xf32> -> vector<4x32xf32>
    %c0_4 = arith.constant 0 : index
    %c0_5 = arith.constant 0 : index
    %4 = vector.load %arg4[%c0_4, %c0_5] : memref<4x32xf32, #tpu.memory_space<vmem>>, vector<4x32xf32>
    %5 = arith.addf %3, %4 : vector<4x32xf32>
    %c0_6 = arith.constant 0 : index
    %c0_7 = arith.constant 0 : index
    %6 = vector.load %arg3[%c0_6, %c0_7] : memref<1x32xf32, #tpu.memory_space<vmem>>, vector<1x32xf32>
    %cst_8 = arith.constant 0.000000e+00 : f32
    %7 = vector.broadcast %cst_8 : f32 to vector<3x32xf32>
    %8 = tpu.concatenate %6, %5, %7 in 0 : vector<1x32xf32>, vector<4x32xf32>, vector<3x32xf32> -> vector<8x32xf32>
    %9 = tpu.iota {dimensions = array<i32: 1>} : vector<1x8xi32>
    %c5_i32 = arith.constant 5 : i32
    %10 = vector.broadcast %c5_i32 : i32 to vector<1x8xi32>
    %11 = arith.cmpi slt, %9, %10 : vector<1x8xi32>
    %cst_9 = arith.constant 0.000000e+00 : f32
    %cst_10 = arith.constant -1.000000e+30 : f32
    %12 = vector.broadcast %cst_9 : f32 to vector<1x8xf32>
    %13 = vector.broadcast %cst_10 : f32 to vector<1x8xf32>
    %14 = arith.select %11, %12, %13 : vector<1x8xi1>, vector<1x8xf32>
    %c0_11 = arith.constant 0 : index
    %c0_12 = arith.constant 0 : index
    %c0_13 = arith.constant 0 : index
    %15 = vector.load %arg5[%c0_11, %c0_12, %c0_13] : memref<4x1x32xf32, #tpu.memory_space<vmem>>, vector<1x1x32xf32>
    %16 = vector.shape_cast %15 : vector<1x1x32xf32> to vector<1x32xf32>
    %c0_14 = arith.constant 0 : index
    %c0_15 = arith.constant 0 : index
    %c0_16 = arith.constant 0 : index
    %17 = vector.load %arg6[%c0_14, %c0_15, %c0_16] : memref<4x1x32xf32, #tpu.memory_space<vmem>>, vector<1x1x32xf32>
    %18 = vector.shape_cast %17 : vector<1x1x32xf32> to vector<1x32xf32>
    %cst_17 = arith.constant dense<0.000000e+00> : vector<8xf32>
    %19 = vector.multi_reduction <add>, %8, %cst_17 [1] : vector<8x32xf32> to vector<8xf32>
    %20 = vector.shape_cast %19 : vector<8xf32> to vector<8x1xf32>
    %cst_18 = arith.constant 3.200000e+01 : f32
    %21 = vector.broadcast %cst_18 : f32 to vector<8x1xf32>
    %22 = arith.divf %20, %21 : vector<8x1xf32>
    %23 = vector.broadcast %22 : vector<8x1xf32> to vector<8x32xf32>
    %24 = arith.subf %8, %23 : vector<8x32xf32>
    %25 = arith.mulf %24, %24 : vector<8x32xf32>
    %cst_19 = arith.constant dense<0.000000e+00> : vector<8xf32>
    %26 = vector.multi_reduction <add>, %25, %cst_19 [1] : vector<8x32xf32> to vector<8xf32>
    %27 = vector.shape_cast %26 : vector<8xf32> to vector<8x1xf32>
    %cst_20 = arith.constant 3.200000e+01 : f32
    %28 = vector.broadcast %cst_20 : f32 to vector<8x1xf32>
    %29 = arith.divf %27, %28 : vector<8x1xf32>
    %30 = vector.broadcast %22 : vector<8x1xf32> to vector<8x32xf32>
    %31 = arith.subf %8, %30 : vector<8x32xf32>
    %cst_21 = arith.constant 9.99999997E-7 : f32
    %32 = vector.broadcast %cst_21 : f32 to vector<8x1xf32>
    %33 = arith.addf %29, %32 : vector<8x1xf32>
    %34 = math.rsqrt %33 : vector<8x1xf32>
    %35 = vector.broadcast %34 : vector<8x1xf32> to vector<8x32xf32>
    %36 = arith.mulf %31, %35 : vector<8x32xf32>
    %37 = vector.broadcast %16 : vector<1x32xf32> to vector<8x32xf32>
    %38 = arith.mulf %36, %37 : vector<8x32xf32>
    %39 = vector.broadcast %18 : vector<1x32xf32> to vector<8x32xf32>
    %40 = arith.addf %38, %39 : vector<8x32xf32>
    %c0_22 = arith.constant 0 : index
    %c0_23 = arith.constant 0 : index
    %c0_24 = arith.constant 0 : index
    %41 = vector.load %arg7[%c0_22, %c0_23, %c0_24] : memref<4x32x96xf32, #tpu.memory_space<vmem>>, vector<1x32x96xf32>
    %42 = vector.shape_cast %41 : vector<1x32x96xf32> to vector<32x96xf32>
    %cst_25 = arith.constant dense<0.000000e+00> : vector<8x96xf32>
    %43 = tpu.matmul %40, %42, %cst_25 {dimension_numbers = #tpu.dot_dimension_numbers<[1], [0], [0], [1], [0, 0, 1, 1], [], []>} : vector<8x32xf32>, vector<32x96xf32>, vector<8x96xf32> -> vector<8x96xf32>
    %c0_26 = arith.constant 0 : index
    %c0_27 = arith.constant 0 : index
    %c0_28 = arith.constant 0 : index
    %44 = vector.load %arg8[%c0_26, %c0_27, %c0_28] : memref<4x1x96xf32, #tpu.memory_space<vmem>>, vector<1x1x96xf32>
    %45 = vector.shape_cast %44 : vector<1x1x96xf32> to vector<1x96xf32>
    %46 = vector.broadcast %45 : vector<1x96xf32> to vector<8x96xf32>
    %47 = arith.addf %43, %46 : vector<8x96xf32>
    %48 = vector.extract_strided_slice %47 {offsets = [0, 0], sizes = [8, 32], strides = [1, 1]} : vector<8x96xf32> to vector<8x32xf32>
    %49 = vector.extract_strided_slice %47 {offsets = [0, 32], sizes = [8, 32], strides = [1, 1]} : vector<8x96xf32> to vector<8x32xf32>
    %50 = vector.extract_strided_slice %47 {offsets = [0, 64], sizes = [8, 32], strides = [1, 1]} : vector<8x96xf32> to vector<8x32xf32>
    %51 = vector.extract_strided_slice %48 {offsets = [0, 0], sizes = [8, 16], strides = [1, 1]} : vector<8x32xf32> to vector<8x16xf32>
    %52 = vector.extract_strided_slice %49 {offsets = [0, 0], sizes = [8, 16], strides = [1, 1]} : vector<8x32xf32> to vector<8x16xf32>
    %cst_29 = arith.constant dense<0.000000e+00> : vector<8x8xf32>
    %53 = tpu.matmul %51, %52, %cst_29 {dimension_numbers = #tpu.dot_dimension_numbers<[1], [1], [0], [0], [0, 0, 1, 0], [], []>} : vector<8x16xf32>, vector<8x16xf32>, vector<8x8xf32> -> vector<8x8xf32>
    %54 = vector.broadcast %14 : vector<1x8xf32> to vector<8x8xf32>
    %55 = arith.addf %53, %54 : vector<8x8xf32>
    %cst_30 = arith.constant dense<0xFF800000> : vector<8xf32>
    %56 = vector.multi_reduction <maximumf>, %55, %cst_30 [1] : vector<8x8xf32> to vector<8xf32>
    %57 = vector.shape_cast %56 : vector<8xf32> to vector<8x1xf32>
    %58 = vector.broadcast %57 : vector<8x1xf32> to vector<8x8xf32>
    %59 = arith.subf %55, %58 : vector<8x8xf32>
    %60 = math.exp %59 : vector<8x8xf32>
    %cst_31 = arith.constant dense<0.000000e+00> : vector<8xf32>
    %61 = vector.multi_reduction <add>, %60, %cst_31 [1] : vector<8x8xf32> to vector<8xf32>
    %62 = vector.shape_cast %61 : vector<8xf32> to vector<8x1xf32>
    %63 = tpu.reciprocal %62 {approx = true} : vector<8x1xf32> -> vector<8x1xf32>
    %64 = vector.broadcast %63 : vector<8x1xf32> to vector<8x8xf32>
    %65 = arith.mulf %60, %64 : vector<8x8xf32>
    %66 = vector.extract_strided_slice %50 {offsets = [0, 0], sizes = [8, 16], strides = [1, 1]} : vector<8x32xf32> to vector<8x16xf32>
    %cst_32 = arith.constant dense<0.000000e+00> : vector<8x16xf32>
    %67 = tpu.matmul %65, %66, %cst_32 {dimension_numbers = #tpu.dot_dimension_numbers<[1], [0], [0], [1], [0, 0, 1, 1], [], []>} : vector<8x8xf32>, vector<8x16xf32>, vector<8x16xf32> -> vector<8x16xf32>
    %68 = vector.extract_strided_slice %48 {offsets = [0, 16], sizes = [8, 16], strides = [1, 1]} : vector<8x32xf32> to vector<8x16xf32>
    %69 = vector.extract_strided_slice %49 {offsets = [0, 16], sizes = [8, 16], strides = [1, 1]} : vector<8x32xf32> to vector<8x16xf32>
    %cst_33 = arith.constant dense<0.000000e+00> : vector<8x8xf32>
    %70 = tpu.matmul %68, %69, %cst_33 {dimension_numbers = #tpu.dot_dimension_numbers<[1], [1], [0], [0], [0, 0, 1, 0], [], []>} : vector<8x16xf32>, vector<8x16xf32>, vector<8x8xf32> -> vector<8x8xf32>
    %71 = vector.broadcast %14 : vector<1x8xf32> to vector<8x8xf32>
    %72 = arith.addf %70, %71 : vector<8x8xf32>
    %cst_34 = arith.constant dense<0xFF800000> : vector<8xf32>
    %73 = vector.multi_reduction <maximumf>, %72, %cst_34 [1] : vector<8x8xf32> to vector<8xf32>
    %74 = vector.shape_cast %73 : vector<8xf32> to vector<8x1xf32>
    %75 = vector.broadcast %74 : vector<8x1xf32> to vector<8x8xf32>
    %76 = arith.subf %72, %75 : vector<8x8xf32>
    %77 = math.exp %76 : vector<8x8xf32>
    %cst_35 = arith.constant dense<0.000000e+00> : vector<8xf32>
    %78 = vector.multi_reduction <add>, %77, %cst_35 [1] : vector<8x8xf32> to vector<8xf32>
    %79 = vector.shape_cast %78 : vector<8xf32> to vector<8x1xf32>
    %80 = tpu.reciprocal %79 {approx = true} : vector<8x1xf32> -> vector<8x1xf32>
    %81 = vector.broadcast %80 : vector<8x1xf32> to vector<8x8xf32>
    %82 = arith.mulf %77, %81 : vector<8x8xf32>
    %83 = vector.extract_strided_slice %50 {offsets = [0, 16], sizes = [8, 16], strides = [1, 1]} : vector<8x32xf32> to vector<8x16xf32>
    %cst_36 = arith.constant dense<0.000000e+00> : vector<8x16xf32>
    %84 = tpu.matmul %82, %83, %cst_36 {dimension_numbers = #tpu.dot_dimension_numbers<[1], [0], [0], [1], [0, 0, 1, 1], [], []>} : vector<8x8xf32>, vector<8x16xf32>, vector<8x16xf32> -> vector<8x16xf32>
    %85 = tpu.concatenate %67, %84 in 1 : vector<8x16xf32>, vector<8x16xf32> -> vector<8x32xf32>
    %c0_37 = arith.constant 0 : index
    %c0_38 = arith.constant 0 : index
    %c0_39 = arith.constant 0 : index
    %86 = vector.load %arg9[%c0_37, %c0_38, %c0_39] : memref<4x32x32xf32, #tpu.memory_space<vmem>>, vector<1x32x32xf32>
    %87 = vector.shape_cast %86 : vector<1x32x32xf32> to vector<32x32xf32>
    %cst_40 = arith.constant dense<0.000000e+00> : vector<8x32xf32>
    %88 = tpu.matmul %85, %87, %cst_40 {dimension_numbers = #tpu.dot_dimension_numbers<[1], [0], [0], [1], [0, 0, 1, 1], [], []>} : vector<8x32xf32>, vector<32x32xf32>, vector<8x32xf32> -> vector<8x32xf32>
    %c0_41 = arith.constant 0 : index
    %c0_42 = arith.constant 0 : index
    %c0_43 = arith.constant 0 : index
    %89 = vector.load %arg10[%c0_41, %c0_42, %c0_43] : memref<4x1x32xf32, #tpu.memory_space<vmem>>, vector<1x1x32xf32>
    %90 = vector.shape_cast %89 : vector<1x1x32xf32> to vector<1x32xf32>
    %91 = vector.broadcast %90 : vector<1x32xf32> to vector<8x32xf32>
    %92 = arith.addf %88, %91 : vector<8x32xf32>
    %c0_44 = arith.constant 0 : index
    %c0_45 = arith.constant 0 : index
    %c0_46 = arith.constant 0 : index
    %93 = vector.load %arg11[%c0_44, %c0_45, %c0_46] : memref<4x1x32xf32, #tpu.memory_space<vmem>>, vector<1x1x32xf32>
    %94 = vector.shape_cast %93 : vector<1x1x32xf32> to vector<1x32xf32>
    %95 = vector.broadcast %94 : vector<1x32xf32> to vector<8x32xf32>
    %96 = arith.mulf %95, %92 : vector<8x32xf32>
    %97 = arith.addf %8, %96 : vector<8x32xf32>
    %c0_47 = arith.constant 0 : index
    %c0_48 = arith.constant 0 : index
    %c0_49 = arith.constant 0 : index
    %98 = vector.load %arg12[%c0_47, %c0_48, %c0_49] : memref<4x1x32xf32, #tpu.memory_space<vmem>>, vector<1x1x32xf32>
    %99 = vector.shape_cast %98 : vector<1x1x32xf32> to vector<1x32xf32>
    %c0_50 = arith.constant 0 : index
    %c0_51 = arith.constant 0 : index
    %c0_52 = arith.constant 0 : index
    %100 = vector.load %arg13[%c0_50, %c0_51, %c0_52] : memref<4x1x32xf32, #tpu.memory_space<vmem>>, vector<1x1x32xf32>
    %101 = vector.shape_cast %100 : vector<1x1x32xf32> to vector<1x32xf32>
    %cst_53 = arith.constant dense<0.000000e+00> : vector<8xf32>
    %102 = vector.multi_reduction <add>, %97, %cst_53 [1] : vector<8x32xf32> to vector<8xf32>
    %103 = vector.shape_cast %102 : vector<8xf32> to vector<8x1xf32>
    %cst_54 = arith.constant 3.200000e+01 : f32
    %104 = vector.broadcast %cst_54 : f32 to vector<8x1xf32>
    %105 = arith.divf %103, %104 : vector<8x1xf32>
    %106 = vector.broadcast %105 : vector<8x1xf32> to vector<8x32xf32>
    %107 = arith.subf %97, %106 : vector<8x32xf32>
    %108 = arith.mulf %107, %107 : vector<8x32xf32>
    %cst_55 = arith.constant dense<0.000000e+00> : vector<8xf32>
    %109 = vector.multi_reduction <add>, %108, %cst_55 [1] : vector<8x32xf32> to vector<8xf32>
    %110 = vector.shape_cast %109 : vector<8xf32> to vector<8x1xf32>
    %cst_56 = arith.constant 3.200000e+01 : f32
    %111 = vector.broadcast %cst_56 : f32 to vector<8x1xf32>
    %112 = arith.divf %110, %111 : vector<8x1xf32>
    %113 = vector.broadcast %105 : vector<8x1xf32> to vector<8x32xf32>
    %114 = arith.subf %97, %113 : vector<8x32xf32>
    %cst_57 = arith.constant 9.99999997E-7 : f32
    %115 = vector.broadcast %cst_57 : f32 to vector<8x1xf32>
    %116 = arith.addf %112, %115 : vector<8x1xf32>
    %117 = math.rsqrt %116 : vector<8x1xf32>
    %118 = vector.broadcast %117 : vector<8x1xf32> to vector<8x32xf32>
    %119 = arith.mulf %114, %118 : vector<8x32xf32>
    %120 = vector.broadcast %99 : vector<1x32xf32> to vector<8x32xf32>
    %121 = arith.mulf %119, %120 : vector<8x32xf32>
    %122 = vector.broadcast %101 : vector<1x32xf32> to vector<8x32xf32>
    %123 = arith.addf %121, %122 : vector<8x32xf32>
    %c0_58 = arith.constant 0 : index
    %c0_59 = arith.constant 0 : index
    %c0_60 = arith.constant 0 : index
    %124 = vector.load %arg14[%c0_58, %c0_59, %c0_60] : memref<4x32x128xf32, #tpu.memory_space<vmem>>, vector<1x32x128xf32>
    %125 = vector.shape_cast %124 : vector<1x32x128xf32> to vector<32x128xf32>
    %cst_61 = arith.constant dense<0.000000e+00> : vector<8x128xf32>
    %126 = tpu.matmul %123, %125, %cst_61 {dimension_numbers = #tpu.dot_dimension_numbers<[1], [0], [0], [1], [0, 0, 1, 1], [], []>} : vector<8x32xf32>, vector<32x128xf32>, vector<8x128xf32> -> vector<8x128xf32>
    %c0_62 = arith.constant 0 : index
    %c0_63 = arith.constant 0 : index
    %c0_64 = arith.constant 0 : index
    %127 = vector.load %arg15[%c0_62, %c0_63, %c0_64] : memref<4x1x128xf32, #tpu.memory_space<vmem>>, vector<1x1x128xf32>
    %128 = vector.shape_cast %127 : vector<1x1x128xf32> to vector<1x128xf32>
    %129 = vector.broadcast %128 : vector<1x128xf32> to vector<8x128xf32>
    %130 = arith.addf %126, %129 : vector<8x128xf32>
    %cst_65 = arith.constant 5.000000e-01 : f32
    %131 = vector.broadcast %cst_65 : f32 to vector<8x128xf32>
    %132 = arith.mulf %131, %130 : vector<8x128xf32>
    %cst_66 = arith.constant 0.707106769 : f32
    %133 = vector.broadcast %cst_66 : f32 to vector<8x128xf32>
    %134 = arith.mulf %130, %133 : vector<8x128xf32>
    %cst_67 = arith.constant 0.000000e+00 : f32
    %135 = vector.broadcast %cst_67 : f32 to vector<8x128xf32>
    %136 = arith.cmpf oge, %134, %135 : vector<8x128xf32>
    %cst_68 = arith.constant 1.000000e+00 : f32
    %cst_69 = arith.constant -1.000000e+00 : f32
    %137 = vector.broadcast %cst_68 : f32 to vector<8x128xf32>
    %138 = vector.broadcast %cst_69 : f32 to vector<8x128xf32>
    %139 = arith.select %136, %137, %138 : vector<8x128xi1>, vector<8x128xf32>
    %140 = math.absf %134 : vector<8x128xf32>
    %cst_70 = arith.constant 0.327591091 : f32
    %141 = vector.broadcast %cst_70 : f32 to vector<8x128xf32>
    %142 = arith.mulf %141, %140 : vector<8x128xf32>
    %cst_71 = arith.constant 1.000000e+00 : f32
    %143 = vector.broadcast %cst_71 : f32 to vector<8x128xf32>
    %144 = arith.addf %143, %142 : vector<8x128xf32>
    %cst_72 = arith.constant 1.000000e+00 : f32
    %145 = vector.broadcast %cst_72 : f32 to vector<8x128xf32>
    %146 = arith.divf %145, %144 : vector<8x128xf32>
    %cst_73 = arith.constant 1.06140542 : f32
    %147 = vector.broadcast %cst_73 : f32 to vector<8x128xf32>
    %148 = arith.mulf %147, %146 : vector<8x128xf32>
    %cst_74 = arith.constant 1.45315206 : f32
    %149 = vector.broadcast %cst_74 : f32 to vector<8x128xf32>
    %150 = arith.subf %148, %149 : vector<8x128xf32>
    %151 = arith.mulf %150, %146 : vector<8x128xf32>
    %cst_75 = arith.constant 1.42141378 : f32
    %152 = vector.broadcast %cst_75 : f32 to vector<8x128xf32>
    %153 = arith.addf %151, %152 : vector<8x128xf32>
    %154 = arith.mulf %153, %146 : vector<8x128xf32>
    %cst_76 = arith.constant 0.284496725 : f32
    %155 = vector.broadcast %cst_76 : f32 to vector<8x128xf32>
    %156 = arith.subf %154, %155 : vector<8x128xf32>
    %157 = arith.mulf %156, %146 : vector<8x128xf32>
    %cst_77 = arith.constant 0.254829586 : f32
    %158 = vector.broadcast %cst_77 : f32 to vector<8x128xf32>
    %159 = arith.addf %157, %158 : vector<8x128xf32>
    %160 = arith.mulf %159, %146 : vector<8x128xf32>
    %cst_78 = arith.constant 0.000000e+00 : f32
    %161 = vector.broadcast %cst_78 : f32 to vector<8x128xf32>
    %162 = arith.subf %161, %140 : vector<8x128xf32>
    %163 = arith.mulf %162, %140 : vector<8x128xf32>
    %164 = math.exp %163 : vector<8x128xf32>
    %165 = arith.mulf %160, %164 : vector<8x128xf32>
    %cst_79 = arith.constant 1.000000e+00 : f32
    %166 = vector.broadcast %cst_79 : f32 to vector<8x128xf32>
    %167 = arith.subf %166, %165 : vector<8x128xf32>
    %168 = arith.mulf %139, %167 : vector<8x128xf32>
    %cst_80 = arith.constant 1.000000e+00 : f32
    %169 = vector.broadcast %cst_80 : f32 to vector<8x128xf32>
    %170 = arith.addf %169, %168 : vector<8x128xf32>
    %171 = arith.mulf %132, %170 : vector<8x128xf32>
    %c0_81 = arith.constant 0 : index
    %c0_82 = arith.constant 0 : index
    %c0_83 = arith.constant 0 : index
    %172 = vector.load %arg16[%c0_81, %c0_82, %c0_83] : memref<4x128x32xf32, #tpu.memory_space<vmem>>, vector<1x128x32xf32>
    %173 = vector.shape_cast %172 : vector<1x128x32xf32> to vector<128x32xf32>
    %cst_84 = arith.constant dense<0.000000e+00> : vector<8x32xf32>
    %174 = tpu.matmul %171, %173, %cst_84 {dimension_numbers = #tpu.dot_dimension_numbers<[1], [0], [0], [1], [0, 0, 1, 1], [], []>} : vector<8x128xf32>, vector<128x32xf32>, vector<8x32xf32> -> vector<8x32xf32>
    %c0_85 = arith.constant 0 : index
    %c0_86 = arith.constant 0 : index
    %c0_87 = arith.constant 0 : index
    %175 = vector.load %arg17[%c0_85, %c0_86, %c0_87] : memref<4x1x32xf32, #tpu.memory_space<vmem>>, vector<1x1x32xf32>
    %176 = vector.shape_cast %175 : vector<1x1x32xf32> to vector<1x32xf32>
    %177 = vector.broadcast %176 : vector<1x32xf32> to vector<8x32xf32>
    %178 = arith.addf %174, %177 : vector<8x32xf32>
    %c0_88 = arith.constant 0 : index
    %c0_89 = arith.constant 0 : index
    %c0_90 = arith.constant 0 : index
    %179 = vector.load %arg18[%c0_88, %c0_89, %c0_90] : memref<4x1x32xf32, #tpu.memory_space<vmem>>, vector<1x1x32xf32>
    %180 = vector.shape_cast %179 : vector<1x1x32xf32> to vector<1x32xf32>
    %181 = vector.broadcast %180 : vector<1x32xf32> to vector<8x32xf32>
    %182 = arith.mulf %181, %178 : vector<8x32xf32>
    %183 = arith.addf %97, %182 : vector<8x32xf32>
    %c1 = arith.constant 1 : index
    %c0_91 = arith.constant 0 : index
    %c0_92 = arith.constant 0 : index
    %184 = vector.load %arg5[%c1, %c0_91, %c0_92] : memref<4x1x32xf32, #tpu.memory_space<vmem>>, vector<1x1x32xf32>
    %185 = vector.shape_cast %184 : vector<1x1x32xf32> to vector<1x32xf32>
    %c1_93 = arith.constant 1 : index
    %c0_94 = arith.constant 0 : index
    %c0_95 = arith.constant 0 : index
    %186 = vector.load %arg6[%c1_93, %c0_94, %c0_95] : memref<4x1x32xf32, #tpu.memory_space<vmem>>, vector<1x1x32xf32>
    %187 = vector.shape_cast %186 : vector<1x1x32xf32> to vector<1x32xf32>
    %cst_96 = arith.constant dense<0.000000e+00> : vector<8xf32>
    %188 = vector.multi_reduction <add>, %183, %cst_96 [1] : vector<8x32xf32> to vector<8xf32>
    %189 = vector.shape_cast %188 : vector<8xf32> to vector<8x1xf32>
    %cst_97 = arith.constant 3.200000e+01 : f32
    %190 = vector.broadcast %cst_97 : f32 to vector<8x1xf32>
    %191 = arith.divf %189, %190 : vector<8x1xf32>
    %192 = vector.broadcast %191 : vector<8x1xf32> to vector<8x32xf32>
    %193 = arith.subf %183, %192 : vector<8x32xf32>
    %194 = arith.mulf %193, %193 : vector<8x32xf32>
    %cst_98 = arith.constant dense<0.000000e+00> : vector<8xf32>
    %195 = vector.multi_reduction <add>, %194, %cst_98 [1] : vector<8x32xf32> to vector<8xf32>
    %196 = vector.shape_cast %195 : vector<8xf32> to vector<8x1xf32>
    %cst_99 = arith.constant 3.200000e+01 : f32
    %197 = vector.broadcast %cst_99 : f32 to vector<8x1xf32>
    %198 = arith.divf %196, %197 : vector<8x1xf32>
    %199 = vector.broadcast %191 : vector<8x1xf32> to vector<8x32xf32>
    %200 = arith.subf %183, %199 : vector<8x32xf32>
    %cst_100 = arith.constant 9.99999997E-7 : f32
    %201 = vector.broadcast %cst_100 : f32 to vector<8x1xf32>
    %202 = arith.addf %198, %201 : vector<8x1xf32>
    %203 = math.rsqrt %202 : vector<8x1xf32>
    %204 = vector.broadcast %203 : vector<8x1xf32> to vector<8x32xf32>
    %205 = arith.mulf %200, %204 : vector<8x32xf32>
    %206 = vector.broadcast %185 : vector<1x32xf32> to vector<8x32xf32>
    %207 = arith.mulf %205, %206 : vector<8x32xf32>
    %208 = vector.broadcast %187 : vector<1x32xf32> to vector<8x32xf32>
    %209 = arith.addf %207, %208 : vector<8x32xf32>
    %c1_101 = arith.constant 1 : index
    %c0_102 = arith.constant 0 : index
    %c0_103 = arith.constant 0 : index
    %210 = vector.load %arg7[%c1_101, %c0_102, %c0_103] : memref<4x32x96xf32, #tpu.memory_space<vmem>>, vector<1x32x96xf32>
    %211 = vector.shape_cast %210 : vector<1x32x96xf32> to vector<32x96xf32>
    %cst_104 = arith.constant dense<0.000000e+00> : vector<8x96xf32>
    %212 = tpu.matmul %209, %211, %cst_104 {dimension_numbers = #tpu.dot_dimension_numbers<[1], [0], [0], [1], [0, 0, 1, 1], [], []>} : vector<8x32xf32>, vector<32x96xf32>, vector<8x96xf32> -> vector<8x96xf32>
    %c1_105 = arith.constant 1 : index
    %c0_106 = arith.constant 0 : index
    %c0_107 = arith.constant 0 : index
    %213 = vector.load %arg8[%c1_105, %c0_106, %c0_107] : memref<4x1x96xf32, #tpu.memory_space<vmem>>, vector<1x1x96xf32>
    %214 = vector.shape_cast %213 : vector<1x1x96xf32> to vector<1x96xf32>
    %215 = vector.broadcast %214 : vector<1x96xf32> to vector<8x96xf32>
    %216 = arith.addf %212, %215 : vector<8x96xf32>
    %217 = vector.extract_strided_slice %216 {offsets = [0, 0], sizes = [8, 32], strides = [1, 1]} : vector<8x96xf32> to vector<8x32xf32>
    %218 = vector.extract_strided_slice %216 {offsets = [0, 32], sizes = [8, 32], strides = [1, 1]} : vector<8x96xf32> to vector<8x32xf32>
    %219 = vector.extract_strided_slice %216 {offsets = [0, 64], sizes = [8, 32], strides = [1, 1]} : vector<8x96xf32> to vector<8x32xf32>
    %220 = vector.extract_strided_slice %217 {offsets = [0, 0], sizes = [8, 16], strides = [1, 1]} : vector<8x32xf32> to vector<8x16xf32>
    %221 = vector.extract_strided_slice %218 {offsets = [0, 0], sizes = [8, 16], strides = [1, 1]} : vector<8x32xf32> to vector<8x16xf32>
    %cst_108 = arith.constant dense<0.000000e+00> : vector<8x8xf32>
    %222 = tpu.matmul %220, %221, %cst_108 {dimension_numbers = #tpu.dot_dimension_numbers<[1], [1], [0], [0], [0, 0, 1, 0], [], []>} : vector<8x16xf32>, vector<8x16xf32>, vector<8x8xf32> -> vector<8x8xf32>
    %223 = vector.broadcast %14 : vector<1x8xf32> to vector<8x8xf32>
    %224 = arith.addf %222, %223 : vector<8x8xf32>
    %cst_109 = arith.constant dense<0xFF800000> : vector<8xf32>
    %225 = vector.multi_reduction <maximumf>, %224, %cst_109 [1] : vector<8x8xf32> to vector<8xf32>
    %226 = vector.shape_cast %225 : vector<8xf32> to vector<8x1xf32>
    %227 = vector.broadcast %226 : vector<8x1xf32> to vector<8x8xf32>
    %228 = arith.subf %224, %227 : vector<8x8xf32>
    %229 = math.exp %228 : vector<8x8xf32>
    %cst_110 = arith.constant dense<0.000000e+00> : vector<8xf32>
    %230 = vector.multi_reduction <add>, %229, %cst_110 [1] : vector<8x8xf32> to vector<8xf32>
    %231 = vector.shape_cast %230 : vector<8xf32> to vector<8x1xf32>
    %232 = tpu.reciprocal %231 {approx = true} : vector<8x1xf32> -> vector<8x1xf32>
    %233 = vector.broadcast %232 : vector<8x1xf32> to vector<8x8xf32>
    %234 = arith.mulf %229, %233 : vector<8x8xf32>
    %235 = vector.extract_strided_slice %219 {offsets = [0, 0], sizes = [8, 16], strides = [1, 1]} : vector<8x32xf32> to vector<8x16xf32>
    %cst_111 = arith.constant dense<0.000000e+00> : vector<8x16xf32>
    %236 = tpu.matmul %234, %235, %cst_111 {dimension_numbers = #tpu.dot_dimension_numbers<[1], [0], [0], [1], [0, 0, 1, 1], [], []>} : vector<8x8xf32>, vector<8x16xf32>, vector<8x16xf32> -> vector<8x16xf32>
    %237 = vector.extract_strided_slice %217 {offsets = [0, 16], sizes = [8, 16], strides = [1, 1]} : vector<8x32xf32> to vector<8x16xf32>
    %238 = vector.extract_strided_slice %218 {offsets = [0, 16], sizes = [8, 16], strides = [1, 1]} : vector<8x32xf32> to vector<8x16xf32>
    %cst_112 = arith.constant dense<0.000000e+00> : vector<8x8xf32>
    %239 = tpu.matmul %237, %238, %cst_112 {dimension_numbers = #tpu.dot_dimension_numbers<[1], [1], [0], [0], [0, 0, 1, 0], [], []>} : vector<8x16xf32>, vector<8x16xf32>, vector<8x8xf32> -> vector<8x8xf32>
    %240 = vector.broadcast %14 : vector<1x8xf32> to vector<8x8xf32>
    %241 = arith.addf %239, %240 : vector<8x8xf32>
    %cst_113 = arith.constant dense<0xFF800000> : vector<8xf32>
    %242 = vector.multi_reduction <maximumf>, %241, %cst_113 [1] : vector<8x8xf32> to vector<8xf32>
    %243 = vector.shape_cast %242 : vector<8xf32> to vector<8x1xf32>
    %244 = vector.broadcast %243 : vector<8x1xf32> to vector<8x8xf32>
    %245 = arith.subf %241, %244 : vector<8x8xf32>
    %246 = math.exp %245 : vector<8x8xf32>
    %cst_114 = arith.constant dense<0.000000e+00> : vector<8xf32>
    %247 = vector.multi_reduction <add>, %246, %cst_114 [1] : vector<8x8xf32> to vector<8xf32>
    %248 = vector.shape_cast %247 : vector<8xf32> to vector<8x1xf32>
    %249 = tpu.reciprocal %248 {approx = true} : vector<8x1xf32> -> vector<8x1xf32>
    %250 = vector.broadcast %249 : vector<8x1xf32> to vector<8x8xf32>
    %251 = arith.mulf %246, %250 : vector<8x8xf32>
    %252 = vector.extract_strided_slice %219 {offsets = [0, 16], sizes = [8, 16], strides = [1, 1]} : vector<8x32xf32> to vector<8x16xf32>
    %cst_115 = arith.constant dense<0.000000e+00> : vector<8x16xf32>
    %253 = tpu.matmul %251, %252, %cst_115 {dimension_numbers = #tpu.dot_dimension_numbers<[1], [0], [0], [1], [0, 0, 1, 1], [], []>} : vector<8x8xf32>, vector<8x16xf32>, vector<8x16xf32> -> vector<8x16xf32>
    %254 = tpu.concatenate %236, %253 in 1 : vector<8x16xf32>, vector<8x16xf32> -> vector<8x32xf32>
    %c1_116 = arith.constant 1 : index
    %c0_117 = arith.constant 0 : index
    %c0_118 = arith.constant 0 : index
    %255 = vector.load %arg9[%c1_116, %c0_117, %c0_118] : memref<4x32x32xf32, #tpu.memory_space<vmem>>, vector<1x32x32xf32>
    %256 = vector.shape_cast %255 : vector<1x32x32xf32> to vector<32x32xf32>
    %cst_119 = arith.constant dense<0.000000e+00> : vector<8x32xf32>
    %257 = tpu.matmul %254, %256, %cst_119 {dimension_numbers = #tpu.dot_dimension_numbers<[1], [0], [0], [1], [0, 0, 1, 1], [], []>} : vector<8x32xf32>, vector<32x32xf32>, vector<8x32xf32> -> vector<8x32xf32>
    %c1_120 = arith.constant 1 : index
    %c0_121 = arith.constant 0 : index
    %c0_122 = arith.constant 0 : index
    %258 = vector.load %arg10[%c1_120, %c0_121, %c0_122] : memref<4x1x32xf32, #tpu.memory_space<vmem>>, vector<1x1x32xf32>
    %259 = vector.shape_cast %258 : vector<1x1x32xf32> to vector<1x32xf32>
    %260 = vector.broadcast %259 : vector<1x32xf32> to vector<8x32xf32>
    %261 = arith.addf %257, %260 : vector<8x32xf32>
    %c1_123 = arith.constant 1 : index
    %c0_124 = arith.constant 0 : index
    %c0_125 = arith.constant 0 : index
    %262 = vector.load %arg11[%c1_123, %c0_124, %c0_125] : memref<4x1x32xf32, #tpu.memory_space<vmem>>, vector<1x1x32xf32>
    %263 = vector.shape_cast %262 : vector<1x1x32xf32> to vector<1x32xf32>
    %264 = vector.broadcast %263 : vector<1x32xf32> to vector<8x32xf32>
    %265 = arith.mulf %264, %261 : vector<8x32xf32>
    %266 = arith.addf %183, %265 : vector<8x32xf32>
    %c1_126 = arith.constant 1 : index
    %c0_127 = arith.constant 0 : index
    %c0_128 = arith.constant 0 : index
    %267 = vector.load %arg12[%c1_126, %c0_127, %c0_128] : memref<4x1x32xf32, #tpu.memory_space<vmem>>, vector<1x1x32xf32>
    %268 = vector.shape_cast %267 : vector<1x1x32xf32> to vector<1x32xf32>
    %c1_129 = arith.constant 1 : index
    %c0_130 = arith.constant 0 : index
    %c0_131 = arith.constant 0 : index
    %269 = vector.load %arg13[%c1_129, %c0_130, %c0_131] : memref<4x1x32xf32, #tpu.memory_space<vmem>>, vector<1x1x32xf32>
    %270 = vector.shape_cast %269 : vector<1x1x32xf32> to vector<1x32xf32>
    %cst_132 = arith.constant dense<0.000000e+00> : vector<8xf32>
    %271 = vector.multi_reduction <add>, %266, %cst_132 [1] : vector<8x32xf32> to vector<8xf32>
    %272 = vector.shape_cast %271 : vector<8xf32> to vector<8x1xf32>
    %cst_133 = arith.constant 3.200000e+01 : f32
    %273 = vector.broadcast %cst_133 : f32 to vector<8x1xf32>
    %274 = arith.divf %272, %273 : vector<8x1xf32>
    %275 = vector.broadcast %274 : vector<8x1xf32> to vector<8x32xf32>
    %276 = arith.subf %266, %275 : vector<8x32xf32>
    %277 = arith.mulf %276, %276 : vector<8x32xf32>
    %cst_134 = arith.constant dense<0.000000e+00> : vector<8xf32>
    %278 = vector.multi_reduction <add>, %277, %cst_134 [1] : vector<8x32xf32> to vector<8xf32>
    %279 = vector.shape_cast %278 : vector<8xf32> to vector<8x1xf32>
    %cst_135 = arith.constant 3.200000e+01 : f32
    %280 = vector.broadcast %cst_135 : f32 to vector<8x1xf32>
    %281 = arith.divf %279, %280 : vector<8x1xf32>
    %282 = vector.broadcast %274 : vector<8x1xf32> to vector<8x32xf32>
    %283 = arith.subf %266, %282 : vector<8x32xf32>
    %cst_136 = arith.constant 9.99999997E-7 : f32
    %284 = vector.broadcast %cst_136 : f32 to vector<8x1xf32>
    %285 = arith.addf %281, %284 : vector<8x1xf32>
    %286 = math.rsqrt %285 : vector<8x1xf32>
    %287 = vector.broadcast %286 : vector<8x1xf32> to vector<8x32xf32>
    %288 = arith.mulf %283, %287 : vector<8x32xf32>
    %289 = vector.broadcast %268 : vector<1x32xf32> to vector<8x32xf32>
    %290 = arith.mulf %288, %289 : vector<8x32xf32>
    %291 = vector.broadcast %270 : vector<1x32xf32> to vector<8x32xf32>
    %292 = arith.addf %290, %291 : vector<8x32xf32>
    %c1_137 = arith.constant 1 : index
    %c0_138 = arith.constant 0 : index
    %c0_139 = arith.constant 0 : index
    %293 = vector.load %arg14[%c1_137, %c0_138, %c0_139] : memref<4x32x128xf32, #tpu.memory_space<vmem>>, vector<1x32x128xf32>
    %294 = vector.shape_cast %293 : vector<1x32x128xf32> to vector<32x128xf32>
    %cst_140 = arith.constant dense<0.000000e+00> : vector<8x128xf32>
    %295 = tpu.matmul %292, %294, %cst_140 {dimension_numbers = #tpu.dot_dimension_numbers<[1], [0], [0], [1], [0, 0, 1, 1], [], []>} : vector<8x32xf32>, vector<32x128xf32>, vector<8x128xf32> -> vector<8x128xf32>
    %c1_141 = arith.constant 1 : index
    %c0_142 = arith.constant 0 : index
    %c0_143 = arith.constant 0 : index
    %296 = vector.load %arg15[%c1_141, %c0_142, %c0_143] : memref<4x1x128xf32, #tpu.memory_space<vmem>>, vector<1x1x128xf32>
    %297 = vector.shape_cast %296 : vector<1x1x128xf32> to vector<1x128xf32>
    %298 = vector.broadcast %297 : vector<1x128xf32> to vector<8x128xf32>
    %299 = arith.addf %295, %298 : vector<8x128xf32>
    %cst_144 = arith.constant 5.000000e-01 : f32
    %300 = vector.broadcast %cst_144 : f32 to vector<8x128xf32>
    %301 = arith.mulf %300, %299 : vector<8x128xf32>
    %cst_145 = arith.constant 0.707106769 : f32
    %302 = vector.broadcast %cst_145 : f32 to vector<8x128xf32>
    %303 = arith.mulf %299, %302 : vector<8x128xf32>
    %cst_146 = arith.constant 0.000000e+00 : f32
    %304 = vector.broadcast %cst_146 : f32 to vector<8x128xf32>
    %305 = arith.cmpf oge, %303, %304 : vector<8x128xf32>
    %cst_147 = arith.constant 1.000000e+00 : f32
    %cst_148 = arith.constant -1.000000e+00 : f32
    %306 = vector.broadcast %cst_147 : f32 to vector<8x128xf32>
    %307 = vector.broadcast %cst_148 : f32 to vector<8x128xf32>
    %308 = arith.select %305, %306, %307 : vector<8x128xi1>, vector<8x128xf32>
    %309 = math.absf %303 : vector<8x128xf32>
    %cst_149 = arith.constant 0.327591091 : f32
    %310 = vector.broadcast %cst_149 : f32 to vector<8x128xf32>
    %311 = arith.mulf %310, %309 : vector<8x128xf32>
    %cst_150 = arith.constant 1.000000e+00 : f32
    %312 = vector.broadcast %cst_150 : f32 to vector<8x128xf32>
    %313 = arith.addf %312, %311 : vector<8x128xf32>
    %cst_151 = arith.constant 1.000000e+00 : f32
    %314 = vector.broadcast %cst_151 : f32 to vector<8x128xf32>
    %315 = arith.divf %314, %313 : vector<8x128xf32>
    %cst_152 = arith.constant 1.06140542 : f32
    %316 = vector.broadcast %cst_152 : f32 to vector<8x128xf32>
    %317 = arith.mulf %316, %315 : vector<8x128xf32>
    %cst_153 = arith.constant 1.45315206 : f32
    %318 = vector.broadcast %cst_153 : f32 to vector<8x128xf32>
    %319 = arith.subf %317, %318 : vector<8x128xf32>
    %320 = arith.mulf %319, %315 : vector<8x128xf32>
    %cst_154 = arith.constant 1.42141378 : f32
    %321 = vector.broadcast %cst_154 : f32 to vector<8x128xf32>
    %322 = arith.addf %320, %321 : vector<8x128xf32>
    %323 = arith.mulf %322, %315 : vector<8x128xf32>
    %cst_155 = arith.constant 0.284496725 : f32
    %324 = vector.broadcast %cst_155 : f32 to vector<8x128xf32>
    %325 = arith.subf %323, %324 : vector<8x128xf32>
    %326 = arith.mulf %325, %315 : vector<8x128xf32>
    %cst_156 = arith.constant 0.254829586 : f32
    %327 = vector.broadcast %cst_156 : f32 to vector<8x128xf32>
    %328 = arith.addf %326, %327 : vector<8x128xf32>
    %329 = arith.mulf %328, %315 : vector<8x128xf32>
    %cst_157 = arith.constant 0.000000e+00 : f32
    %330 = vector.broadcast %cst_157 : f32 to vector<8x128xf32>
    %331 = arith.subf %330, %309 : vector<8x128xf32>
    %332 = arith.mulf %331, %309 : vector<8x128xf32>
    %333 = math.exp %332 : vector<8x128xf32>
    %334 = arith.mulf %329, %333 : vector<8x128xf32>
    %cst_158 = arith.constant 1.000000e+00 : f32
    %335 = vector.broadcast %cst_158 : f32 to vector<8x128xf32>
    %336 = arith.subf %335, %334 : vector<8x128xf32>
    %337 = arith.mulf %308, %336 : vector<8x128xf32>
    %cst_159 = arith.constant 1.000000e+00 : f32
    %338 = vector.broadcast %cst_159 : f32 to vector<8x128xf32>
    %339 = arith.addf %338, %337 : vector<8x128xf32>
    %340 = arith.mulf %301, %339 : vector<8x128xf32>
    %c1_160 = arith.constant 1 : index
    %c0_161 = arith.constant 0 : index
    %c0_162 = arith.constant 0 : index
    %341 = vector.load %arg16[%c1_160, %c0_161, %c0_162] : memref<4x128x32xf32, #tpu.memory_space<vmem>>, vector<1x128x32xf32>
    %342 = vector.shape_cast %341 : vector<1x128x32xf32> to vector<128x32xf32>
    %cst_163 = arith.constant dense<0.000000e+00> : vector<8x32xf32>
    %343 = tpu.matmul %340, %342, %cst_163 {dimension_numbers = #tpu.dot_dimension_numbers<[1], [0], [0], [1], [0, 0, 1, 1], [], []>} : vector<8x128xf32>, vector<128x32xf32>, vector<8x32xf32> -> vector<8x32xf32>
    %c1_164 = arith.constant 1 : index
    %c0_165 = arith.constant 0 : index
    %c0_166 = arith.constant 0 : index
    %344 = vector.load %arg17[%c1_164, %c0_165, %c0_166] : memref<4x1x32xf32, #tpu.memory_space<vmem>>, vector<1x1x32xf32>
    %345 = vector.shape_cast %344 : vector<1x1x32xf32> to vector<1x32xf32>
    %346 = vector.broadcast %345 : vector<1x32xf32> to vector<8x32xf32>
    %347 = arith.addf %343, %346 : vector<8x32xf32>
    %c1_167 = arith.constant 1 : index
    %c0_168 = arith.constant 0 : index
    %c0_169 = arith.constant 0 : index
    %348 = vector.load %arg18[%c1_167, %c0_168, %c0_169] : memref<4x1x32xf32, #tpu.memory_space<vmem>>, vector<1x1x32xf32>
    %349 = vector.shape_cast %348 : vector<1x1x32xf32> to vector<1x32xf32>
    %350 = vector.broadcast %349 : vector<1x32xf32> to vector<8x32xf32>
    %351 = arith.mulf %350, %347 : vector<8x32xf32>
    %352 = arith.addf %266, %351 : vector<8x32xf32>
    %c0_170 = arith.constant 0 : index
    %c0_171 = arith.constant 0 : index
    %353 = vector.load %arg19[%c0_170, %c0_171] : memref<1x32xf32, #tpu.memory_space<vmem>>, vector<1x32xf32>
    %c0_172 = arith.constant 0 : index
    %c0_173 = arith.constant 0 : index
    %354 = vector.load %arg20[%c0_172, %c0_173] : memref<1x32xf32, #tpu.memory_space<vmem>>, vector<1x32xf32>
    %cst_174 = arith.constant dense<0.000000e+00> : vector<8xf32>
    %355 = vector.multi_reduction <add>, %352, %cst_174 [1] : vector<8x32xf32> to vector<8xf32>
    %356 = vector.shape_cast %355 : vector<8xf32> to vector<8x1xf32>
    %cst_175 = arith.constant 3.200000e+01 : f32
    %357 = vector.broadcast %cst_175 : f32 to vector<8x1xf32>
    %358 = arith.divf %356, %357 : vector<8x1xf32>
    %359 = vector.broadcast %358 : vector<8x1xf32> to vector<8x32xf32>
    %360 = arith.subf %352, %359 : vector<8x32xf32>
    %361 = arith.mulf %360, %360 : vector<8x32xf32>
    %cst_176 = arith.constant dense<0.000000e+00> : vector<8xf32>
    %362 = vector.multi_reduction <add>, %361, %cst_176 [1] : vector<8x32xf32> to vector<8xf32>
    %363 = vector.shape_cast %362 : vector<8xf32> to vector<8x1xf32>
    %cst_177 = arith.constant 3.200000e+01 : f32
    %364 = vector.broadcast %cst_177 : f32 to vector<8x1xf32>
    %365 = arith.divf %363, %364 : vector<8x1xf32>
    %366 = vector.broadcast %358 : vector<8x1xf32> to vector<8x32xf32>
    %367 = arith.subf %352, %366 : vector<8x32xf32>
    %cst_178 = arith.constant 9.99999997E-7 : f32
    %368 = vector.broadcast %cst_178 : f32 to vector<8x1xf32>
    %369 = arith.addf %365, %368 : vector<8x1xf32>
    %370 = math.rsqrt %369 : vector<8x1xf32>
    %371 = vector.broadcast %370 : vector<8x1xf32> to vector<8x32xf32>
    %372 = arith.mulf %367, %371 : vector<8x32xf32>
    %373 = vector.broadcast %353 : vector<1x32xf32> to vector<8x32xf32>
    %374 = arith.mulf %372, %373 : vector<8x32xf32>
    %375 = vector.broadcast %354 : vector<1x32xf32> to vector<8x32xf32>
    %376 = arith.addf %374, %375 : vector<8x32xf32>
    %377 = vector.extract_strided_slice %376 {offsets = [1, 0], sizes = [4, 32], strides = [1, 1]} : vector<8x32xf32> to vector<4x32xf32>
    %c0_179 = arith.constant 0 : index
    %c0_180 = arith.constant 0 : index
    %c0_181 = arith.constant 0 : index
    %c0_182 = arith.constant 0 : index
    %378 = vector.load %arg21[%c0_179, %c0_180, %c0_181, %c0_182] : memref<2x1x4x32xf32, #tpu.memory_space<vmem>>, vector<1x1x4x32xf32>
    %379 = vector.shape_cast %378 : vector<1x1x4x32xf32> to vector<4x32xf32>
    %380 = vector.shape_cast %377 : vector<4x32xf32> to vector<1x1x4x32xf32>
    tpu.vector_store %arg21[%c0_179, %c0_180, %c0_181, %c0_182], %380 {strides = array<i32>} : memref<2x1x4x32xf32, #tpu.memory_space<vmem>>, vector<1x1x4x32xf32>,
    %c2 = arith.constant 2 : index
    %c0_183 = arith.constant 0 : index
    %c0_184 = arith.constant 0 : index
    %381 = vector.load %arg5[%c2, %c0_183, %c0_184] : memref<4x1x32xf32, #tpu.memory_space<vmem>>, vector<1x1x32xf32>
    %382 = vector.shape_cast %381 : vector<1x1x32xf32> to vector<1x32xf32>
    %c2_185 = arith.constant 2 : index
    %c0_186 = arith.constant 0 : index
    %c0_187 = arith.constant 0 : index
    %383 = vector.load %arg6[%c2_185, %c0_186, %c0_187] : memref<4x1x32xf32, #tpu.memory_space<vmem>>, vector<1x1x32xf32>
    %384 = vector.shape_cast %383 : vector<1x1x32xf32> to vector<1x32xf32>
    %cst_188 = arith.constant dense<0.000000e+00> : vector<8xf32>
    %385 = vector.multi_reduction <add>, %352, %cst_188 [1] : vector<8x32xf32> to vector<8xf32>
    %386 = vector.shape_cast %385 : vector<8xf32> to vector<8x1xf32>
    %cst_189 = arith.constant 3.200000e+01 : f32
    %387 = vector.broadcast %cst_189 : f32 to vector<8x1xf32>
    %388 = arith.divf %386, %387 : vector<8x1xf32>
    %389 = vector.broadcast %388 : vector<8x1xf32> to vector<8x32xf32>
    %390 = arith.subf %352, %389 : vector<8x32xf32>
    %391 = arith.mulf %390, %390 : vector<8x32xf32>
    %cst_190 = arith.constant dense<0.000000e+00> : vector<8xf32>
    %392 = vector.multi_reduction <add>, %391, %cst_190 [1] : vector<8x32xf32> to vector<8xf32>
    %393 = vector.shape_cast %392 : vector<8xf32> to vector<8x1xf32>
    %cst_191 = arith.constant 3.200000e+01 : f32
    %394 = vector.broadcast %cst_191 : f32 to vector<8x1xf32>
    %395 = arith.divf %393, %394 : vector<8x1xf32>
    %396 = vector.broadcast %388 : vector<8x1xf32> to vector<8x32xf32>
    %397 = arith.subf %352, %396 : vector<8x32xf32>
    %cst_192 = arith.constant 9.99999997E-7 : f32
    %398 = vector.broadcast %cst_192 : f32 to vector<8x1xf32>
    %399 = arith.addf %395, %398 : vector<8x1xf32>
    %400 = math.rsqrt %399 : vector<8x1xf32>
    %401 = vector.broadcast %400 : vector<8x1xf32> to vector<8x32xf32>
    %402 = arith.mulf %397, %401 : vector<8x32xf32>
    %403 = vector.broadcast %382 : vector<1x32xf32> to vector<8x32xf32>
    %404 = arith.mulf %402, %403 : vector<8x32xf32>
    %405 = vector.broadcast %384 : vector<1x32xf32> to vector<8x32xf32>
    %406 = arith.addf %404, %405 : vector<8x32xf32>
    %c2_193 = arith.constant 2 : index
    %c0_194 = arith.constant 0 : index
    %c0_195 = arith.constant 0 : index
    %407 = vector.load %arg7[%c2_193, %c0_194, %c0_195] : memref<4x32x96xf32, #tpu.memory_space<vmem>>, vector<1x32x96xf32>
    %408 = vector.shape_cast %407 : vector<1x32x96xf32> to vector<32x96xf32>
    %cst_196 = arith.constant dense<0.000000e+00> : vector<8x96xf32>
    %409 = tpu.matmul %406, %408, %cst_196 {dimension_numbers = #tpu.dot_dimension_numbers<[1], [0], [0], [1], [0, 0, 1, 1], [], []>} : vector<8x32xf32>, vector<32x96xf32>, vector<8x96xf32> -> vector<8x96xf32>
    %c2_197 = arith.constant 2 : index
    %c0_198 = arith.constant 0 : index
    %c0_199 = arith.constant 0 : index
    %410 = vector.load %arg8[%c2_197, %c0_198, %c0_199] : memref<4x1x96xf32, #tpu.memory_space<vmem>>, vector<1x1x96xf32>
    %411 = vector.shape_cast %410 : vector<1x1x96xf32> to vector<1x96xf32>
    %412 = vector.broadcast %411 : vector<1x96xf32> to vector<8x96xf32>
    %413 = arith.addf %409, %412 : vector<8x96xf32>
    %414 = vector.extract_strided_slice %413 {offsets = [0, 0], sizes = [8, 32], strides = [1, 1]} : vector<8x96xf32> to vector<8x32xf32>
    %415 = vector.extract_strided_slice %413 {offsets = [0, 32], sizes = [8, 32], strides = [1, 1]} : vector<8x96xf32> to vector<8x32xf32>
    %416 = vector.extract_strided_slice %413 {offsets = [0, 64], sizes = [8, 32], strides = [1, 1]} : vector<8x96xf32> to vector<8x32xf32>
    %417 = vector.extract_strided_slice %414 {offsets = [0, 0], sizes = [8, 16], strides = [1, 1]} : vector<8x32xf32> to vector<8x16xf32>
    %418 = vector.extract_strided_slice %415 {offsets = [0, 0], sizes = [8, 16], strides = [1, 1]} : vector<8x32xf32> to vector<8x16xf32>
    %cst_200 = arith.constant dense<0.000000e+00> : vector<8x8xf32>
    %419 = tpu.matmul %417, %418, %cst_200 {dimension_numbers = #tpu.dot_dimension_numbers<[1], [1], [0], [0], [0, 0, 1, 0], [], []>} : vector<8x16xf32>, vector<8x16xf32>, vector<8x8xf32> -> vector<8x8xf32>
    %420 = vector.broadcast %14 : vector<1x8xf32> to vector<8x8xf32>
    %421 = arith.addf %419, %420 : vector<8x8xf32>
    %cst_201 = arith.constant dense<0xFF800000> : vector<8xf32>
    %422 = vector.multi_reduction <maximumf>, %421, %cst_201 [1] : vector<8x8xf32> to vector<8xf32>
    %423 = vector.shape_cast %422 : vector<8xf32> to vector<8x1xf32>
    %424 = vector.broadcast %423 : vector<8x1xf32> to vector<8x8xf32>
    %425 = arith.subf %421, %424 : vector<8x8xf32>
    %426 = math.exp %425 : vector<8x8xf32>
    %cst_202 = arith.constant dense<0.000000e+00> : vector<8xf32>
    %427 = vector.multi_reduction <add>, %426, %cst_202 [1] : vector<8x8xf32> to vector<8xf32>
    %428 = vector.shape_cast %427 : vector<8xf32> to vector<8x1xf32>
    %429 = tpu.reciprocal %428 {approx = true} : vector<8x1xf32> -> vector<8x1xf32>
    %430 = vector.broadcast %429 : vector<8x1xf32> to vector<8x8xf32>
    %431 = arith.mulf %426, %430 : vector<8x8xf32>
    %432 = vector.extract_strided_slice %416 {offsets = [0, 0], sizes = [8, 16], strides = [1, 1]} : vector<8x32xf32> to vector<8x16xf32>
    %cst_203 = arith.constant dense<0.000000e+00> : vector<8x16xf32>
    %433 = tpu.matmul %431, %432, %cst_203 {dimension_numbers = #tpu.dot_dimension_numbers<[1], [0], [0], [1], [0, 0, 1, 1], [], []>} : vector<8x8xf32>, vector<8x16xf32>, vector<8x16xf32> -> vector<8x16xf32>
    %434 = vector.extract_strided_slice %414 {offsets = [0, 16], sizes = [8, 16], strides = [1, 1]} : vector<8x32xf32> to vector<8x16xf32>
    %435 = vector.extract_strided_slice %415 {offsets = [0, 16], sizes = [8, 16], strides = [1, 1]} : vector<8x32xf32> to vector<8x16xf32>
    %cst_204 = arith.constant dense<0.000000e+00> : vector<8x8xf32>
    %436 = tpu.matmul %434, %435, %cst_204 {dimension_numbers = #tpu.dot_dimension_numbers<[1], [1], [0], [0], [0, 0, 1, 0], [], []>} : vector<8x16xf32>, vector<8x16xf32>, vector<8x8xf32> -> vector<8x8xf32>
    %437 = vector.broadcast %14 : vector<1x8xf32> to vector<8x8xf32>
    %438 = arith.addf %436, %437 : vector<8x8xf32>
    %cst_205 = arith.constant dense<0xFF800000> : vector<8xf32>
    %439 = vector.multi_reduction <maximumf>, %438, %cst_205 [1] : vector<8x8xf32> to vector<8xf32>
    %440 = vector.shape_cast %439 : vector<8xf32> to vector<8x1xf32>
    %441 = vector.broadcast %440 : vector<8x1xf32> to vector<8x8xf32>
    %442 = arith.subf %438, %441 : vector<8x8xf32>
    %443 = math.exp %442 : vector<8x8xf32>
    %cst_206 = arith.constant dense<0.000000e+00> : vector<8xf32>
    %444 = vector.multi_reduction <add>, %443, %cst_206 [1] : vector<8x8xf32> to vector<8xf32>
    %445 = vector.shape_cast %444 : vector<8xf32> to vector<8x1xf32>
    %446 = tpu.reciprocal %445 {approx = true} : vector<8x1xf32> -> vector<8x1xf32>
    %447 = vector.broadcast %446 : vector<8x1xf32> to vector<8x8xf32>
    %448 = arith.mulf %443, %447 : vector<8x8xf32>
    %449 = vector.extract_strided_slice %416 {offsets = [0, 16], sizes = [8, 16], strides = [1, 1]} : vector<8x32xf32> to vector<8x16xf32>
    %cst_207 = arith.constant dense<0.000000e+00> : vector<8x16xf32>
    %450 = tpu.matmul %448, %449, %cst_207 {dimension_numbers = #tpu.dot_dimension_numbers<[1], [0], [0], [1], [0, 0, 1, 1], [], []>} : vector<8x8xf32>, vector<8x16xf32>, vector<8x16xf32> -> vector<8x16xf32>
    %451 = tpu.concatenate %433, %450 in 1 : vector<8x16xf32>, vector<8x16xf32> -> vector<8x32xf32>
    %c2_208 = arith.constant 2 : index
    %c0_209 = arith.constant 0 : index
    %c0_210 = arith.constant 0 : index
    %452 = vector.load %arg9[%c2_208, %c0_209, %c0_210] : memref<4x32x32xf32, #tpu.memory_space<vmem>>, vector<1x32x32xf32>
    %453 = vector.shape_cast %452 : vector<1x32x32xf32> to vector<32x32xf32>
    %cst_211 = arith.constant dense<0.000000e+00> : vector<8x32xf32>
    %454 = tpu.matmul %451, %453, %cst_211 {dimension_numbers = #tpu.dot_dimension_numbers<[1], [0], [0], [1], [0, 0, 1, 1], [], []>} : vector<8x32xf32>, vector<32x32xf32>, vector<8x32xf32> -> vector<8x32xf32>
    %c2_212 = arith.constant 2 : index
    %c0_213 = arith.constant 0 : index
    %c0_214 = arith.constant 0 : index
    %455 = vector.load %arg10[%c2_212, %c0_213, %c0_214] : memref<4x1x32xf32, #tpu.memory_space<vmem>>, vector<1x1x32xf32>
    %456 = vector.shape_cast %455 : vector<1x1x32xf32> to vector<1x32xf32>
    %457 = vector.broadcast %456 : vector<1x32xf32> to vector<8x32xf32>
    %458 = arith.addf %454, %457 : vector<8x32xf32>
    %c2_215 = arith.constant 2 : index
    %c0_216 = arith.constant 0 : index
    %c0_217 = arith.constant 0 : index
    %459 = vector.load %arg11[%c2_215, %c0_216, %c0_217] : memref<4x1x32xf32, #tpu.memory_space<vmem>>, vector<1x1x32xf32>
    %460 = vector.shape_cast %459 : vector<1x1x32xf32> to vector<1x32xf32>
    %461 = vector.broadcast %460 : vector<1x32xf32> to vector<8x32xf32>
    %462 = arith.mulf %461, %458 : vector<8x32xf32>
    %463 = arith.addf %352, %462 : vector<8x32xf32>
    %c2_218 = arith.constant 2 : index
    %c0_219 = arith.constant 0 : index
    %c0_220 = arith.constant 0 : index
    %464 = vector.load %arg12[%c2_218, %c0_219, %c0_220] : memref<4x1x32xf32, #tpu.memory_space<vmem>>, vector<1x1x32xf32>
    %465 = vector.shape_cast %464 : vector<1x1x32xf32> to vector<1x32xf32>
    %c2_221 = arith.constant 2 : index
    %c0_222 = arith.constant 0 : index
    %c0_223 = arith.constant 0 : index
    %466 = vector.load %arg13[%c2_221, %c0_222, %c0_223] : memref<4x1x32xf32, #tpu.memory_space<vmem>>, vector<1x1x32xf32>
    %467 = vector.shape_cast %466 : vector<1x1x32xf32> to vector<1x32xf32>
    %cst_224 = arith.constant dense<0.000000e+00> : vector<8xf32>
    %468 = vector.multi_reduction <add>, %463, %cst_224 [1] : vector<8x32xf32> to vector<8xf32>
    %469 = vector.shape_cast %468 : vector<8xf32> to vector<8x1xf32>
    %cst_225 = arith.constant 3.200000e+01 : f32
    %470 = vector.broadcast %cst_225 : f32 to vector<8x1xf32>
    %471 = arith.divf %469, %470 : vector<8x1xf32>
    %472 = vector.broadcast %471 : vector<8x1xf32> to vector<8x32xf32>
    %473 = arith.subf %463, %472 : vector<8x32xf32>
    %474 = arith.mulf %473, %473 : vector<8x32xf32>
    %cst_226 = arith.constant dense<0.000000e+00> : vector<8xf32>
    %475 = vector.multi_reduction <add>, %474, %cst_226 [1] : vector<8x32xf32> to vector<8xf32>
    %476 = vector.shape_cast %475 : vector<8xf32> to vector<8x1xf32>
    %cst_227 = arith.constant 3.200000e+01 : f32
    %477 = vector.broadcast %cst_227 : f32 to vector<8x1xf32>
    %478 = arith.divf %476, %477 : vector<8x1xf32>
    %479 = vector.broadcast %471 : vector<8x1xf32> to vector<8x32xf32>
    %480 = arith.subf %463, %479 : vector<8x32xf32>
    %cst_228 = arith.constant 9.99999997E-7 : f32
    %481 = vector.broadcast %cst_228 : f32 to vector<8x1xf32>
    %482 = arith.addf %478, %481 : vector<8x1xf32>
    %483 = math.rsqrt %482 : vector<8x1xf32>
    %484 = vector.broadcast %483 : vector<8x1xf32> to vector<8x32xf32>
    %485 = arith.mulf %480, %484 : vector<8x32xf32>
    %486 = vector.broadcast %465 : vector<1x32xf32> to vector<8x32xf32>
    %487 = arith.mulf %485, %486 : vector<8x32xf32>
    %488 = vector.broadcast %467 : vector<1x32xf32> to vector<8x32xf32>
    %489 = arith.addf %487, %488 : vector<8x32xf32>
    %c2_229 = arith.constant 2 : index
    %c0_230 = arith.constant 0 : index
    %c0_231 = arith.constant 0 : index
    %490 = vector.load %arg14[%c2_229, %c0_230, %c0_231] : memref<4x32x128xf32, #tpu.memory_space<vmem>>, vector<1x32x128xf32>
    %491 = vector.shape_cast %490 : vector<1x32x128xf32> to vector<32x128xf32>
    %cst_232 = arith.constant dense<0.000000e+00> : vector<8x128xf32>
    %492 = tpu.matmul %489, %491, %cst_232 {dimension_numbers = #tpu.dot_dimension_numbers<[1], [0], [0], [1], [0, 0, 1, 1], [], []>} : vector<8x32xf32>, vector<32x128xf32>, vector<8x128xf32> -> vector<8x128xf32>
    %c2_233 = arith.constant 2 : index
    %c0_234 = arith.constant 0 : index
    %c0_235 = arith.constant 0 : index
    %493 = vector.load %arg15[%c2_233, %c0_234, %c0_235] : memref<4x1x128xf32, #tpu.memory_space<vmem>>, vector<1x1x128xf32>
    %494 = vector.shape_cast %493 : vector<1x1x128xf32> to vector<1x128xf32>
    %495 = vector.broadcast %494 : vector<1x128xf32> to vector<8x128xf32>
    %496 = arith.addf %492, %495 : vector<8x128xf32>
    %cst_236 = arith.constant 5.000000e-01 : f32
    %497 = vector.broadcast %cst_236 : f32 to vector<8x128xf32>
    %498 = arith.mulf %497, %496 : vector<8x128xf32>
    %cst_237 = arith.constant 0.707106769 : f32
    %499 = vector.broadcast %cst_237 : f32 to vector<8x128xf32>
    %500 = arith.mulf %496, %499 : vector<8x128xf32>
    %cst_238 = arith.constant 0.000000e+00 : f32
    %501 = vector.broadcast %cst_238 : f32 to vector<8x128xf32>
    %502 = arith.cmpf oge, %500, %501 : vector<8x128xf32>
    %cst_239 = arith.constant 1.000000e+00 : f32
    %cst_240 = arith.constant -1.000000e+00 : f32
    %503 = vector.broadcast %cst_239 : f32 to vector<8x128xf32>
    %504 = vector.broadcast %cst_240 : f32 to vector<8x128xf32>
    %505 = arith.select %502, %503, %504 : vector<8x128xi1>, vector<8x128xf32>
    %506 = math.absf %500 : vector<8x128xf32>
    %cst_241 = arith.constant 0.327591091 : f32
    %507 = vector.broadcast %cst_241 : f32 to vector<8x128xf32>
    %508 = arith.mulf %507, %506 : vector<8x128xf32>
    %cst_242 = arith.constant 1.000000e+00 : f32
    %509 = vector.broadcast %cst_242 : f32 to vector<8x128xf32>
    %510 = arith.addf %509, %508 : vector<8x128xf32>
    %cst_243 = arith.constant 1.000000e+00 : f32
    %511 = vector.broadcast %cst_243 : f32 to vector<8x128xf32>
    %512 = arith.divf %511, %510 : vector<8x128xf32>
    %cst_244 = arith.constant 1.06140542 : f32
    %513 = vector.broadcast %cst_244 : f32 to vector<8x128xf32>
    %514 = arith.mulf %513, %512 : vector<8x128xf32>
    %cst_245 = arith.constant 1.45315206 : f32
    %515 = vector.broadcast %cst_245 : f32 to vector<8x128xf32>
    %516 = arith.subf %514, %515 : vector<8x128xf32>
    %517 = arith.mulf %516, %512 : vector<8x128xf32>
    %cst_246 = arith.constant 1.42141378 : f32
    %518 = vector.broadcast %cst_246 : f32 to vector<8x128xf32>
    %519 = arith.addf %517, %518 : vector<8x128xf32>
    %520 = arith.mulf %519, %512 : vector<8x128xf32>
    %cst_247 = arith.constant 0.284496725 : f32
    %521 = vector.broadcast %cst_247 : f32 to vector<8x128xf32>
    %522 = arith.subf %520, %521 : vector<8x128xf32>
    %523 = arith.mulf %522, %512 : vector<8x128xf32>
    %cst_248 = arith.constant 0.254829586 : f32
    %524 = vector.broadcast %cst_248 : f32 to vector<8x128xf32>
    %525 = arith.addf %523, %524 : vector<8x128xf32>
    %526 = arith.mulf %525, %512 : vector<8x128xf32>
    %cst_249 = arith.constant 0.000000e+00 : f32
    %527 = vector.broadcast %cst_249 : f32 to vector<8x128xf32>
    %528 = arith.subf %527, %506 : vector<8x128xf32>
    %529 = arith.mulf %528, %506 : vector<8x128xf32>
    %530 = math.exp %529 : vector<8x128xf32>
    %531 = arith.mulf %526, %530 : vector<8x128xf32>
    %cst_250 = arith.constant 1.000000e+00 : f32
    %532 = vector.broadcast %cst_250 : f32 to vector<8x128xf32>
    %533 = arith.subf %532, %531 : vector<8x128xf32>
    %534 = arith.mulf %505, %533 : vector<8x128xf32>
    %cst_251 = arith.constant 1.000000e+00 : f32
    %535 = vector.broadcast %cst_251 : f32 to vector<8x128xf32>
    %536 = arith.addf %535, %534 : vector<8x128xf32>
    %537 = arith.mulf %498, %536 : vector<8x128xf32>
    %c2_252 = arith.constant 2 : index
    %c0_253 = arith.constant 0 : index
    %c0_254 = arith.constant 0 : index
    %538 = vector.load %arg16[%c2_252, %c0_253, %c0_254] : memref<4x128x32xf32, #tpu.memory_space<vmem>>, vector<1x128x32xf32>
    %539 = vector.shape_cast %538 : vector<1x128x32xf32> to vector<128x32xf32>
    %cst_255 = arith.constant dense<0.000000e+00> : vector<8x32xf32>
    %540 = tpu.matmul %537, %539, %cst_255 {dimension_numbers = #tpu.dot_dimension_numbers<[1], [0], [0], [1], [0, 0, 1, 1], [], []>} : vector<8x128xf32>, vector<128x32xf32>, vector<8x32xf32> -> vector<8x32xf32>
    %c2_256 = arith.constant 2 : index
    %c0_257 = arith.constant 0 : index
    %c0_258 = arith.constant 0 : index
    %541 = vector.load %arg17[%c2_256, %c0_257, %c0_258] : memref<4x1x32xf32, #tpu.memory_space<vmem>>, vector<1x1x32xf32>
    %542 = vector.shape_cast %541 : vector<1x1x32xf32> to vector<1x32xf32>
    %543 = vector.broadcast %542 : vector<1x32xf32> to vector<8x32xf32>
    %544 = arith.addf %540, %543 : vector<8x32xf32>
    %c2_259 = arith.constant 2 : index
    %c0_260 = arith.constant 0 : index
    %c0_261 = arith.constant 0 : index
    %545 = vector.load %arg18[%c2_259, %c0_260, %c0_261] : memref<4x1x32xf32, #tpu.memory_space<vmem>>, vector<1x1x32xf32>
    %546 = vector.shape_cast %545 : vector<1x1x32xf32> to vector<1x32xf32>
    %547 = vector.broadcast %546 : vector<1x32xf32> to vector<8x32xf32>
    %548 = arith.mulf %547, %544 : vector<8x32xf32>
    %549 = arith.addf %463, %548 : vector<8x32xf32>
    %c3 = arith.constant 3 : index
    %c0_262 = arith.constant 0 : index
    %c0_263 = arith.constant 0 : index
    %550 = vector.load %arg5[%c3, %c0_262, %c0_263] : memref<4x1x32xf32, #tpu.memory_space<vmem>>, vector<1x1x32xf32>
    %551 = vector.shape_cast %550 : vector<1x1x32xf32> to vector<1x32xf32>
    %c3_264 = arith.constant 3 : index
    %c0_265 = arith.constant 0 : index
    %c0_266 = arith.constant 0 : index
    %552 = vector.load %arg6[%c3_264, %c0_265, %c0_266] : memref<4x1x32xf32, #tpu.memory_space<vmem>>, vector<1x1x32xf32>
    %553 = vector.shape_cast %552 : vector<1x1x32xf32> to vector<1x32xf32>
    %cst_267 = arith.constant dense<0.000000e+00> : vector<8xf32>
    %554 = vector.multi_reduction <add>, %549, %cst_267 [1] : vector<8x32xf32> to vector<8xf32>
    %555 = vector.shape_cast %554 : vector<8xf32> to vector<8x1xf32>
    %cst_268 = arith.constant 3.200000e+01 : f32
    %556 = vector.broadcast %cst_268 : f32 to vector<8x1xf32>
    %557 = arith.divf %555, %556 : vector<8x1xf32>
    %558 = vector.broadcast %557 : vector<8x1xf32> to vector<8x32xf32>
    %559 = arith.subf %549, %558 : vector<8x32xf32>
    %560 = arith.mulf %559, %559 : vector<8x32xf32>
    %cst_269 = arith.constant dense<0.000000e+00> : vector<8xf32>
    %561 = vector.multi_reduction <add>, %560, %cst_269 [1] : vector<8x32xf32> to vector<8xf32>
    %562 = vector.shape_cast %561 : vector<8xf32> to vector<8x1xf32>
    %cst_270 = arith.constant 3.200000e+01 : f32
    %563 = vector.broadcast %cst_270 : f32 to vector<8x1xf32>
    %564 = arith.divf %562, %563 : vector<8x1xf32>
    %565 = vector.broadcast %557 : vector<8x1xf32> to vector<8x32xf32>
    %566 = arith.subf %549, %565 : vector<8x32xf32>
    %cst_271 = arith.constant 9.99999997E-7 : f32
    %567 = vector.broadcast %cst_271 : f32 to vector<8x1xf32>
    %568 = arith.addf %564, %567 : vector<8x1xf32>
    %569 = math.rsqrt %568 : vector<8x1xf32>
    %570 = vector.broadcast %569 : vector<8x1xf32> to vector<8x32xf32>
    %571 = arith.mulf %566, %570 : vector<8x32xf32>
    %572 = vector.broadcast %551 : vector<1x32xf32> to vector<8x32xf32>
    %573 = arith.mulf %571, %572 : vector<8x32xf32>
    %574 = vector.broadcast %553 : vector<1x32xf32> to vector<8x32xf32>
    %575 = arith.addf %573, %574 : vector<8x32xf32>
    %c3_272 = arith.constant 3 : index
    %c0_273 = arith.constant 0 : index
    %c0_274 = arith.constant 0 : index
    %576 = vector.load %arg7[%c3_272, %c0_273, %c0_274] : memref<4x32x96xf32, #tpu.memory_space<vmem>>, vector<1x32x96xf32>
    %577 = vector.shape_cast %576 : vector<1x32x96xf32> to vector<32x96xf32>
    %cst_275 = arith.constant dense<0.000000e+00> : vector<8x96xf32>
    %578 = tpu.matmul %575, %577, %cst_275 {dimension_numbers = #tpu.dot_dimension_numbers<[1], [0], [0], [1], [0, 0, 1, 1], [], []>} : vector<8x32xf32>, vector<32x96xf32>, vector<8x96xf32> -> vector<8x96xf32>
    %c3_276 = arith.constant 3 : index
    %c0_277 = arith.constant 0 : index
    %c0_278 = arith.constant 0 : index
    %579 = vector.load %arg8[%c3_276, %c0_277, %c0_278] : memref<4x1x96xf32, #tpu.memory_space<vmem>>, vector<1x1x96xf32>
    %580 = vector.shape_cast %579 : vector<1x1x96xf32> to vector<1x96xf32>
    %581 = vector.broadcast %580 : vector<1x96xf32> to vector<8x96xf32>
    %582 = arith.addf %578, %581 : vector<8x96xf32>
    %583 = vector.extract_strided_slice %582 {offsets = [0, 0], sizes = [8, 32], strides = [1, 1]} : vector<8x96xf32> to vector<8x32xf32>
    %584 = vector.extract_strided_slice %582 {offsets = [0, 32], sizes = [8, 32], strides = [1, 1]} : vector<8x96xf32> to vector<8x32xf32>
    %585 = vector.extract_strided_slice %582 {offsets = [0, 64], sizes = [8, 32], strides = [1, 1]} : vector<8x96xf32> to vector<8x32xf32>
    %586 = vector.extract_strided_slice %583 {offsets = [0, 0], sizes = [8, 16], strides = [1, 1]} : vector<8x32xf32> to vector<8x16xf32>
    %587 = vector.extract_strided_slice %584 {offsets = [0, 0], sizes = [8, 16], strides = [1, 1]} : vector<8x32xf32> to vector<8x16xf32>
    %cst_279 = arith.constant dense<0.000000e+00> : vector<8x8xf32>
    %588 = tpu.matmul %586, %587, %cst_279 {dimension_numbers = #tpu.dot_dimension_numbers<[1], [1], [0], [0], [0, 0, 1, 0], [], []>} : vector<8x16xf32>, vector<8x16xf32>, vector<8x8xf32> -> vector<8x8xf32>
    %589 = vector.broadcast %14 : vector<1x8xf32> to vector<8x8xf32>
    %590 = arith.addf %588, %589 : vector<8x8xf32>
    %cst_280 = arith.constant dense<0xFF800000> : vector<8xf32>
    %591 = vector.multi_reduction <maximumf>, %590, %cst_280 [1] : vector<8x8xf32> to vector<8xf32>
    %592 = vector.shape_cast %591 : vector<8xf32> to vector<8x1xf32>
    %593 = vector.broadcast %592 : vector<8x1xf32> to vector<8x8xf32>
    %594 = arith.subf %590, %593 : vector<8x8xf32>
    %595 = math.exp %594 : vector<8x8xf32>
    %cst_281 = arith.constant dense<0.000000e+00> : vector<8xf32>
    %596 = vector.multi_reduction <add>, %595, %cst_281 [1] : vector<8x8xf32> to vector<8xf32>
    %597 = vector.shape_cast %596 : vector<8xf32> to vector<8x1xf32>
    %598 = tpu.reciprocal %597 {approx = true} : vector<8x1xf32> -> vector<8x1xf32>
    %599 = vector.broadcast %598 : vector<8x1xf32> to vector<8x8xf32>
    %600 = arith.mulf %595, %599 : vector<8x8xf32>
    %601 = vector.extract_strided_slice %585 {offsets = [0, 0], sizes = [8, 16], strides = [1, 1]} : vector<8x32xf32> to vector<8x16xf32>
    %cst_282 = arith.constant dense<0.000000e+00> : vector<8x16xf32>
    %602 = tpu.matmul %600, %601, %cst_282 {dimension_numbers = #tpu.dot_dimension_numbers<[1], [0], [0], [1], [0, 0, 1, 1], [], []>} : vector<8x8xf32>, vector<8x16xf32>, vector<8x16xf32> -> vector<8x16xf32>
    %603 = vector.extract_strided_slice %583 {offsets = [0, 16], sizes = [8, 16], strides = [1, 1]} : vector<8x32xf32> to vector<8x16xf32>
    %604 = vector.extract_strided_slice %584 {offsets = [0, 16], sizes = [8, 16], strides = [1, 1]} : vector<8x32xf32> to vector<8x16xf32>
    %cst_283 = arith.constant dense<0.000000e+00> : vector<8x8xf32>
    %605 = tpu.matmul %603, %604, %cst_283 {dimension_numbers = #tpu.dot_dimension_numbers<[1], [1], [0], [0], [0, 0, 1, 0], [], []>} : vector<8x16xf32>, vector<8x16xf32>, vector<8x8xf32> -> vector<8x8xf32>
    %606 = vector.broadcast %14 : vector<1x8xf32> to vector<8x8xf32>
    %607 = arith.addf %605, %606 : vector<8x8xf32>
    %cst_284 = arith.constant dense<0xFF800000> : vector<8xf32>
    %608 = vector.multi_reduction <maximumf>, %607, %cst_284 [1] : vector<8x8xf32> to vector<8xf32>
    %609 = vector.shape_cast %608 : vector<8xf32> to vector<8x1xf32>
    %610 = vector.broadcast %609 : vector<8x1xf32> to vector<8x8xf32>
    %611 = arith.subf %607, %610 : vector<8x8xf32>
    %612 = math.exp %611 : vector<8x8xf32>
    %cst_285 = arith.constant dense<0.000000e+00> : vector<8xf32>
    %613 = vector.multi_reduction <add>, %612, %cst_285 [1] : vector<8x8xf32> to vector<8xf32>
    %614 = vector.shape_cast %613 : vector<8xf32> to vector<8x1xf32>
    %615 = tpu.reciprocal %614 {approx = true} : vector<8x1xf32> -> vector<8x1xf32>
    %616 = vector.broadcast %615 : vector<8x1xf32> to vector<8x8xf32>
    %617 = arith.mulf %612, %616 : vector<8x8xf32>
    %618 = vector.extract_strided_slice %585 {offsets = [0, 16], sizes = [8, 16], strides = [1, 1]} : vector<8x32xf32> to vector<8x16xf32>
    %cst_286 = arith.constant dense<0.000000e+00> : vector<8x16xf32>
    %619 = tpu.matmul %617, %618, %cst_286 {dimension_numbers = #tpu.dot_dimension_numbers<[1], [0], [0], [1], [0, 0, 1, 1], [], []>} : vector<8x8xf32>, vector<8x16xf32>, vector<8x16xf32> -> vector<8x16xf32>
    %620 = tpu.concatenate %602, %619 in 1 : vector<8x16xf32>, vector<8x16xf32> -> vector<8x32xf32>
    %c3_287 = arith.constant 3 : index
    %c0_288 = arith.constant 0 : index
    %c0_289 = arith.constant 0 : index
    %621 = vector.load %arg9[%c3_287, %c0_288, %c0_289] : memref<4x32x32xf32, #tpu.memory_space<vmem>>, vector<1x32x32xf32>
    %622 = vector.shape_cast %621 : vector<1x32x32xf32> to vector<32x32xf32>
    %cst_290 = arith.constant dense<0.000000e+00> : vector<8x32xf32>
    %623 = tpu.matmul %620, %622, %cst_290 {dimension_numbers = #tpu.dot_dimension_numbers<[1], [0], [0], [1], [0, 0, 1, 1], [], []>} : vector<8x32xf32>, vector<32x32xf32>, vector<8x32xf32> -> vector<8x32xf32>
    %c3_291 = arith.constant 3 : index
    %c0_292 = arith.constant 0 : index
    %c0_293 = arith.constant 0 : index
    %624 = vector.load %arg10[%c3_291, %c0_292, %c0_293] : memref<4x1x32xf32, #tpu.memory_space<vmem>>, vector<1x1x32xf32>
    %625 = vector.shape_cast %624 : vector<1x1x32xf32> to vector<1x32xf32>
    %626 = vector.broadcast %625 : vector<1x32xf32> to vector<8x32xf32>
    %627 = arith.addf %623, %626 : vector<8x32xf32>
    %c3_294 = arith.constant 3 : index
    %c0_295 = arith.constant 0 : index
    %c0_296 = arith.constant 0 : index
    %628 = vector.load %arg11[%c3_294, %c0_295, %c0_296] : memref<4x1x32xf32, #tpu.memory_space<vmem>>, vector<1x1x32xf32>
    %629 = vector.shape_cast %628 : vector<1x1x32xf32> to vector<1x32xf32>
    %630 = vector.broadcast %629 : vector<1x32xf32> to vector<8x32xf32>
    %631 = arith.mulf %630, %627 : vector<8x32xf32>
    %632 = arith.addf %549, %631 : vector<8x32xf32>
    %c3_297 = arith.constant 3 : index
    %c0_298 = arith.constant 0 : index
    %c0_299 = arith.constant 0 : index
    %633 = vector.load %arg12[%c3_297, %c0_298, %c0_299] : memref<4x1x32xf32, #tpu.memory_space<vmem>>, vector<1x1x32xf32>
    %634 = vector.shape_cast %633 : vector<1x1x32xf32> to vector<1x32xf32>
    %c3_300 = arith.constant 3 : index
    %c0_301 = arith.constant 0 : index
    %c0_302 = arith.constant 0 : index
    %635 = vector.load %arg13[%c3_300, %c0_301, %c0_302] : memref<4x1x32xf32, #tpu.memory_space<vmem>>, vector<1x1x32xf32>
    %636 = vector.shape_cast %635 : vector<1x1x32xf32> to vector<1x32xf32>
    %cst_303 = arith.constant dense<0.000000e+00> : vector<8xf32>
    %637 = vector.multi_reduction <add>, %632, %cst_303 [1] : vector<8x32xf32> to vector<8xf32>
    %638 = vector.shape_cast %637 : vector<8xf32> to vector<8x1xf32>
    %cst_304 = arith.constant 3.200000e+01 : f32
    %639 = vector.broadcast %cst_304 : f32 to vector<8x1xf32>
    %640 = arith.divf %638, %639 : vector<8x1xf32>
    %641 = vector.broadcast %640 : vector<8x1xf32> to vector<8x32xf32>
    %642 = arith.subf %632, %641 : vector<8x32xf32>
    %643 = arith.mulf %642, %642 : vector<8x32xf32>
    %cst_305 = arith.constant dense<0.000000e+00> : vector<8xf32>
    %644 = vector.multi_reduction <add>, %643, %cst_305 [1] : vector<8x32xf32> to vector<8xf32>
    %645 = vector.shape_cast %644 : vector<8xf32> to vector<8x1xf32>
    %cst_306 = arith.constant 3.200000e+01 : f32
    %646 = vector.broadcast %cst_306 : f32 to vector<8x1xf32>
    %647 = arith.divf %645, %646 : vector<8x1xf32>
    %648 = vector.broadcast %640 : vector<8x1xf32> to vector<8x32xf32>
    %649 = arith.subf %632, %648 : vector<8x32xf32>
    %cst_307 = arith.constant 9.99999997E-7 : f32
    %650 = vector.broadcast %cst_307 : f32 to vector<8x1xf32>
    %651 = arith.addf %647, %650 : vector<8x1xf32>
    %652 = math.rsqrt %651 : vector<8x1xf32>
    %653 = vector.broadcast %652 : vector<8x1xf32> to vector<8x32xf32>
    %654 = arith.mulf %649, %653 : vector<8x32xf32>
    %655 = vector.broadcast %634 : vector<1x32xf32> to vector<8x32xf32>
    %656 = arith.mulf %654, %655 : vector<8x32xf32>
    %657 = vector.broadcast %636 : vector<1x32xf32> to vector<8x32xf32>
    %658 = arith.addf %656, %657 : vector<8x32xf32>
    %c3_308 = arith.constant 3 : index
    %c0_309 = arith.constant 0 : index
    %c0_310 = arith.constant 0 : index
    %659 = vector.load %arg14[%c3_308, %c0_309, %c0_310] : memref<4x32x128xf32, #tpu.memory_space<vmem>>, vector<1x32x128xf32>
    %660 = vector.shape_cast %659 : vector<1x32x128xf32> to vector<32x128xf32>
    %cst_311 = arith.constant dense<0.000000e+00> : vector<8x128xf32>
    %661 = tpu.matmul %658, %660, %cst_311 {dimension_numbers = #tpu.dot_dimension_numbers<[1], [0], [0], [1], [0, 0, 1, 1], [], []>} : vector<8x32xf32>, vector<32x128xf32>, vector<8x128xf32> -> vector<8x128xf32>
    %c3_312 = arith.constant 3 : index
    %c0_313 = arith.constant 0 : index
    %c0_314 = arith.constant 0 : index
    %662 = vector.load %arg15[%c3_312, %c0_313, %c0_314] : memref<4x1x128xf32, #tpu.memory_space<vmem>>, vector<1x1x128xf32>
    %663 = vector.shape_cast %662 : vector<1x1x128xf32> to vector<1x128xf32>
    %664 = vector.broadcast %663 : vector<1x128xf32> to vector<8x128xf32>
    %665 = arith.addf %661, %664 : vector<8x128xf32>
    %cst_315 = arith.constant 5.000000e-01 : f32
    %666 = vector.broadcast %cst_315 : f32 to vector<8x128xf32>
    %667 = arith.mulf %666, %665 : vector<8x128xf32>
    %cst_316 = arith.constant 0.707106769 : f32
    %668 = vector.broadcast %cst_316 : f32 to vector<8x128xf32>
    %669 = arith.mulf %665, %668 : vector<8x128xf32>
    %cst_317 = arith.constant 0.000000e+00 : f32
    %670 = vector.broadcast %cst_317 : f32 to vector<8x128xf32>
    %671 = arith.cmpf oge, %669, %670 : vector<8x128xf32>
    %cst_318 = arith.constant 1.000000e+00 : f32
    %cst_319 = arith.constant -1.000000e+00 : f32
    %672 = vector.broadcast %cst_318 : f32 to vector<8x128xf32>
    %673 = vector.broadcast %cst_319 : f32 to vector<8x128xf32>
    %674 = arith.select %671, %672, %673 : vector<8x128xi1>, vector<8x128xf32>
    %675 = math.absf %669 : vector<8x128xf32>
    %cst_320 = arith.constant 0.327591091 : f32
    %676 = vector.broadcast %cst_320 : f32 to vector<8x128xf32>
    %677 = arith.mulf %676, %675 : vector<8x128xf32>
    %cst_321 = arith.constant 1.000000e+00 : f32
    %678 = vector.broadcast %cst_321 : f32 to vector<8x128xf32>
    %679 = arith.addf %678, %677 : vector<8x128xf32>
    %cst_322 = arith.constant 1.000000e+00 : f32
    %680 = vector.broadcast %cst_322 : f32 to vector<8x128xf32>
    %681 = arith.divf %680, %679 : vector<8x128xf32>
    %cst_323 = arith.constant 1.06140542 : f32
    %682 = vector.broadcast %cst_323 : f32 to vector<8x128xf32>
    %683 = arith.mulf %682, %681 : vector<8x128xf32>
    %cst_324 = arith.constant 1.45315206 : f32
    %684 = vector.broadcast %cst_324 : f32 to vector<8x128xf32>
    %685 = arith.subf %683, %684 : vector<8x128xf32>
    %686 = arith.mulf %685, %681 : vector<8x128xf32>
    %cst_325 = arith.constant 1.42141378 : f32
    %687 = vector.broadcast %cst_325 : f32 to vector<8x128xf32>
    %688 = arith.addf %686, %687 : vector<8x128xf32>
    %689 = arith.mulf %688, %681 : vector<8x128xf32>
    %cst_326 = arith.constant 0.284496725 : f32
    %690 = vector.broadcast %cst_326 : f32 to vector<8x128xf32>
    %691 = arith.subf %689, %690 : vector<8x128xf32>
    %692 = arith.mulf %691, %681 : vector<8x128xf32>
    %cst_327 = arith.constant 0.254829586 : f32
    %693 = vector.broadcast %cst_327 : f32 to vector<8x128xf32>
    %694 = arith.addf %692, %693 : vector<8x128xf32>
    %695 = arith.mulf %694, %681 : vector<8x128xf32>
    %cst_328 = arith.constant 0.000000e+00 : f32
    %696 = vector.broadcast %cst_328 : f32 to vector<8x128xf32>
    %697 = arith.subf %696, %675 : vector<8x128xf32>
    %698 = arith.mulf %697, %675 : vector<8x128xf32>
    %699 = math.exp %698 : vector<8x128xf32>
    %700 = arith.mulf %695, %699 : vector<8x128xf32>
    %cst_329 = arith.constant 1.000000e+00 : f32
    %701 = vector.broadcast %cst_329 : f32 to vector<8x128xf32>
    %702 = arith.subf %701, %700 : vector<8x128xf32>
    %703 = arith.mulf %674, %702 : vector<8x128xf32>
    %cst_330 = arith.constant 1.000000e+00 : f32
    %704 = vector.broadcast %cst_330 : f32 to vector<8x128xf32>
    %705 = arith.addf %704, %703 : vector<8x128xf32>
    %706 = arith.mulf %667, %705 : vector<8x128xf32>
    %c3_331 = arith.constant 3 : index
    %c0_332 = arith.constant 0 : index
    %c0_333 = arith.constant 0 : index
    %707 = vector.load %arg16[%c3_331, %c0_332, %c0_333] : memref<4x128x32xf32, #tpu.memory_space<vmem>>, vector<1x128x32xf32>
    %708 = vector.shape_cast %707 : vector<1x128x32xf32> to vector<128x32xf32>
    %cst_334 = arith.constant dense<0.000000e+00> : vector<8x32xf32>
    %709 = tpu.matmul %706, %708, %cst_334 {dimension_numbers = #tpu.dot_dimension_numbers<[1], [0], [0], [1], [0, 0, 1, 1], [], []>} : vector<8x128xf32>, vector<128x32xf32>, vector<8x32xf32> -> vector<8x32xf32>
    %c3_335 = arith.constant 3 : index
    %c0_336 = arith.constant 0 : index
    %c0_337 = arith.constant 0 : index
    %710 = vector.load %arg17[%c3_335, %c0_336, %c0_337] : memref<4x1x32xf32, #tpu.memory_space<vmem>>, vector<1x1x32xf32>
    %711 = vector.shape_cast %710 : vector<1x1x32xf32> to vector<1x32xf32>
    %712 = vector.broadcast %711 : vector<1x32xf32> to vector<8x32xf32>
    %713 = arith.addf %709, %712 : vector<8x32xf32>
    %c3_338 = arith.constant 3 : index
    %c0_339 = arith.constant 0 : index
    %c0_340 = arith.constant 0 : index
    %714 = vector.load %arg18[%c3_338, %c0_339, %c0_340] : memref<4x1x32xf32, #tpu.memory_space<vmem>>, vector<1x1x32xf32>
    %715 = vector.shape_cast %714 : vector<1x1x32xf32> to vector<1x32xf32>
    %716 = vector.broadcast %715 : vector<1x32xf32> to vector<8x32xf32>
    %717 = arith.mulf %716, %713 : vector<8x32xf32>
    %718 = arith.addf %632, %717 : vector<8x32xf32>
    %c0_341 = arith.constant 0 : index
    %c0_342 = arith.constant 0 : index
    %719 = vector.load %arg19[%c0_341, %c0_342] : memref<1x32xf32, #tpu.memory_space<vmem>>, vector<1x32xf32>
    %c0_343 = arith.constant 0 : index
    %c0_344 = arith.constant 0 : index
    %720 = vector.load %arg20[%c0_343, %c0_344] : memref<1x32xf32, #tpu.memory_space<vmem>>, vector<1x32xf32>
    %cst_345 = arith.constant dense<0.000000e+00> : vector<8xf32>
    %721 = vector.multi_reduction <add>, %718, %cst_345 [1] : vector<8x32xf32> to vector<8xf32>
    %722 = vector.shape_cast %721 : vector<8xf32> to vector<8x1xf32>
    %cst_346 = arith.constant 3.200000e+01 : f32
    %723 = vector.broadcast %cst_346 : f32 to vector<8x1xf32>
    %724 = arith.divf %722, %723 : vector<8x1xf32>
    %725 = vector.broadcast %724 : vector<8x1xf32> to vector<8x32xf32>
    %726 = arith.subf %718, %725 : vector<8x32xf32>
    %727 = arith.mulf %726, %726 : vector<8x32xf32>
    %cst_347 = arith.constant dense<0.000000e+00> : vector<8xf32>
    %728 = vector.multi_reduction <add>, %727, %cst_347 [1] : vector<8x32xf32> to vector<8xf32>
    %729 = vector.shape_cast %728 : vector<8xf32> to vector<8x1xf32>
    %cst_348 = arith.constant 3.200000e+01 : f32
    %730 = vector.broadcast %cst_348 : f32 to vector<8x1xf32>
    %731 = arith.divf %729, %730 : vector<8x1xf32>
    %732 = vector.broadcast %724 : vector<8x1xf32> to vector<8x32xf32>
    %733 = arith.subf %718, %732 : vector<8x32xf32>
    %cst_349 = arith.constant 9.99999997E-7 : f32
    %734 = vector.broadcast %cst_349 : f32 to vector<8x1xf32>
    %735 = arith.addf %731, %734 : vector<8x1xf32>
    %736 = math.rsqrt %735 : vector<8x1xf32>
    %737 = vector.broadcast %736 : vector<8x1xf32> to vector<8x32xf32>
    %738 = arith.mulf %733, %737 : vector<8x32xf32>
    %739 = vector.broadcast %719 : vector<1x32xf32> to vector<8x32xf32>
    %740 = arith.mulf %738, %739 : vector<8x32xf32>
    %741 = vector.broadcast %720 : vector<1x32xf32> to vector<8x32xf32>
    %742 = arith.addf %740, %741 : vector<8x32xf32>
    %743 = vector.extract_strided_slice %742 {offsets = [1, 0], sizes = [4, 32], strides = [1, 1]} : vector<8x32xf32> to vector<4x32xf32>
    %c1_350 = arith.constant 1 : index
    %c0_351 = arith.constant 0 : index
    %c0_352 = arith.constant 0 : index
    %c0_353 = arith.constant 0 : index
    %744 = vector.load %arg21[%c1_350, %c0_351, %c0_352, %c0_353] : memref<2x1x4x32xf32, #tpu.memory_space<vmem>>, vector<1x1x4x32xf32>
    %745 = vector.shape_cast %744 : vector<1x1x4x32xf32> to vector<4x32xf32>
    %746 = vector.shape_cast %743 : vector<4x32xf32> to vector<1x1x4x32xf32>
    tpu.vector_store %arg21[%c1_350, %c0_351, %c0_352, %c0_353], %746 {strides = array<i32>} : memref<2x1x4x32xf32, #tpu.memory_space<vmem>>, vector<1x1x4x32xf32>,
    return
  }
  func.func @transform_0(%arg0: i32) -> (i32, i32, i32) {
    %c0_i32 = arith.constant 0 : i32
    %c0_i32_0 = arith.constant 0 : i32
    %c0_i32_1 = arith.constant 0 : i32
    return %arg0, %c0_i32, %c0_i32_0 : i32, i32, i32
  }
  func.func @transform_1(%arg0: i32) -> (i32, i32) {
    %c0_i32 = arith.constant 0 : i32
    %c0_i32_0 = arith.constant 0 : i32
    %c0_i32_1 = arith.constant 0 : i32
    return %c0_i32, %c0_i32_0 : i32, i32
  }
  func.func @transform_2(%arg0: i32) -> (i32, i32) {
    %c0_i32 = arith.constant 0 : i32
    %c0_i32_0 = arith.constant 0 : i32
    %c0_i32_1 = arith.constant 0 : i32
    return %c0_i32, %c0_i32_0 : i32, i32
  }
  func.func @transform_3(%arg0: i32) -> (i32, i32) {
    %c0_i32 = arith.constant 0 : i32
    %c0_i32_0 = arith.constant 0 : i32
    %c0_i32_1 = arith.constant 0 : i32
    return %c0_i32, %c0_i32_0 : i32, i32
  }
  func.func @transform_4(%arg0: i32) -> (i32, i32, i32) {
    %c0_i32 = arith.constant 0 : i32
    %c0_i32_0 = arith.constant 0 : i32
    %c0_i32_1 = arith.constant 0 : i32
    %c0_i32_2 = arith.constant 0 : i32
    return %c0_i32, %c0_i32_0, %c0_i32_1 : i32, i32, i32
  }
  func.func @transform_5(%arg0: i32) -> (i32, i32, i32) {
    %c0_i32 = arith.constant 0 : i32
    %c0_i32_0 = arith.constant 0 : i32
    %c0_i32_1 = arith.constant 0 : i32
    %c0_i32_2 = arith.constant 0 : i32
    return %c0_i32, %c0_i32_0, %c0_i32_1 : i32, i32, i32
  }
  func.func @transform_6(%arg0: i32) -> (i32, i32, i32) {
    %c0_i32 = arith.constant 0 : i32
    %c0_i32_0 = arith.constant 0 : i32
    %c0_i32_1 = arith.constant 0 : i32
    %c0_i32_2 = arith.constant 0 : i32
    return %c0_i32, %c0_i32_0, %c0_i32_1 : i32, i32, i32
  }
  func.func @transform_7(%arg0: i32) -> (i32, i32, i32) {
    %c0_i32 = arith.constant 0 : i32
    %c0_i32_0 = arith.constant 0 : i32
    %c0_i32_1 = arith.constant 0 : i32
    %c0_i32_2 = arith.constant 0 : i32
    return %c0_i32, %c0_i32_0, %c0_i32_1 : i32, i32, i32
  }
  func.func @transform_8(%arg0: i32) -> (i32, i32, i32) {
    %c0_i32 = arith.constant 0 : i32
    %c0_i32_0 = arith.constant 0 : i32
    %c0_i32_1 = arith.constant 0 : i32
    %c0_i32_2 = arith.constant 0 : i32
    return %c0_i32, %c0_i32_0, %c0_i32_1 : i32, i32, i32
  }
  func.func @transform_9(%arg0: i32) -> (i32, i32, i32) {
    %c0_i32 = arith.constant 0 : i32
    %c0_i32_0 = arith.constant 0 : i32
    %c0_i32_1 = arith.constant 0 : i32
    %c0_i32_2 = arith.constant 0 : i32
    return %c0_i32, %c0_i32_0, %c0_i32_1 : i32, i32, i32
  }
  func.func @transform_10(%arg0: i32) -> (i32, i32, i32) {
    %c0_i32 = arith.constant 0 : i32
    %c0_i32_0 = arith.constant 0 : i32
    %c0_i32_1 = arith.constant 0 : i32
    %c0_i32_2 = arith.constant 0 : i32
    return %c0_i32, %c0_i32_0, %c0_i32_1 : i32, i32, i32
  }
  func.func @transform_11(%arg0: i32) -> (i32, i32, i32) {
    %c0_i32 = arith.constant 0 : i32
    %c0_i32_0 = arith.constant 0 : i32
    %c0_i32_1 = arith.constant 0 : i32
    %c0_i32_2 = arith.constant 0 : i32
    return %c0_i32, %c0_i32_0, %c0_i32_1 : i32, i32, i32
  }
  func.func @transform_12(%arg0: i32) -> (i32, i32, i32) {
    %c0_i32 = arith.constant 0 : i32
    %c0_i32_0 = arith.constant 0 : i32
    %c0_i32_1 = arith.constant 0 : i32
    %c0_i32_2 = arith.constant 0 : i32
    return %c0_i32, %c0_i32_0, %c0_i32_1 : i32, i32, i32
  }
  func.func @transform_13(%arg0: i32) -> (i32, i32, i32) {
    %c0_i32 = arith.constant 0 : i32
    %c0_i32_0 = arith.constant 0 : i32
    %c0_i32_1 = arith.constant 0 : i32
    %c0_i32_2 = arith.constant 0 : i32
    return %c0_i32, %c0_i32_0, %c0_i32_1 : i32, i32, i32
  }
  func.func @transform_14(%arg0: i32) -> (i32, i32, i32) {
    %c0_i32 = arith.constant 0 : i32
    %c0_i32_0 = arith.constant 0 : i32
    %c0_i32_1 = arith.constant 0 : i32
    %c0_i32_2 = arith.constant 0 : i32
    return %c0_i32, %c0_i32_0, %c0_i32_1 : i32, i32, i32
  }
  func.func @transform_15(%arg0: i32) -> (i32, i32, i32) {
    %c0_i32 = arith.constant 0 : i32
    %c0_i32_0 = arith.constant 0 : i32
    %c0_i32_1 = arith.constant 0 : i32
    %c0_i32_2 = arith.constant 0 : i32
    return %c0_i32, %c0_i32_0, %c0_i32_1 : i32, i32, i32
  }
  func.func @transform_16(%arg0: i32) -> (i32, i32, i32) {
    %c0_i32 = arith.constant 0 : i32
    %c0_i32_0 = arith.constant 0 : i32
    %c0_i32_1 = arith.constant 0 : i32
    %c0_i32_2 = arith.constant 0 : i32
    return %c0_i32, %c0_i32_0, %c0_i32_1 : i32, i32, i32
  }
  func.func @transform_17(%arg0: i32) -> (i32, i32, i32) {
    %c0_i32 = arith.constant 0 : i32
    %c0_i32_0 = arith.constant 0 : i32
    %c0_i32_1 = arith.constant 0 : i32
    %c0_i32_2 = arith.constant 0 : i32
    return %c0_i32, %c0_i32_0, %c0_i32_1 : i32, i32, i32
  }
  func.func @transform_18(%arg0: i32) -> (i32, i32) {
    %c0_i32 = arith.constant 0 : i32
    %c0_i32_0 = arith.constant 0 : i32
    %c0_i32_1 = arith.constant 0 : i32
    return %c0_i32, %c0_i32_0 : i32, i32
  }
  func.func @transform_19(%arg0: i32) -> (i32, i32) {
    %c0_i32 = arith.constant 0 : i32
    %c0_i32_0 = arith.constant 0 : i32
    %c0_i32_1 = arith.constant 0 : i32
    return %c0_i32, %c0_i32_0 : i32, i32
  }
  func.func @transform_20(%arg0: i32) -> (i32, i32, i32, i32) {
    %c0_i32 = arith.constant 0 : i32
    %c0_i32_0 = arith.constant 0 : i32
    %c0_i32_1 = arith.constant 0 : i32
    %c0_i32_2 = arith.constant 0 : i32
    return %c0_i32, %arg0, %c0_i32_0, %c0_i32_1 : i32, i32, i32, i32
  }
}

</mosaic_0001>

<bundles_post_ra>
// kernel: dinov2_multiscale_forward.1
= control target key start
LH: loop header
LB: loop body
LE: loop exit
PB: predicated region body
PF: predicated region fallthrough
CT: control target
= control target key end

     0   :  { %s6651_s0 = inlined_call_operand.vmem [shape: f32[2,4,588], index: 0, kind: input, shape index: {}]   ;;  %s6652_s1 = inlined_call_operand.vmem [shape: f32[588,32], index: 1, kind: input, shape index: {}]   ;;  %s6653_s2 = inlined_call_operand.vmem [shape: f32[1,32], index: 2, kind: input, shape index: {}]   ;;  %s6654_s3 = inlined_call_operand.vmem [shape: f32[4,32], index: 3, kind: input, shape index: {}]   ;;  %s6655_s4 = inlined_call_operand.vmem [shape: f32[4,1,32], index: 4, kind: input, shape index: {}]   ;;  %s6656_s5 = inlined_call_operand.vmem [shape: f32[4,1,32], index: 5, kind: input, shape index: {}]   ;;  %s6657_s6 = inlined_call_operand.vmem [shape: f32[4,32,96], index: 6, kind: input, shape index: {}]   ;;  %s6658_s7 = inlined_call_operand.vmem [shape: f32[4,1,96], index: 7, kind: input, shape index: {}]   ;;  %s6659_s8 = inlined_call_operand.vmem [shape: f32[4,32,32], index: 8, kind: input, shape index: {}]   ;;  %s6660_s9 = inlined_call_operand.vmem [shape: f32[4,1,32], index: 9, kind: input, shape index: {}]   ;;  %s6661_s10 = inlined_call_operand.vmem [shape: f32[4,1,32], index: 10, kind: input, shape index: {}]   ;;  %s6662_s11 = inlined_call_operand.vmem [shape: f32[4,1,32], index: 11, kind: input, shape index: {}]   ;;  %s6663_s12 = inlined_call_operand.vmem [shape: f32[4,1,32], index: 12, kind: input, shape index: {}]   ;;  %s6664_s13 = inlined_call_operand.vmem [shape: f32[4,32,128], index: 13, kind: input, shape index: {}]   ;;  %s6665_s14 = inlined_call_operand.vmem [shape: f32[4,1,128], index: 14, kind: input, shape index: {}]   ;;  %s6666_s15 = inlined_call_operand.vmem [shape: f32[4,128,32], index: 15, kind: input, shape index: {}]   ;;  %s6667_s16 = inlined_call_operand.vmem [shape: f32[4,1,32], index: 16, kind: input, shape index: {}]   ;;  %s6668_s17 = inlined_call_operand.vmem [shape: f32[4,1,32], index: 17, kind: input, shape index: {}]   ;;  %s6669_s18 = inlined_call_operand.vmem [shape: f32[1,32], index: 18, kind: input, shape index: {}]   ;;  %s6670_s19 = inlined_call_operand.vmem [shape: f32[1,32], index: 19, kind: input, shape index: {}]   ;;  %s6671_s20 = inlined_call_operand.vmem [shape: f32[2,2,4,32], index: 20, kind: output, shape index: {}]  }
   0x1   :  { %6690 = sst [smem:[#allocation7_spill]] %s6651_s0 }
   0x2   :  { %6691 = sst [smem:[#allocation8_spill]] %s6652_s1 }
   0x3   :  { %6692 = sst [smem:[#allocation9_spill]] %s6653_s2 }
   0x4   :  { %6693 = sst [smem:[#allocation10_spill]] %s6654_s3 }
   0x5   :  { %6694 = sst [smem:[#allocation11_spill]] %s6655_s4 }
   0x6   :  { %6695 = sst [smem:[#allocation12_spill]] %s6669_s18 }
   0x7   :  { %6696 = sst [smem:[#allocation13_spill]] %s6670_s19 }
   0x8   :  { %6697 = sst [smem:[#allocation14_spill]] %s6671_s20 }
   0x9   :  { %s5589_s1 = smov 0   ;;  %s5591_s22 = smov 0  }
   0xa   :  { %s5593_s23 = smov 0  }
   0xb LB: > { %6698 = sst [smem:[#allocation3_spill]] %s5466_s22  ;;  %s5602_s24 = sadd.s32 4294967295, %s5470_s23   ;;  %s5470_s23 = sphi %s5593_s23, %s6718_s23   ;;  %s5466_s22 = sphi %s5591_s22, %s6720_s22   ;;  %s5462_s1 = sphi %s5589_s1, %s6719_s1  }
   0xc   : > { %6699 = sst [smem:[#allocation4_spill]] %s5602_s24  ;;  %s5604_s2 = sadd.s32 1, %s5470_s23  }
   0xd   : > { %6700 = sst [smem:[#allocation5_spill]] %s5604_s2  ;;  %s459_s25 = ssub.s32 %s5470_s23, %s5604_s2 }
   0xe   : > { %s462_s3 = sadd.s32 1, %s5466_s22  ;;  %p460_p0 = scmp.eq.s32.totalorder %s459_s25, 0 }
   0xf   : > { %p472_p1 = scmp.ne.s32.totalorder %s5466_s22, %s5462_s1  ;;  %p473_p2 = scmp.eq.s32.totalorder %s5602_s24, 1 }
  0x10   : > { %p4267_p3 = scmp.ge.s32.totalorder %s5470_s23, 1  ;;  %p562_p5 = scmp.lt.s32.totalorder %s5470_s23, 3 }
  0x11   : > { %s5612_s26 = scalar_select %p460_p0, %s5466_s22, %s462_s3  }
  0x12   : > { %p5614_p4 = por %p473_p2, %p472_p1  ;;  %p563_p6 = pnand %p4267_p3, %p562_p5 }
  0x13   : > { %6701 = sst [smem:[#allocation6_spill]] %s5612_s26  ;;  %s6703_s29 = sld [smem:[#allocation8_spill]] (!%p563_p6)  ;;  %vm5473_vm0 = vmmov (!%p563_p6), 0   ;;  %vm712_vm1 = vcmask (!%p563_p6), 1043456   ;;  %vm5475_vm2 = vmmov (!%p563_p6), 1   ;;  %vm709_vm4 = vcmask (!%p563_p6), 621568  }
  0x14   : > { %566 = sbr.rel (%p563_p6) target bundleno = 12794 (0x31fa), region = 100  ;;  %p619_p7 = scmp.lt.s32.totalorder (!%p563_p6), %s5602_s24, 1  ;;  %vm5173_vm3 = vmpackc.low (!%p563_p6), %vm712_vm1, %vm5475_vm2  ;;  %vm930_vm5 = vcmask (!%p563_p6), 1040384   ;;  %vm932_vm6 = vcmask (!%p563_p6), 1044480   ;;  %vm940_vm7 = vcmask (!%p563_p6), 261120   ;;  %vm1056_vm8 = vcmask (!%p563_p6), 130048  }
  0x15   : > { %s6705_s22 = sld [smem:[#allocation10_spill]] (!%p563_p6)  ;;  %s6706_s23 = sld [smem:[#allocation9_spill]] (!%p563_p6)  ;;  %vm1131_vm10 = vcmask (!%p563_p6), 64512   ;;  %vm2549_vm13 = vcmask (!%p563_p6), 258049  }
  0x16   : > { %s6682_s0 = smov (!%p563_p6), 64   ;;  %s6686_s21 = smov (!%p563_p6), 80  }
  0x17   : > { %s6684_s26 = smov (!%p563_p6), 112   ;;  %s6680_s20 = smov (!%p563_p6), 16  }
  0x18   : > { %s6709_s4 = smov (!%p563_p6), 16   ;;  %s616_s3 = sand.u32 (!%p563_p6), 1, %s5462_s1  }
  0x19   : > { %v643_v0 = vld [vmem:[%s6703_s29 + $0x80] sm:$0xff] (!%p563_p6)  ;;  %v644_v1 = vld [vmem:[%s6703_s29 + $0x88] sm:$0xff] (!%p563_p6)  ;;  %v645_v11 = vld [vmem:[%s6703_s29 + $0x90] sm:$0xff] (!%p563_p6)  ;;  %s6710_s18 = sld [smem:[#allocation12_spill]] (!%p563_p6)  ;;  %s6711_s19 = sld [smem:[#allocation13_spill]] (!%p563_p6) }
  0x1a   : > { %v675_v2 = vld [vmem:[%s6703_s29 + $0x180] sm:$0xff] (!%p563_p6)  ;;  %v5095_v3 = vpack.c.bf16 (!%p563_p6), %v644_v1, %v643_v0  ;;  %v676_v4 = vld [vmem:[%s6703_s29 + $0x188] sm:$0xff] (!%p563_p6)  ;;  %v646_v13 = vld [vmem:[%s6703_s29 + $0x98] sm:$0xff] (!%p563_p6)  ;;  %s6715_s30 = smov (!%p563_p6), 64  }
  0x1b   : > { %v627_v5 = vld [vmem:[%s6703_s29] sm:$0xff]  ;;  %v628_v6 = vld [vmem:[%s6703_s29 + $0x8] sm:$0xff]  ;;  %v5127_v7 = vpack.c.bf16 %v676_v4, %v675_v2  ;;  %v677_v14 = vld [vmem:[%s6703_s29 + $0x190] sm:$0xff]  ;;  %v5099_v16 = vpack.c.bf16 %v646_v13, %v645_v11  ;;  %s5721_s28 = scalar_select %p619_p7, %s5602_s24, 1 }
  0x1c   : > { %v5097_v8 = vpack.c.bf16 %v628_v6, %v627_v5  ;;  %v659_v9 = vld [vmem:[%s6703_s29 + $0x100] sm:$0xff]  ;;  %v660_v10 = vld [vmem:[%s6703_s29 + $0x108] sm:$0xff]  ;;  %5096 = vmatprep.subr.bf16.mxu0 %v5095_v3  ;;  %v678_v15 = vld [vmem:[%s6703_s29 + $0x198] sm:$0xff] }
  0x1d   : > { %v5129_v12 = vpack.c.bf16 %v660_v10, %v659_v9  ;;  %5128 = vmatprep.subr.bf16.mxu1 %v5127_v7  ;;  %v5131_v17 = vpack.c.bf16 %v678_v15, %v677_v14  ;;  %v629_v18 = vld [vmem:[%s6703_s29 + $0x10] sm:$0xff]  ;;  %v630_v19 = vld [vmem:[%s6703_s29 + $0x18] sm:$0xff]  ;;  %v647_v23 = vld [vmem:[%s6703_s29 + $0xa0] sm:$0xff]  ;;  %s5343_s2 = smul.u32 20, %s5721_s28  ;;  %s6704_s28 = sld [smem:[#allocation7_spill]] }
  0x1e   : > { %5098 = vmatpush3.bf16.msra.mxu0 %v5097_v8  ;;  %v661_v20 = vld [vmem:[%s6703_s29 + $0x110] sm:$0xff]  ;;  %v5101_v21 = vpack.c.bf16 %v630_v19, %v629_v18  ;;  %v662_v22 = vld [vmem:[%s6703_s29 + $0x118] sm:$0xff]  ;;  %v648_v24 = vld [vmem:[%s6703_s29 + $0xa8] sm:$0xff] }
  0x1f   : > { %5130 = vmatpush3.bf16.msra.mxu1 %v5129_v12  ;;  %5100 = vmatprep.subr.bf16.mxu0 %v5099_v16  ;;  %v5133_v25 = vpack.c.bf16 %v662_v22, %v661_v20  ;;  %v5103_v26 = vpack.c.bf16 %v648_v24, %v647_v23  ;;  %v679_v27 = vld [vmem:[%s6703_s29 + $0x1a0] sm:$0xff]  ;;  %v680_v28 = vld [vmem:[%s6703_s29 + $0x1a8] sm:$0xff]  ;;  %v649_v35 = vld [vmem:[%s6703_s29 + $0xb0] sm:$0xff] }
  0x20   : > { %5132 = vmatprep.subr.bf16.mxu1 %v5131_v17  ;;  %v631_v29 = vld [vmem:[%s6703_s29 + $0x20] sm:$0xff]  ;;  %v5135_v30 = vpack.c.bf16 %v680_v28, %v679_v27  ;;  %v632_v31 = vld [vmem:[%s6703_s29 + $0x28] sm:$0xff]  ;;  %v650_v36 = vld [vmem:[%s6703_s29 + $0xb8] sm:$0xff] }
  0x21   : > { %v663_v32 = vld [vmem:[%s6703_s29 + $0x120] sm:$0xff]  ;;  %v664_v33 = vld [vmem:[%s6703_s29 + $0x128] sm:$0xff]  ;;  %v5105_v34 = vpack.c.bf16 %v632_v31, %v631_v29  ;;  %v681_v37 = vld [vmem:[%s6703_s29 + $0x1b0] sm:$0xff]  ;;  %v5107_v39 = vpack.c.bf16 %v650_v36, %v649_v35 }
  0x22   : > { %5102 = vmatpush3.bf16.msra.mxu0 %v5101_v21  ;;  %v5137_v38 = vpack.c.bf16 %v664_v33, %v663_v32  ;;  %v682_v40 = vld [vmem:[%s6703_s29 + $0x1b8] sm:$0xff]  ;;  %v633_v41 = vld [vmem:[%s6703_s29 + $0x30] sm:$0xff]  ;;  %v651_v46 = vld [vmem:[%s6703_s29 + $0xc0] sm:$0xff] }
  0x23   : > { %5134 = vmatpush3.bf16.msra.mxu1 %v5133_v25  ;;  %5104 = vmatprep.subr.bf16.mxu0 %v5103_v26  ;;  %v634_v42 = vld [vmem:[%s6703_s29 + $0x38] sm:$0xff]  ;;  %v5139_v43 = vpack.c.bf16 %v682_v40, %v681_v37  ;;  %v665_v44 = vld [vmem:[%s6703_s29 + $0x130] sm:$0xff]  ;;  %v652_v47 = vld [vmem:[%s6703_s29 + $0xc8] sm:$0xff]  ;;  %s5778_s24 = scalar_lea.vmem %s6704_s28, %s5343_s2  ;;  %s6688_s2 = smov 96  }
  0x24   : > { %5136 = vmatprep.subr.bf16.mxu1 %v5135_v30  ;;  %v666_v45 = vld [vmem:[%s6703_s29 + $0x138] sm:$0xff]  ;;  %v683_v48 = vld [vmem:[%s6703_s29 + $0x1c0] sm:$0xff]  ;;  %v684_v49 = vld [vmem:[%s6703_s29 + $0x1c8] sm:$0xff]  ;;  %v5109_v50 = vpack.c.bf16 %v634_v42, %v633_v41  ;;  %v5111_v52 = vpack.c.bf16 %v652_v47, %v651_v46  ;;  %v5474_v42 = vmov 0.0   ;;  %s6678_s28 = smov 48  }
  0x25   : > { %v5141_v51 = vpack.c.bf16 %v666_v45, %v665_v44  ;;  %v635_v53 = vld [vmem:[%s6703_s29 + $0x40] sm:$0xff]  ;;  %v636_v54 = vld [vmem:[%s6703_s29 + $0x48] sm:$0xff]  ;;  %v5143_v56 = vpack.c.bf16 %v684_v49, %v683_v48  ;;  %v653_v58 = vld [vmem:[%s6703_s29 + $0xd0] sm:$0xff] }
  0x26   : > { %5106 = vmatpush3.bf16.msra.mxu0 %v5105_v34  ;;  %v667_v55 = vld [vmem:[%s6703_s29 + $0x140] sm:$0xff]  ;;  %v668_v57 = vld [vmem:[%s6703_s29 + $0x148] sm:$0xff]  ;;  %v654_v59 = vld [vmem:[%s6703_s29 + $0xd8] sm:$0xff]  ;;  %v5113_v62 = vpack.c.bf16 %v636_v54, %v635_v53 }
  0x27   : > { %5138 = vmatpush3.bf16.msra.mxu1 %v5137_v38  ;;  %5108 = vmatprep.subr.bf16.mxu0 %v5107_v39  ;;  %v685_v60 = vld [vmem:[%s6703_s29 + $0x1d0] sm:$0xff]  ;;  %v686_v61 = vld [vmem:[%s6703_s29 + $0x1d8] sm:$0xff]  ;;  %v5145_v63 = vpack.c.bf16 %v668_v57, %v667_v55  ;;  %v5115_v0 = vpack.c.bf16 %v654_v59, %v653_v58  ;;  %v655_v6 = vld [vmem:[%s6703_s29 + $0xe0] sm:$0xff]  ;;  %v5472_v39 = vmov 0.0|0.0  }
  0x28   : > { %5140 = vmatprep.subr.bf16.mxu1 %v5139_v43  ;;  %v637_v1 = vld [vmem:[%s6703_s29 + $0x50] sm:$0xff]  ;;  %v638_v2 = vld [vmem:[%s6703_s29 + $0x58] sm:$0xff]  ;;  %v5147_v4 = vpack.c.bf16 %v686_v61, %v685_v60  ;;  %v656_v7 = vld [vmem:[%s6703_s29 + $0xe8] sm:$0xff] }
  0x29   : > { %v669_v3 = vld [vmem:[%s6703_s29 + $0x150] sm:$0xff]  ;;  %v670_v5 = vld [vmem:[%s6703_s29 + $0x158] sm:$0xff]  ;;  %v687_v8 = vld [vmem:[%s6703_s29 + $0x1e0] sm:$0xff]  ;;  %v5117_v10 = vpack.c.bf16 %v638_v2, %v637_v1  ;;  %v5119_v14 = vpack.c.bf16 %v656_v7, %v655_v6 }
  0x2a   : > { %5110 = vmatpush3.bf16.msra.mxu0 %v5109_v50  ;;  %v688_v9 = vld [vmem:[%s6703_s29 + $0x1e8] sm:$0xff]  ;;  %v639_v11 = vld [vmem:[%s6703_s29 + $0x60] sm:$0xff]  ;;  %v5149_v13 = vpack.c.bf16 %v670_v5, %v669_v3  ;;  %v657_v19 = vld [vmem:[%s6703_s29 + $0xf0] sm:$0xff] }
  0x2b   : > { %5142 = vmatpush3.bf16.msra.mxu1 %v5141_v51  ;;  %5112 = vmatprep.subr.bf16.mxu0 %v5111_v52  ;;  %v640_v12 = vld [vmem:[%s6703_s29 + $0x68] sm:$0xff]  ;;  %v671_v15 = vld [vmem:[%s6703_s29 + $0x160] sm:$0xff]  ;;  %v5151_v18 = vpack.c.bf16 %v688_v9, %v687_v8  ;;  %v658_v20 = vld [vmem:[%s6703_s29 + $0xf8] sm:$0xff] }
  0x2c   : > { %5144 = vmatprep.subr.bf16.mxu1 %v5143_v56  ;;  %v672_v16 = vld [vmem:[%s6703_s29 + $0x168] sm:$0xff]  ;;  %v624_v17 = vld [vmem:[%s5778_s24] sm:$0xff]  ;;  %v689_v23 = vld [vmem:[%s6703_s29 + $0x1f0] sm:$0xff]  ;;  %v5121_v26 = vpack.c.bf16 %v640_v12, %v639_v11  ;;  %v5123_v28 = vpack.c.bf16 %v658_v20, %v657_v19 }
  0x2d   : > { %v705_v21 = vcombine.high %v624_v17, %v624_v17  ;;  %v625_v22 = vld [vmem:[%s5778_s24 + $0x8] sm:$0xff]  ;;  %v690_v24 = vld [vmem:[%s6703_s29 + $0x1f8] sm:$0xff]  ;;  %v5153_v27 = vpack.c.bf16 %v672_v16, %v671_v15  ;;  %v641_v29 = vld [vmem:[%s6703_s29 + $0x70] sm:$0xff] }
  0x2e   : > { %5114 = vmatpush3.bf16.msra.mxu0 %v5113_v62  ;;  %v706_v25 = vcombine.high %v625_v22, %v625_v22  ;;  %v642_v30 = vld [vmem:[%s6703_s29 + $0x78] sm:$0xff]  ;;  %v5155_v31 = vpack.c.bf16 %v690_v24, %v689_v23  ;;  %v673_v32 = vld [vmem:[%s6703_s29 + $0x170] sm:$0xff]  ;;  %v691_v36 = vld [vmem:[%s6703_s29 + $0x200] sm:$0xff] }
  0x2f   : > { %5146 = vmatpush3.bf16.msra.mxu1 %v5145_v63  ;;  %5116 = vmatprep.subr.bf16.mxu0 %v5115_v0  ;;  %v674_v33 = vld [vmem:[%s6703_s29 + $0x178] sm:$0xff]  ;;  %v5125_v34 = vpack.c.bf16 %v642_v30, %v641_v29  ;;  %v692_v37 = vld [vmem:[%s6703_s29 + $0x208] sm:$0xff]  ;;  %v693_v40 = vld [vmem:[%s6703_s29 + $0x210] sm:$0xff] }
  0x30   : > { %5148 = vmatprep.subr.bf16.mxu1 %v5147_v4  ;;  %780 = vmatprep.mubr.f32.mxu0 %v705_v21  ;;  %v5157_v35 = vpack.c.bf16 %v674_v33, %v673_v32  ;;  %v5160_v38 = vpack.c.bf16 %v692_v37, %v691_v36  ;;  %v694_v41 = vld [vmem:[%s6703_s29 + $0x218] sm:$0xff]  ;;  %v695_v44 = vld [vmem:[%s6703_s29 + $0x220] sm:$0xff]  ;;  %v696_v45 = vld [vmem:[%s6703_s29 + $0x228] sm:$0xff]  ;;  %v934_v33 = vlaneseq }
  0x31   : > { %850 = vmatprep.mubr.f32.mxu1 %v706_v25  ;;  %v5163_v43 = vpack.c.bf16 %v694_v41, %v693_v40  ;;  %v5166_v46 = vpack.c.bf16 %v696_v45, %v695_v44  ;;  %v697_v47 = vld [vmem:[%s6703_s29 + $0x230] sm:$0xff]  ;;  %v698_v48 = vld [vmem:[%s6703_s29 + $0x238] sm:$0xff]  ;;  %v699_v50 = vld [vmem:[%s6703_s29 + $0x240] sm:$0xff] }
  0x32   : > { %5118 = vmatpush3.bf16.msra.mxu0 %v5117_v10  ;;  %v5169_v49 = vpack.c.bf16 %v698_v48, %v697_v47  ;;  %v700_v51 = vld [vmem:[%s6703_s29 + $0x248] sm:$0xf]  ;;  %v626_v53 = vld [vmem:[%s5778_s24 + $0x10] sm:$0xf]  ;;  %v701_v56 = vld [vmem:[%s6705_s22] sm:$0xf] }
  0x33   : > { %5150 = vmatpush3.bf16.msra.mxu1 %v5149_v13  ;;  %5120 = vmatprep.subr.bf16.mxu0 %v5119_v14  ;;  %v5172_v52 = vpack.c.bf16 %v700_v51, %v699_v50  ;;  %v926_v2 = vld [vmem:[%s6706_s23] sm:$0x1]  ;;  %v970_v13 = vld [vmem:[%s6657_s6 + $0x8] sm:$0xff]  ;;  %v971_v15 = vld [vmem:[%s6657_s6 + $0x10] sm:$0xff]  ;;  %s6707_s24 = sld [smem:[#allocation11_spill]]  ;;  %s6708_s23 = smov 48  }
  0x34   : > { %5152 = vmatprep.subr.bf16.mxu1 %v5151_v18  ;;  %v969_v12 = vld [vmem:[%s6657_s6] sm:$0xff]  ;;  %v972_v16 = vld [vmem:[%s6657_s6 + $0x18] sm:$0xff]  ;;  %s6716_s22 = sld [smem:[#allocation4_spill]] (%p5614_p4) }
  0x35   : > { %v5176_v14 = vpack.c.bf16 %v970_v13, %v969_v12  ;;  %v4273_v24 = vld [vmem:[%s6656_s5] ss:$0 sm:$0xff] }
  0x36   : > { %5122 = vmatpush3.bf16.msra.mxu0 %v5121_v26 }
  0x37   : > { %5154 = vmatpush3.bf16.msra.mxu1 %v5153_v27  ;;  %5124 = vmatprep.subr.bf16.mxu0 %v5123_v28  ;;  %v4274_v27 = vld [vmem:[%s6658_s7] ss:$0 sm:$0xff] }
  0x38   : > { %5156 = vmatprep.subr.bf16.mxu1 %v5155_v31 }
  0x3a   : > { %5126 = vmatpush3.bf16.msra.mxu0 %v5125_v34  ;;  %v935_v34 = vand.u32 127, %v934_v33 }
  0x3b   : > { %5158 = vmatpush3.bf16.msra.mxu1 %v5157_v35  ;;  %5175 = vmatprep.subr.bf16.mxu0 %v5472_v39  ;;  %v5479_v35 = vmov -1e+30  }
  0x3c   : > { %5159 = vmatprep.subr.bf16.mxu1 %v5472_v39  ;;  %vm936_vm9 = vcmp.lt.s32.totalorder %v935_v34, 5 }
  0x3d   : > { %781 = vmatmul.mubr.f32.vlgmr.msra.gmra.mrb[0].mxu0 %v624_v17  ;;  %v5179_v17 = vpack.c.bf16 %v972_v16, %v971_v15  ;;  %v5915_v36 = vsel %vm936_vm9, 0.0, %v5479_v35  ;;  %v4282_v15 = vld [vmem:[%s6660_s9] ss:$0 sm:$0xff] }
  0x3e   : > { %851 = vmatmul.mubr.f32.vlgmr.msra.gmra.mrb[0].mxu1 %v625_v22  ;;  %4751 = vmatprep.mubr.msk.f32.mxu0 %vm5473_vm0, %v5474_v42  ;;  %v4272_v22 = vld [vmem:[%s6707_s24] ss:$0 sm:$0xff] }
  0x3f   : > { %5161 = vmatpush3.bf16.msra.mxu1 %v5160_v38  ;;  %4740 = vmatprep.mubr.msk.f32.mxu1 %vm5473_vm0, %v5474_v42 }
  0x40   : > { %5162 = vmatprep.subr.bf16.mxu1 %v5472_v39  ;;  %5177 = vmatpush3.bf16.msra.mxu0 %v5176_v14 }
  0x41   : > { %5178 = vmatprep.subr.bf16.mxu0 %v5472_v39 }
  0x43   : > { %5164 = vmatpush3.bf16.msra.mxu1 %v5163_v43 }
  0x44   : > { %5165 = vmatprep.subr.bf16.mxu1 %v5472_v39  ;;  %5180 = vmatpush3.bf16.msra.mxu0 %v5179_v17  ;;  %v4284_v17 = vld [vmem:[%s6661_s10] ss:$0 sm:$0xff] }
  0x45   : > { %4769 = vmatprep.subr.mxu0 %v5474_v42 }
  0x47   : > { %5167 = vmatpush3.bf16.msra.mxu1 %v5166_v46 }
  0x48   : > { %5168 = vmatprep.subr.bf16.mxu1 %v5472_v39 }
  0x4b   : > { %5170 = vmatpush3.bf16.msra.mxu1 %v5169_v49 }
  0x4c   : > { %5171 = vmatprep.subr.bf16.mxu1 %v5472_v39 }
  0x4f   : > { %5174 = vmatpush3.bf16.msk.msra.mxu1 %vm5173_vm3, %v5172_v52 }
  0x50   : > { %4754 = vmatprep.subr.mxu1 %v5474_v42 }
  0x52   : > { %4741 = vmatmul.mubr.msk.f32.vlgmr.msra.gmra.mrb[2].mxu1 %vm709_vm4, %v626_v53 }
  0x53   : > { %4756 = vmatprep.mubr.msk.f32.mxu1 %vm5473_vm0, %v5474_v42 }
 0x110   : > { %v4511_v54 = vpop.f32.mrb[0].mxu0 }
 0x111   : > { %v4546_v55 = vpop.f32.mrb[0].mxu1  ;;  %v4512_v57 = vpop.f32.mrb[1].mxu0 }
 0x112   : > { %v4513_v58 = vadd.f32 %v4512_v57, %v4511_v54  ;;  %v4547_v59 = vpop.f32.mrb[1].mxu1 }
 0x113   : > { %v4548_v60 = vadd.f32 %v4547_v59, %v4546_v55 }
 0x114   : > { %v783_v61 = vadd.f32 %v4513_v58, %v701_v56 }
 0x116   : > { %v853_v62 = vadd.f32 %v4548_v60, %v783_v61 }
 0x125   : > { %v922_v63 = vpop.f32.mrb[2].mxu1 }
 0x126   : > { %v923_v0 = vadd.f32 %v922_v63, %v853_v62  ;;  %v4742_v1 = vpop.f32.mrb[3].mxu1 }
 0x128   : > { %v928_v3 = vrot.slane %v923_v0, 7 }
 0x12a   : > { %v931_v4 = vsel %vm930_vm5, %v926_v2, %v928_v3 }
 0x12b   : > { %v5874_v5 = vsel %vm932_vm6, %v931_v4, 0.0  ;;  %v1389_v4 = vld [vmem:[%s6659_s8] sm:$0xff] }
 0x12c   : > { %v941_v6 = vsel %vm940_vm7, %v5874_v5, 0.0 }
 0x12d   : > { %942 = vadd.xlane.f32.xlu0 %v941_v6  ;;  %v1390_v6 = vld [vmem:[%s6659_s8 + $0x8] sm:$0xff] }
 0x1ba   : > { %v943_v7 = vpop.xlane.xlu0 %942 }
 0x1bb   : > { %v945_v8 = vmul.f32 0.03125, %v943_v7  ;;  %v1391_v7 = vld [vmem:[%s6659_s8 + $0x10] sm:$0xff] }
 0x1bd   : > { %v946_v9 = vsub.f32 %v5874_v5, %v945_v8  ;;  %v5182_v8 = vpack.c.bf16 %v1390_v6, %v1389_v4  ;;  %v4287_v6 = vld [vmem:[%s6665_s14] ss:$0 sm:$0xff] }
 0x1bf   : > { %v947_v10 = vmul.f32 %v946_v9, %v946_v9 }
 0x1c1   : > { %v948_v11 = vsel %vm940_vm7, %v947_v10, 0.0 }
 0x1c2   : > { %949 = vadd.xlane.f32.xlu0 %v948_v11 }
 0x24f   : > { %v950_v18 = vpop.xlane.xlu0 %949 }
 0x250   : > { %v951_v19 = vmul.f32 0.03125, %v950_v18 }
 0x252   : > { %v952_v20 = vadd.f32 1e-06, %v951_v19 }
 0x254   : > { %5382 = vrsqrt.f32 %v952_v20 }
 0x25e   : > { %v5383_v21 = vpop.eup %5382 }
 0x25f   : > { %v954_v23 = vmul.f32 %v5383_v21, %v946_v9  ;;  %v1392_v9 = vld [vmem:[%s6659_s8 + $0x18] sm:$0xff] }
 0x260   : > { %v5185_v10 = vpack.c.bf16 %v1392_v9, %v1391_v7 }
 0x261   : > { %v961_v25 = vmul.f32 %v4272_v22, %v954_v23 }
 0x263   : > { %v968_v26 = vadd.f32 %v4273_v24, %v961_v25 }
 0x265   : > { %4752 = vmatmul.mubr.msk.f32.vlgmr.msra.gmra.mrb[2].mxu0 %vm940_vm7, %v968_v26 }
 0x266   : > { %4771 = vmatprep.mubr.msk.f32.mxu0 %vm5473_vm0, %v5474_v42 }
 0x338   : > { %v1049_v28 = vpop.f32.mrb[2].mxu0 }
 0x339   : > { %v1050_v29 = vadd.f32 %v4274_v27, %v1049_v28  ;;  %v4753_v30 = vpop.f32.mrb[3].mxu0  ;;  %v1511_v28 = vld [vmem:[%s6664_s13] sm:$0xff] }
 0x33a   : > { %v1513_v30 = vld [vmem:[%s6664_s13 + $0x10] sm:$0xff] }
 0x33b   : > { %1143 = vrot.lane.b32.xlu0 %v1050_v29, %s6682_s0  ;;  %1054 = vrot.lane.b32.xlu1 %v1050_v29, %s6688_s2 }
 0x33f   : > { %1221 = vrot.lane.b32.xlu0 %v1050_v29, %s6686_s21 }
 0x3ad   : > { %v1055_v31 = vpop.permute.xlu1 %1054  ;;  %v1144_v32 = vpop.permute.xlu0 %1143 }
 0x3ae   : > { %4755 = vmatpush3.xpose.msk.msra.mxu1 %vm1056_vm8, %v1055_v31  ;;  %v1514_v31 = vld [vmem:[%s6664_s13 + $0x18] sm:$0xff] }
 0x3af   : > { %4759 = vmatprep.subr.mxu1 %v5474_v42 }
 0x3b1   : > { %4757 = vmatmul.mubr.msk.f32.vlgmr.msra.gmra.mrb[4].mxu1 %vm1056_vm8, %v1050_v29  ;;  %v1222_v48 = vpop.permute.xlu0 %1221 }
 0x3b2   : > { %4760 = vmatpush3.msra.mxu1 %v1144_v32  ;;  %4761 = vmatprep.mubr.msk.f32.mxu1 %vm5473_vm0, %v5474_v42  ;;  %v5191_v32 = vpack.c.bf16 %v1514_v31, %v1513_v30  ;;  %v5483_v30 = vmov -1.0  }
 0x3b3   : > { %4764 = vmatprep.subr.mxu1 %v5474_v42 }
 0x484   : > { %v1127_v37 = vpop.f32.mrb[4].mxu1 }
 0x485   : > { %v1128_v38 = vadd.f32 %v1127_v37, %v5915_v36  ;;  %v4758_v40 = vpop.f32.mrb[5].mxu1 }
 0x487   : > { %v1132_v41 = vsel %vm1131_vm10, %v1128_v38, -inf }
 0x488   : > { %1133 = vmax.xlane.f32.xlu1 %v1132_v41  ;;  %v4286_v41 = vld [vmem:[%s6663_s12] ss:$0 sm:$0xff] }
 0x515   : > { %v1134_v43 = vpop.xlane.xlu1 %1133 }
 0x516   : > { %v1135_v44 = vsub.f32 %v1128_v38, %v1134_v43  ;;  %v4285_v38 = vld [vmem:[%s6662_s11] ss:$0 sm:$0xff] }
 0x518   : > { %v1136_v45 = vmul.f32 1.442695, %v1135_v44 }
 0x51a   : > { %5384 = vpow2.f32 %v1136_v45  ;;  %v1622_v45 = vld [vmem:[%s6666_s15] sm:$0xff] }
 0x524   : > { %v5385_v46 = vpop.eup %5384 }
 0x525   : > { %v1138_v47 = vsel %vm1131_vm10, %v5385_v46, 0.0 }
 0x526   : > { %1139 = vadd.xlane.f32.xlu0 %v1138_v47 }
 0x53c   : > { %1219 = vrot.lane.b32.xlu0 %v1050_v29, %s6684_s26 }
 0x5b3   : > { %v1140_v49 = vpop.xlane.xlu0 %1139 }
 0x5b4   : > { %5386 = vrcp.f32 %v1140_v49  ;;  %v1625_v49 = vld [vmem:[%s6666_s15 + $0x18] sm:$0xff] }
 0x5b7   : > { %v1220_v52 = vpop.permute.xlu0 %1219 }
 0x5be   : > { %v5387_v50 = vpop.eup %5386 }
 0x5bf   : > { %v1142_v51 = vmul.f32 %v5387_v50, %v5385_v46  ;;  %v1623_v46 = vld [vmem:[%s6666_s15 + $0x8] sm:$0xff] }
 0x5c0   : > { %v5194_v47 = vpack.c.bf16 %v1623_v46, %v1622_v45 }
 0x5c1   : > { %4762 = vmatmul.mubr.msk.f32.vlgmr.msra.gmra.mrb[6].mxu1 %vm1131_vm10, %v1142_v51  ;;  %v1626_v51 = vld [vmem:[%s6666_s15 + $0x20] sm:$0xff] }
 0x5c2   : > { %4765 = vmatpush3.xpose.msk.msra.mxu1 %vm1056_vm8, %v1222_v48  ;;  %4766 = vmatprep.mubr.msk.f32.mxu1 %vm5473_vm0, %v5474_v42  ;;  %v1624_v48 = vld [vmem:[%s6666_s15 + $0x10] sm:$0xff] }
 0x5c3   : > { %5181 = vmatprep.subr.bf16.mxu1 %v5472_v39  ;;  %v5197_v50 = vpack.c.bf16 %v1625_v49, %v1624_v48 }
 0x5c5   : > { %4767 = vmatmul.mubr.msk.f32.vlgmr.msra.gmra.mrb[8].mxu1 %vm1056_vm8, %v1220_v52  ;;  %v1627_v52 = vld [vmem:[%s6666_s15 + $0x28] sm:$0xff] }
 0x5c6   : > { %4782 = vmatprep.mubr.msk.f32.mxu1 %vm5473_vm0, %v5474_v42  ;;  %5183 = vmatpush3.bf16.msra.mxu1 %v5182_v8 }
 0x5c7   : > { %5184 = vmatprep.subr.bf16.mxu1 %v5472_v39 }
 0x5ca   : > { %5186 = vmatpush3.bf16.msra.mxu1 %v5185_v10 }
 0x5cb   : > { %5193 = vmatprep.subr.bf16.mxu1 %v5472_v39 }
 0x694   : > { %v1215_v53 = vpop.f32.mrb[6].mxu1 }
 0x695   : > { %v4763_v54 = vpop.f32.mrb[7].mxu1 }
 0x696   : > { %v1628_v54 = vld [vmem:[%s6666_s15 + $0x30] sm:$0xff] }
 0x698   : > { %v1293_v55 = vpop.f32.mrb[8].mxu1 }
 0x699   : > { %v1294_v56 = vadd.f32 %v1293_v55, %v5915_v36  ;;  %v4768_v57 = vpop.f32.mrb[9].mxu1  ;;  %v1629_v55 = vld [vmem:[%s6666_s15 + $0x38] sm:$0xff] }
 0x69a   : > { %v1630_v57 = vld [vmem:[%s6666_s15 + $0x40] sm:$0xff] }
 0x69b   : > { %v1297_v58 = vsel %vm1131_vm10, %v1294_v56, -inf }
 0x69c   : > { %1298 = vmax.xlane.f32.xlu1 %v1297_v58  ;;  %v1631_v58 = vld [vmem:[%s6666_s15 + $0x48] sm:$0xff] }
 0x6ad   : > { %1308 = vrot.lane.b32.xlu1 %v1050_v29, %s6678_s28 }
 0x729   : > { %v1299_v59 = vpop.xlane.xlu1 %1298 }
 0x72a   : > { %v1300_v60 = vsub.f32 %v1294_v56, %v1299_v59  ;;  %v5203_v56 = vpack.c.bf16 %v1629_v55, %v1628_v54  ;;  %v5206_v59 = vpack.c.bf16 %v1631_v58, %v1630_v57  ;;  %v4299_v54 = vld [vmem:[%s6657_s6 + $0x30] sm:$0xff]  ;;  %v4300_v55 = vld [vmem:[%s6657_s6 + $0x38] sm:$0xff] }
 0x72c   : > { %v1301_v61 = vmul.f32 1.442695, %v1300_v60  ;;  %v1632_v60 = vld [vmem:[%s6666_s15 + $0x50] sm:$0xff] }
 0x72d   : > { %v1309_v62 = vpop.permute.xlu1 %1308 }
 0x72e   : > { %5388 = vpow2.f32 %v1301_v61  ;;  %4770 = vmatpush3.msra.mxu0 %v1309_v62  ;;  %v1633_v61 = vld [vmem:[%s6666_s15 + $0x58] sm:$0xff] }
 0x72f   : > { %5187 = vmatprep.subr.bf16.mxu0 %v5472_v39  ;;  %v5209_v62 = vpack.c.bf16 %v1633_v61, %v1632_v60  ;;  %v4295_v61 = vld [vmem:[%s6707_s24 + $0x1] ss:$0 sm:$0xff] }
 0x738   : > { %v5389_v63 = vpop.eup %5388 }
 0x739   : > { %v1303_v0 = vsel %vm1131_vm10, %v5389_v63, 0.0 }
 0x73a   : > { %1304 = vadd.xlane.f32.xlu0 %v1303_v0  ;;  %v1635_v0 = vld [vmem:[%s6666_s15 + $0x68] sm:$0xff] }
 0x7c7   : > { %v1305_v1 = vpop.xlane.xlu0 %1304 }
 0x7c8   : > { %5390 = vrcp.f32 %v1305_v1 }
 0x7d2   : > { %v5391_v2 = vpop.eup %5390 }
 0x7d3   : > { %v1307_v3 = vmul.f32 %v5391_v2, %v5389_v63  ;;  %v1634_v63 = vld [vmem:[%s6666_s15 + $0x60] sm:$0xff]  ;;  %v1636_v2 = vld [vmem:[%s6666_s15 + $0x70] sm:$0xff] }
 0x7d4   : > { %v5212_v1 = vpack.c.bf16 %v1635_v0, %v1634_v63  ;;  %v4296_v63 = vld [vmem:[%s6656_s5 + $0x1] ss:$0 sm:$0xff] }
 0x7d5   : > { %4772 = vmatmul.mubr.msk.f32.vlgmr.msra.gmra.mrb[4].mxu0 %vm1131_vm10, %v1307_v3  ;;  %v1637_v3 = vld [vmem:[%s6666_s15 + $0x78] sm:$0xff] }
 0x7d6   : > { %4793 = vmatprep.mubr.msk.f32.mxu0 %vm5473_vm0, %v5474_v42  ;;  %v5215_v4 = vpack.c.bf16 %v1637_v3, %v1636_v2  ;;  %v4302_v2 = vld [vmem:[%s6658_s7 + $0x1] ss:$0 sm:$0xff] }
 0x8a8   : > { %v1380_v11 = vpop.f32.mrb[4].mxu0 }
 0x8a9   : > { %1385 = vrot.lane.b32.xlu1 %v1380_v11, %s6680_s20  ;;  %v4773_v12 = vpop.f32.mrb[5].mxu0  ;;  %s4268_s20 = sshll.u32 %s616_s3, 3  ;;  %s4476_s3 = sshll.u32 (%p5614_p4), %s6716_s22, 2 }
 0x8aa   : > { %s6285_s1 = scalar_lea.vmem [#allocation2], %s4268_s20 }
 0x91b   : > { %v1386_v13 = vpop.permute.xlu1 %1385 }
 0x91c   : > { %v1388_v14 = vsel %vm1056_vm8, %v1215_v53, %v1386_v13  ;;  %v5200_v53 = vpack.c.bf16 %v1627_v52, %v1626_v51  ;;  %v4297_v52 = vld [vmem:[%s6657_s6 + $0x20] sm:$0xff] }
 0x91d   : > { %4783 = vmatmul.mubr.msk.f32.vlgmr.msra.gmra.mrb[10].mxu1 %vm940_vm7, %v1388_v14 }
 0x91e   : > { %4828 = vmatprep.mubr.msk.f32.mxu1 %vm5473_vm0, %v5474_v42  ;;  %5195 = vmatpush3.bf16.msra.mxu1 %v5194_v47 }
 0x91f   : > { %5196 = vmatprep.subr.bf16.mxu1 %v5472_v39 }
 0x922   : > { %5198 = vmatpush3.bf16.msra.mxu1 %v5197_v50 }
 0x923   : > { %5199 = vmatprep.subr.bf16.mxu1 %v5472_v39 }
 0x926   : > { %5201 = vmatpush3.bf16.msra.mxu1 %v5200_v53 }
 0x927   : > { %5202 = vmatprep.subr.bf16.mxu1 %v5472_v39 }
 0x92a   : > { %5204 = vmatpush3.bf16.msra.mxu1 %v5203_v56  ;;  %v5221_v56 = vpack.c.bf16 %v4300_v55, %v4299_v54  ;;  %v4318_v54 = vld [vmem:[%s6661_s10 + $0x1] ss:$0 sm:$0xff] }
 0x92b   : > { %5205 = vmatprep.subr.bf16.mxu1 %v5472_v39 }
 0x92e   : > { %5207 = vmatpush3.bf16.msra.mxu1 %v5206_v59 }
 0x92f   : > { %5208 = vmatprep.subr.bf16.mxu1 %v5472_v39 }
 0x932   : > { %5210 = vmatpush3.bf16.msra.mxu1 %v5209_v62 }
 0x933   : > { %5211 = vmatprep.subr.bf16.mxu1 %v5472_v39 }
 0x936   : > { %5213 = vmatpush3.bf16.msra.mxu1 %v5212_v1 }
 0x937   : > { %5214 = vmatprep.subr.bf16.mxu1 %v5472_v39 }
 0x93a   : > { %5216 = vmatpush3.bf16.msra.mxu1 %v5215_v4 }
 0x93b   : > { %5229 = vmatprep.subr.bf16.mxu1 %v5472_v39 }
 0x9f0   : > { %v1469_v16 = vpop.f32.mrb[10].mxu1 }
 0x9f1   : > { %v1470_v18 = vadd.f32 %v4282_v15, %v1469_v16  ;;  %v4784_v19 = vpop.f32.mrb[11].mxu1 }
 0x9f3   : > { %v1480_v20 = vmul.f32 %v4284_v17, %v1470_v18 }
 0x9f5   : > { %v5963_v21 = vadd.f32 %v1480_v20, %v5874_v5  ;;  %v1512_v5 = vld [vmem:[%s6664_s13 + $0x8] sm:$0xff] }
 0x9f6   : > { %v5188_v29 = vpack.c.bf16 %v1512_v5, %v1511_v28 }
 0x9f7   : > { %v1484_v22 = vsel %vm940_vm7, %v5963_v21, 0.0 }
 0x9f8   : > { %1485 = vadd.xlane.f32.xlu1 %v1484_v22  ;;  %5189 = vmatpush3.bf16.msra.mxu0 %v5188_v29 }
 0x9f9   : > { %5190 = vmatprep.subr.bf16.mxu0 %v5472_v39 }
 0x9fc   : > { %5192 = vmatpush3.bf16.msra.mxu0 %v5191_v32 }
 0x9fd   : > { %5217 = vmatprep.subr.bf16.mxu0 %v5472_v39 }
 0xa85   : > { %v1486_v23 = vpop.xlane.xlu1 %1485 }
 0xa86   : > { %v1487_v24 = vmul.f32 0.03125, %v1486_v23 }
 0xa88   : > { %v1488_v25 = vsub.f32 %v5963_v21, %v1487_v24 }
 0xa8a   : > { %v1489_v26 = vmul.f32 %v1488_v25, %v1488_v25 }
 0xa8c   : > { %v1490_v27 = vsel %vm940_vm7, %v1489_v26, 0.0 }
 0xa8d   : > { %1491 = vadd.xlane.f32.xlu0 %v1490_v27 }
 0xb1a   : > { %v1492_v33 = vpop.xlane.xlu0 %1491 }
 0xb1b   : > { %v1493_v34 = vmul.f32 0.03125, %v1492_v33 }
 0xb1d   : > { %v1494_v35 = vadd.f32 1e-06, %v1493_v34 }
 0xb1f   : > { %5392 = vrsqrt.f32 %v1494_v35 }
 0xb29   : > { %v5393_v37 = vpop.eup %5392 }
 0xb2a   : > { %v1496_v40 = vmul.f32 %v5393_v37, %v1488_v25  ;;  %v4291_v37 = vld [vmem:[%s6667_s16] ss:$0 sm:$0xff] }
 0xb2c   : > { %v1503_v43 = vmul.f32 %v4285_v38, %v1496_v40  ;;  %v4292_v40 = vld [vmem:[%s6668_s17] ss:$0 sm:$0xff] }
 0xb2e   : > { %v1510_v44 = vadd.f32 %v4286_v41, %v1503_v43 }
 0xb30   : > { %4794 = vmatmul.mubr.msk.f32.vlgmr.msra.gmra.mrb[6].mxu0 %vm940_vm7, %v1510_v44 }
 0xb31   : > { %4839 = vmatprep.mubr.msk.f32.mxu0 %vm5473_vm0, %v5474_v42 }
 0xc03   : > { %v1591_v7 = vpop.f32.mrb[6].mxu0 }
 0xc04   : > { %v1592_v8 = vadd.f32 %v4287_v6, %v1591_v7  ;;  %v4795_v9 = vpop.f32.mrb[7].mxu0 }
 0xc06   : > { %v1596_v10 = vmul.f32 0.70710677, %v1592_v8  ;;  %v1595_v33 = vmul.f32 0.5, %v1592_v8 }
 0xc08   : > { %v1599_v11 = vand.u32 2147483647, %v1596_v10  ;;  %vm1597_vm11 = vcmp.ge.f32.partialorder %v1596_v10, 0.0 }
 0xc09   : > { %v1598_v31 = vsel %vm1597_vm11, 1.0, %v5483_v30 }
 0xc0a   : > { %v1600_v12 = vmul.f32 0.3275911, %v1599_v11  ;;  %v1613_v14 = vsub.f32 0.0, %v1599_v11 }
 0xc0c   : > { %v1601_v13 = vadd.f32 1.0, %v1600_v12  ;;  %v1614_v16 = vmul.f32 %v1613_v14, %v1599_v11 }
 0xc0e   : > { %5394 = vrcp.f32 %v1601_v13  ;;  %v1615_v19 = vmul.f32 1.442695, %v1614_v16 }
 0xc10   : > { %5396 = vpow2.f32 %v1615_v19 }
 0xc18   : > { %v5395_v15 = vpop.eup %5394 }
 0xc19   : > { %v1604_v17 = vmul.f32 1.0614054, %v5395_v15 }
 0xc1a   : > { %v5397_v28 = vpop.eup %5396 }
 0xc1b   : > { %v4289_v18 = vadd.f32 -1.4531521, %v1604_v17 }
 0xc1d   : > { %v1606_v20 = vmul.f32 %v5395_v15, %v4289_v18 }
 0xc1f   : > { %v1607_v22 = vadd.f32 1.4214138, %v1606_v20 }
 0xc21   : > { %v1608_v23 = vmul.f32 %v5395_v15, %v1607_v22 }
 0xc23   : > { %v4290_v24 = vadd.f32 -0.28449672, %v1608_v23 }
 0xc25   : > { %v1610_v25 = vmul.f32 %v5395_v15, %v4290_v24 }
 0xc27   : > { %v1611_v26 = vadd.f32 0.2548296, %v1610_v25 }
 0xc29   : > { %v1612_v27 = vmul.f32 %v5395_v15, %v1611_v26 }
 0xc2b   : > { %v1617_v5 = vmul.f32 %v5397_v28, %v1612_v27 }
 0xc2d   : > { %v1618_v29 = vsub.f32 1.0, %v1617_v5 }
 0xc2f   : > { %v1619_v32 = vmul.f32 %v1618_v29, %v1598_v31 }
 0xc31   : > { %v1620_v34 = vadd.f32 1.0, %v1619_v32 }
 0xc33   : > { %v1621_v35 = vmul.f32 %v1620_v34, %v1595_v33 }
 0xc35   : > { %4829 = vmatmul.mubr.f32.vlgmr.msra.gmra.mrb[12].mxu1 %v1621_v35 }
 0xc36   : > { %4881 = vmatprep.mubr.msk.f32.mxu1 %vm5473_vm0, %v5474_v42 }
 0xd08   : > { %v1711_v38 = vpop.f32.mrb[12].mxu1 }
 0xd09   : > { %v1712_v41 = vadd.f32 %v4291_v37, %v1711_v38  ;;  %v4830_v43 = vpop.f32.mrb[13].mxu1 }
 0xd0a   : > { %v4311_v43 = vld [vmem:[%s6659_s8 + $0x28] sm:$0xff] }
 0xd0b   : > { %v1722_v44 = vmul.f32 %v4292_v40, %v1712_v41  ;;  %v4310_v41 = vld [vmem:[%s6659_s8 + $0x20] sm:$0xff] }
 0xd0d   : > { %v6061_v45 = vadd.f32 %v1722_v44, %v5963_v21  ;;  %v4298_v21 = vld [vmem:[%s6657_s6 + $0x28] sm:$0xff]  ;;  %v4312_v44 = vld [vmem:[%s6659_s8 + $0x30] sm:$0xff] }
 0xd0e   : > { %v5218_v53 = vpack.c.bf16 %v4298_v21, %v4297_v52  ;;  %v4315_v21 = vld [vmem:[%s6660_s9 + $0x1] ss:$0 sm:$0xff] }
 0xd0f   : > { %v1728_v46 = vsel %vm940_vm7, %v6061_v45, 0.0 }
 0xd10   : > { %1729 = vadd.xlane.f32.xlu0 %v1728_v46  ;;  %5219 = vmatpush3.bf16.msra.mxu0 %v5218_v53  ;;  %v5224_v46 = vpack.c.bf16 %v4311_v43, %v4310_v41  ;;  %v4347_v41 = vld [vmem:[%s6666_s15 + $0xf8] sm:$0xff] }
 0xd11   : > { %5220 = vmatprep.subr.bf16.mxu0 %v5472_v39 }
 0xd14   : > { %5222 = vmatpush3.bf16.msra.mxu0 %v5221_v56 }
 0xd15   : > { %4842 = vmatprep.subr.mxu0 %v5474_v42 }
 0xd9d   : > { %v1730_v47 = vpop.xlane.xlu0 %1729 }
 0xd9e   : > { %v1731_v48 = vmul.f32 0.03125, %v1730_v47  ;;  %v4313_v47 = vld [vmem:[%s6659_s8 + $0x38] sm:$0xff] }
 0xda0   : > { %v1732_v49 = vsub.f32 %v6061_v45, %v1731_v48  ;;  %v5227_v48 = vpack.c.bf16 %v4313_v47, %v4312_v44  ;;  %v4328_v44 = vld [vmem:[%s6665_s14 + $0x1] ss:$0 sm:$0xff] }
 0xda2   : > { %v1733_v50 = vmul.f32 %v1732_v49, %v1732_v49 }
 0xda4   : > { %v1734_v51 = vsel %vm940_vm7, %v1733_v50, 0.0 }
 0xda5   : > { %1735 = vadd.xlane.f32.xlu0 %v1734_v51 }
 0xe32   : > { %v1736_v57 = vpop.xlane.xlu0 %1735 }
 0xe33   : > { %v1737_v58 = vmul.f32 0.03125, %v1736_v57 }
 0xe35   : > { %v1738_v59 = vadd.f32 1e-06, %v1737_v58 }
 0xe37   : > { %5398 = vrsqrt.f32 %v1738_v59 }
 0xe41   : > { %v5399_v60 = vpop.eup %5398 }
 0xe42   : > { %v1740_v62 = vmul.f32 %v5399_v60, %v1732_v49 }
 0xe44   : > { %v1747_v0 = vmul.f32 %v4295_v61, %v1740_v62 }
 0xe46   : > { %v1754_v1 = vadd.f32 %v4296_v63, %v1747_v0 }
 0xe48   : > { %4840 = vmatmul.mubr.msk.f32.vlgmr.msra.gmra.mrb[8].mxu0 %vm940_vm7, %v1754_v1  ;;  %v4323_v1 = vld [vmem:[%s6664_s13 + $0x20] sm:$0xff] }
 0xe49   : > { %4844 = vmatprep.mubr.msk.f32.mxu0 %vm5473_vm0, %v5474_v42 }
 0xf1b   : > { %v1837_v3 = vpop.f32.mrb[8].mxu0 }
 0xf1c   : > { %v1838_v4 = vadd.f32 %v4302_v2, %v1837_v3  ;;  %v4841_v6 = vpop.f32.mrb[9].mxu0  ;;  %v4325_v3 = vld [vmem:[%s6664_s13 + $0x30] sm:$0xff] }
 0xf1e   : > { %1842 = vrot.lane.b32.xlu0 %v1838_v4, %s6688_s2 }
 0xf22   : > { %1929 = vrot.lane.b32.xlu0 %v1838_v4, %s6682_s0  ;;  %s6713_s0 = smov 80  }
 0xf26   : > { %2005 = vrot.lane.b32.xlu0 %v1838_v4, %s6684_s26  ;;  %s6714_s26 = smov 112  }
 0xf90   : > { %v1843_v7 = vpop.permute.xlu0 %1842 }
 0xf91   : > { %4843 = vmatpush3.xpose.msk.msra.mxu0 %vm1056_vm8, %v1843_v7 }
 0xf92   : > { %4847 = vmatprep.subr.mxu0 %v5474_v42 }
 0xf94   : > { %4845 = vmatmul.mubr.msk.f32.vlgmr.msra.gmra.mrb[10].mxu0 %vm1056_vm8, %v1838_v4  ;;  %v1930_v8 = vpop.permute.xlu0 %1929 }
 0xf95   : > { %4848 = vmatpush3.msra.mxu0 %v1930_v8  ;;  %4849 = vmatprep.mubr.msk.f32.mxu0 %vm5473_vm0, %v5474_v42 }
 0xf96   : > { %4852 = vmatprep.subr.mxu0 %v5474_v42 }
 0xf98   : > { %v2006_v23 = vpop.permute.xlu0 %2005 }
0x1067   : > { %v1914_v9 = vpop.f32.mrb[10].mxu0 }
0x1068   : > { %v1915_v10 = vadd.f32 %v1914_v9, %v5915_v36  ;;  %v4846_v11 = vpop.f32.mrb[11].mxu0 }
0x1069   : > { %v4321_v11 = vld [vmem:[%s6662_s11 + $0x1] ss:$0 sm:$0xff] }
0x106a   : > { %v1918_v12 = vsel %vm1131_vm10, %v1915_v10, -inf }
0x106b   : > { %1919 = vmax.xlane.f32.xlu1 %v1918_v12 }
0x10f8   : > { %v1920_v13 = vpop.xlane.xlu1 %1919 }
0x10f9   : > { %v1921_v14 = vsub.f32 %v1915_v10, %v1920_v13  ;;  %v4322_v13 = vld [vmem:[%s6663_s12 + $0x1] ss:$0 sm:$0xff] }
0x10fb   : > { %v1922_v15 = vmul.f32 1.442695, %v1921_v14 }
0x10fd   : > { %5400 = vpow2.f32 %v1922_v15 }
0x1107   : > { %v5401_v16 = vpop.eup %5400 }
0x1108   : > { %v1924_v17 = vsel %vm1131_vm10, %v5401_v16, 0.0 }
0x1109   : > { %1925 = vadd.xlane.f32.xlu1 %v1924_v17  ;;  %v4333_v17 = vld [vmem:[%s6666_s15 + $0x88] sm:$0xff] }
0x111a   : > { %2007 = vrot.lane.b32.xlu1 %v1838_v4, %s6686_s21  ;;  %s6712_s21 = smov 96  }
0x1196   : > { %v1926_v18 = vpop.xlane.xlu1 %1925 }
0x1197   : > { %5402 = vrcp.f32 %v1926_v18 }
0x119a   : > { %v2008_v22 = vpop.permute.xlu1 %2007 }
0x11a1   : > { %v5403_v19 = vpop.eup %5402 }
0x11a2   : > { %v1928_v20 = vmul.f32 %v5403_v19, %v5401_v16  ;;  %v4332_v16 = vld [vmem:[%s6666_s15 + $0x80] sm:$0xff]  ;;  %v4334_v19 = vld [vmem:[%s6666_s15 + $0x90] sm:$0xff] }
0x11a3   : > { %v5236_v18 = vpack.c.bf16 %v4333_v17, %v4332_v16 }
0x11a4   : > { %4850 = vmatmul.mubr.msk.f32.vlgmr.msra.gmra.mrb[12].mxu0 %vm1131_vm10, %v1928_v20  ;;  %v4335_v20 = vld [vmem:[%s6666_s15 + $0x98] sm:$0xff] }
0x11a5   : > { %4853 = vmatpush3.xpose.msk.msra.mxu0 %vm1056_vm8, %v2008_v22  ;;  %4854 = vmatprep.mubr.msk.f32.mxu0 %vm5473_vm0, %v5474_v42  ;;  %v5239_v22 = vpack.c.bf16 %v4335_v20, %v4334_v19 }
0x11a6   : > { %4857 = vmatprep.subr.mxu0 %v5474_v42 }
0x11a8   : > { %4855 = vmatmul.mubr.msk.f32.vlgmr.msra.gmra.mrb[14].mxu0 %vm1056_vm8, %v2006_v23  ;;  %v4336_v23 = vld [vmem:[%s6666_s15 + $0xa0] sm:$0xff] }
0x11a9   : > { %4859 = vmatprep.mubr.msk.f32.mxu0 %vm5473_vm0, %v5474_v42 }
0x1277   : > { %v2001_v24 = vpop.f32.mrb[12].mxu0 }
0x1278   : > { %v4851_v25 = vpop.f32.mrb[13].mxu0 }
0x127b   : > { %v2079_v26 = vpop.f32.mrb[14].mxu0 }
0x127c   : > { %v2080_v27 = vadd.f32 %v2079_v26, %v5915_v36  ;;  %v4856_v28 = vpop.f32.mrb[15].mxu0  ;;  %v4338_v26 = vld [vmem:[%s6666_s15 + $0xb0] sm:$0xff] }
0x127e   : > { %v2083_v5 = vsel %vm1131_vm10, %v2080_v27, -inf }
0x127f   : > { %2084 = vmax.xlane.f32.xlu0 %v2083_v5  ;;  %v4340_v5 = vld [vmem:[%s6666_s15 + $0xc0] sm:$0xff] }
0x1295   : > { %2094 = vrot.lane.b32.xlu0 %v1838_v4, %s6708_s23  ;;  %v4326_v4 = vld [vmem:[%s6664_s13 + $0x38] sm:$0xff] }
0x1296   : > { %v5233_v6 = vpack.c.bf16 %v4326_v4, %v4325_v3 }
0x130c   : > { %v2085_v29 = vpop.xlane.xlu0 %2084 }
0x130d   : > { %v2086_v31 = vsub.f32 %v2080_v27, %v2085_v29  ;;  %v4339_v27 = vld [vmem:[%s6666_s15 + $0xb8] sm:$0xff]  ;;  %v4341_v29 = vld [vmem:[%s6666_s15 + $0xc8] sm:$0xff] }
0x130e   : > { %v5245_v28 = vpack.c.bf16 %v4339_v27, %v4338_v26  ;;  %v4360_v26 = vld [vmem:[%s6657_s6 + $0x50] sm:$0xff]  ;;  %v4361_v27 = vld [vmem:[%s6657_s6 + $0x58] sm:$0xff] }
0x130f   : > { %v2087_v32 = vmul.f32 1.442695, %v2086_v31  ;;  %v5248_v31 = vpack.c.bf16 %v4341_v29, %v4340_v5 }
0x1310   : > { %v2095_v33 = vpop.permute.xlu0 %2094 }
0x1311   : > { %5404 = vpow2.f32 %v2087_v32  ;;  %4858 = vmatpush3.msra.mxu0 %v2095_v33  ;;  %v4342_v32 = vld [vmem:[%s6666_s15 + $0xd0] sm:$0xff]  ;;  %v4343_v33 = vld [vmem:[%s6666_s15 + $0xd8] sm:$0xff] }
0x1312   : > { %5223 = vmatprep.subr.bf16.mxu0 %v5472_v39 }
0x131b   : > { %v5405_v34 = vpop.eup %5404 }
0x131c   : > { %v2089_v35 = vsel %vm1131_vm10, %v5405_v34, 0.0 }
0x131d   : > { %2090 = vadd.xlane.f32.xlu1 %v2089_v35  ;;  %v4344_v35 = vld [vmem:[%s6666_s15 + $0xe0] sm:$0xff] }
0x13aa   : > { %v2091_v37 = vpop.xlane.xlu1 %2090 }
0x13ab   : > { %5406 = vrcp.f32 %v2091_v37  ;;  %v4345_v37 = vld [vmem:[%s6666_s15 + $0xe8] sm:$0xff] }
0x13b5   : > { %v5407_v38 = vpop.eup %5406 }
0x13b6   : > { %v2093_v40 = vmul.f32 %v5407_v38, %v5405_v34  ;;  %v5251_v34 = vpack.c.bf16 %v4343_v33, %v4342_v32  ;;  %v5254_v38 = vpack.c.bf16 %v4345_v37, %v4344_v35  ;;  %v6270_v33 = vld [vmem:[%s6710_s18] ss:$0 sm:$0xff] }
0x13b7   : > { %v6278_v37 = vld [vmem:[%s6711_s19] ss:$0 sm:$0xff]  ;;  %s6717_s19 = sld [smem:[#allocation14_spill]] (%p5614_p4) }
0x13b8   : > { %4860 = vmatmul.mubr.msk.f32.vlgmr.msra.gmra.mrb[16].mxu0 %vm1131_vm10, %v2093_v40  ;;  %v4346_v40 = vld [vmem:[%s6666_s15 + $0xf0] sm:$0xff] }
0x13b9   : > { %4870 = vmatprep.mubr.msk.f32.mxu0 %vm5473_vm0, %v5474_v42  ;;  %5225 = vmatpush3.bf16.msra.mxu0 %v5224_v46  ;;  %v5257_v43 = vpack.c.bf16 %v4347_v41, %v4346_v40 }
0x13ba   : > { %5226 = vmatprep.subr.bf16.mxu0 %v5472_v39 }
0x13bd   : > { %5228 = vmatpush3.bf16.msra.mxu0 %v5227_v48  ;;  %s4169_s28 = scalar_lea.vmem (%p5614_p4), %s6717_s19, %s4476_s3 }
0x13be   : > { %5235 = vmatprep.subr.bf16.mxu0 %v5472_v39 }
0x148b   : > { %v2166_v49 = vpop.f32.mrb[16].mxu0 }
0x148c   : > { %2171 = vrot.lane.b32.xlu1 %v2166_v49, %s6709_s4  ;;  %v4861_v50 = vpop.f32.mrb[17].mxu0 }
0x14fe   : > { %v2172_v51 = vpop.permute.xlu1 %2171 }
0x14ff   : > { %v2174_v52 = vsel %vm1056_vm8, %v2001_v24, %v2172_v51  ;;  %v4337_v24 = vld [vmem:[%s6666_s15 + $0xa8] sm:$0xff] }
0x1500   : > { %4871 = vmatmul.mubr.msk.f32.vlgmr.msra.gmra.mrb[18].mxu0 %vm940_vm7, %v2174_v52  ;;  %v5242_v25 = vpack.c.bf16 %v4337_v24, %v4336_v23  ;;  %v4358_v24 = vld [vmem:[%s6657_s6 + $0x40] sm:$0xff] }
0x1501   : > { %4916 = vmatprep.mubr.msk.f32.mxu0 %vm5473_vm0, %v5474_v42  ;;  %5237 = vmatpush3.bf16.msra.mxu0 %v5236_v18 }
0x1502   : > { %5238 = vmatprep.subr.bf16.mxu0 %v5472_v39 }
0x1505   : > { %5240 = vmatpush3.bf16.msra.mxu0 %v5239_v22 }
0x1506   : > { %5241 = vmatprep.subr.bf16.mxu0 %v5472_v39 }
0x1509   : > { %5243 = vmatpush3.bf16.msra.mxu0 %v5242_v25 }
0x150a   : > { %5244 = vmatprep.subr.bf16.mxu0 %v5472_v39 }
0x150d   : > { %5246 = vmatpush3.bf16.msra.mxu0 %v5245_v28  ;;  %v5263_v28 = vpack.c.bf16 %v4361_v27, %v4360_v26 }
0x150e   : > { %5247 = vmatprep.subr.bf16.mxu0 %v5472_v39 }
0x1511   : > { %5249 = vmatpush3.bf16.msra.mxu0 %v5248_v31 }
0x1512   : > { %5250 = vmatprep.subr.bf16.mxu0 %v5472_v39 }
0x1515   : > { %5252 = vmatpush3.bf16.msra.mxu0 %v5251_v34  ;;  %v4356_v34 = vld [vmem:[%s6707_s24 + $0x2] ss:$0 sm:$0xff] }
0x1516   : > { %5253 = vmatprep.subr.bf16.mxu0 %v5472_v39 }
0x1519   : > { %5255 = vmatpush3.bf16.msra.mxu0 %v5254_v38  ;;  %v4357_v38 = vld [vmem:[%s6656_s5 + $0x2] ss:$0 sm:$0xff] }
0x151a   : > { %5256 = vmatprep.subr.bf16.mxu0 %v5472_v39 }
0x151d   : > { %5258 = vmatpush3.bf16.msra.mxu0 %v5257_v43 }
0x151e   : > { %5271 = vmatprep.subr.bf16.mxu0 %v5472_v39 }
0x15d3   : > { %v2257_v53 = vpop.f32.mrb[18].mxu0 }
0x15d4   : > { %v2258_v55 = vadd.f32 %v4315_v21, %v2257_v53  ;;  %v4872_v56 = vpop.f32.mrb[19].mxu0 }
0x15d6   : > { %v2269_v57 = vmul.f32 %v4318_v54, %v2258_v55 }
0x15d8   : > { %v6148_v58 = vadd.f32 %v2269_v57, %v6061_v45  ;;  %v4324_v45 = vld [vmem:[%s6664_s13 + $0x28] sm:$0xff] }
0x15d9   : > { %v5230_v2 = vpack.c.bf16 %v4324_v45, %v4323_v1 }
0x15da   : > { %v2275_v59 = vsel %vm940_vm7, %v6148_v58, 0.0 }
0x15db   : > { %2276 = vadd.xlane.f32.xlu0 %v2275_v59  ;;  %5231 = vmatpush3.bf16.msra.mxu1 %v5230_v2 }
0x15dc   : > { %5232 = vmatprep.subr.bf16.mxu1 %v5472_v39 }
0x15df   : > { %5234 = vmatpush3.bf16.msra.mxu1 %v5233_v6 }
0x15e0   : > { %5259 = vmatprep.subr.bf16.mxu1 %v5472_v39 }
0x1668   : > { %v2277_v60 = vpop.xlane.xlu0 %2276 }
0x1669   : > { %v2278_v61 = vmul.f32 0.03125, %v2277_v60 }
0x166b   : > { %v2279_v62 = vsub.f32 %v6148_v58, %v2278_v61 }
0x166d   : > { %v2280_v63 = vmul.f32 %v2279_v62, %v2279_v62 }
0x166f   : > { %v2281_v0 = vsel %vm940_vm7, %v2280_v63, 0.0 }
0x1670   : > { %2282 = vadd.xlane.f32.xlu1 %v2281_v0 }
0x16fd   : > { %v2283_v7 = vpop.xlane.xlu1 %2282 }
0x16fe   : > { %v2284_v8 = vmul.f32 0.03125, %v2283_v7 }
0x1700   : > { %v2285_v9 = vadd.f32 1e-06, %v2284_v8 }
0x1702   : > { %5408 = vrsqrt.f32 %v2285_v9 }
0x170c   : > { %v5409_v10 = vpop.eup %5408 }
0x170d   : > { %v2287_v12 = vmul.f32 %v5409_v10, %v2279_v62  ;;  %v4349_v10 = vld [vmem:[%s6667_s16 + $0x1] ss:$0 sm:$0xff] }
0x170f   : > { %v2294_v14 = vmul.f32 %v4321_v11, %v2287_v12  ;;  %v4351_v12 = vld [vmem:[%s6668_s17 + $0x1] ss:$0 sm:$0xff] }
0x1711   : > { %v2301_v15 = vadd.f32 %v4322_v13, %v2294_v14 }
0x1713   : > { %4882 = vmatmul.mubr.msk.f32.vlgmr.msra.gmra.mrb[14].mxu1 %vm940_vm7, %v2301_v15 }
0x1714   : > { %4927 = vmatprep.mubr.msk.f32.mxu1 %vm5473_vm0, %v5474_v42 }
0x17e6   : > { %v2384_v46 = vpop.f32.mrb[14].mxu1 }
0x17e7   : > { %v2385_v47 = vadd.f32 %v4328_v44, %v2384_v46  ;;  %v4883_v48 = vpop.f32.mrb[15].mxu1  ;;  %v4363_v46 = vld [vmem:[%s6658_s7 + $0x2] ss:$0 sm:$0xff] }
0x17e9   : > { %v2389_v49 = vmul.f32 0.70710677, %v2385_v47  ;;  %v2388_v7 = vmul.f32 0.5, %v2385_v47 }
0x17eb   : > { %v2392_v50 = vand.u32 2147483647, %v2389_v49  ;;  %vm2390_vm12 = vcmp.ge.f32.partialorder %v2389_v49, 0.0 }
0x17ec   : > { %v2391_v4 = vsel %vm2390_vm12, 1.0, %v5483_v30 }
0x17ed   : > { %v2393_v51 = vmul.f32 0.3275911, %v2392_v50  ;;  %v2406_v21 = vsub.f32 0.0, %v2392_v50 }
0x17ef   : > { %v2394_v52 = vadd.f32 1.0, %v2393_v51  ;;  %v2407_v54 = vmul.f32 %v2406_v21, %v2392_v50 }
0x17f1   : > { %5410 = vrcp.f32 %v2394_v52  ;;  %v2408_v57 = vmul.f32 1.442695, %v2407_v54 }
0x17f3   : > { %5412 = vpow2.f32 %v2408_v57 }
0x17fb   : > { %v5411_v53 = vpop.eup %5410 }
0x17fc   : > { %v2397_v55 = vmul.f32 1.0614054, %v5411_v53 }
0x17fd   : > { %v5413_v45 = vpop.eup %5412 }
0x17fe   : > { %v4330_v56 = vadd.f32 -1.4531521, %v2397_v55 }
0x1800   : > { %v2399_v59 = vmul.f32 %v5411_v53, %v4330_v56 }
0x1802   : > { %v2400_v60 = vadd.f32 1.4214138, %v2399_v59 }
0x1804   : > { %v2401_v61 = vmul.f32 %v5411_v53, %v2400_v60 }
0x1806   : > { %v4331_v62 = vadd.f32 -0.28449672, %v2401_v61 }
0x1808   : > { %v2403_v63 = vmul.f32 %v5411_v53, %v4331_v62 }
0x180a   : > { %v2404_v0 = vadd.f32 0.2548296, %v2403_v63 }
0x180c   : > { %v2405_v1 = vmul.f32 %v5411_v53, %v2404_v0 }
0x180e   : > { %v2410_v2 = vmul.f32 %v5413_v45, %v2405_v1 }
0x1810   : > { %v2411_v3 = vsub.f32 1.0, %v2410_v2 }
0x1812   : > { %v2412_v6 = vmul.f32 %v2411_v3, %v2391_v4 }
0x1814   : > { %v2413_v8 = vadd.f32 1.0, %v2412_v6 }
0x1816   : > { %v2414_v9 = vmul.f32 %v2413_v8, %v2388_v7 }
0x1818   : > { %4917 = vmatmul.mubr.f32.vlgmr.msra.gmra.mrb[20].mxu0 %v2414_v9 }
0x1819   : > { %4969 = vmatprep.mubr.msk.f32.mxu0 %vm5473_vm0, %v5474_v42 }
0x18eb   : > { %v2506_v11 = vpop.f32.mrb[20].mxu0 }
0x18ec   : > { %v2507_v13 = vadd.f32 %v4349_v10, %v2506_v11  ;;  %v4918_v14 = vpop.f32.mrb[21].mxu0 }
0x18ee   : > { %v2518_v15 = vmul.f32 %v4351_v12, %v2507_v13 }
0x18f0   : > { %v6246_v16 = vadd.f32 %v2518_v15, %v6148_v58  ;;  %v4359_v58 = vld [vmem:[%s6657_s6 + $0x48] sm:$0xff] }
0x18f1   : > { %v5260_v25 = vpack.c.bf16 %v4359_v58, %v4358_v24 }
0x18f2   : > { %v2522_v17 = vsel %vm940_vm7, %v6246_v16, 0.0 }
0x18f3   : > { %2523 = vadd.xlane.f32.xlu0 %v2522_v17  ;;  %5261 = vmatpush3.bf16.msra.mxu1 %v5260_v25 }
0x18f4   : > { %5262 = vmatprep.subr.bf16.mxu1 %v5472_v39 }
0x18f7   : > { %5264 = vmatpush3.bf16.msra.mxu1 %v5263_v28  ;;  %v4376_v28 = vld [vmem:[%s6660_s9 + $0x2] ss:$0 sm:$0xff] }
0x18f8   : > { %4930 = vmatprep.subr.mxu1 %v5474_v42 }
0x1980   : > { %v2524_v18 = vpop.xlane.xlu0 %2523 }
0x1981   : > { %v2525_v19 = vmul.f32 0.03125, %v2524_v18  ;;  %v4371_v18 = vld [vmem:[%s6659_s8 + $0x40] sm:$0xff] }
0x1983   : > { %v2526_v20 = vsub.f32 %v6246_v16, %v2525_v19  ;;  %v4372_v19 = vld [vmem:[%s6659_s8 + $0x48] sm:$0xff] }
0x1985   : > { %v2527_v22 = vmul.f32 %v2526_v20, %v2526_v20 }
0x1987   : > { %v2528_v23 = vsel %vm940_vm7, %v2527_v22, 0.0  ;;  %v5266_v22 = vpack.c.bf16 %v4372_v19, %v4371_v18  ;;  %v4407_v19 = vld [vmem:[%s6666_s15 + $0x170] sm:$0xff] }
0x1988   : > { %2529 = vadd.xlane.f32.xlu0 %v2528_v23  ;;  %v4374_v23 = vld [vmem:[%s6659_s8 + $0x58] sm:$0xff] }
0x1a15   : > { %v2530_v5 = vpop.xlane.xlu0 %2529 }
0x1a16   : > { %v2531_v29 = vmul.f32 0.03125, %v2530_v5 }
0x1a18   : > { %v2532_v31 = vadd.f32 1e-06, %v2531_v29  ;;  %v4379_v29 = vld [vmem:[%s6661_s10 + $0x2] ss:$0 sm:$0xff] }
0x1a1a   : > { %5414 = vrsqrt.f32 %v2532_v31 }
0x1a24   : > { %v5415_v32 = vpop.eup %5414 }
0x1a25   : > { %v2534_v35 = vmul.f32 %v5415_v32, %v2526_v20  ;;  %v4373_v20 = vld [vmem:[%s6659_s8 + $0x50] sm:$0xff] }
0x1a26   : > { %v5269_v24 = vpack.c.bf16 %v4374_v23, %v4373_v20  ;;  %v4408_v20 = vld [vmem:[%s6666_s15 + $0x178] sm:$0xff]  ;;  %v4389_v23 = vld [vmem:[%s6665_s14 + $0x2] ss:$0 sm:$0xff] }
0x1a27   : > { %v2541_v40 = vmul.f32 %v6270_v33, %v2534_v35  ;;  %v2561_v41 = vmul.f32 %v4356_v34, %v2534_v35 }
0x1a29   : > { %v2548_v43 = vadd.f32 %v6278_v37, %v2541_v40  ;;  %v2568_v44 = vadd.f32 %v4357_v38, %v2561_v41 }
0x1a2b   : > { %2550 = vst.msk [vmem:[%s6285_s1 - $0x1] sm:$0x1e] %vm2549_vm13, %v2548_v43  ;;  %4928 = vmatmul.mubr.msk.f32.vlgmr.msra.gmra.mrb[16].mxu1 %vm940_vm7, %v2568_v44 }
0x1a2c   : > { %4932 = vmatprep.mubr.msk.f32.mxu1 %vm5473_vm0, %v5474_v42 }
0x1afe   : > { %v2651_v47 = vpop.f32.mrb[16].mxu1 }
0x1aff   : > { %v2652_v48 = vadd.f32 %v4363_v46, %v2651_v47  ;;  %v4929_v49 = vpop.f32.mrb[17].mxu1  ;;  %v4384_v47 = vld [vmem:[%s6664_s13 + $0x40] sm:$0xff] }
0x1b00   : > { %v4386_v49 = vld [vmem:[%s6664_s13 + $0x50] sm:$0xff] }
0x1b01   : > { %2656 = vrot.lane.b32.xlu0 %v2652_v48, %s6712_s21 }
0x1b05   : > { %2821 = vrot.lane.b32.xlu0 %v2652_v48, %s6713_s0 }
0x1b09   : > { %2819 = vrot.lane.b32.xlu0 %v2652_v48, %s6714_s26 }
0x1b73   : > { %v2657_v50 = vpop.permute.xlu0 %2656 }
0x1b74   : > { %4931 = vmatpush3.xpose.msk.msra.mxu1 %vm1056_vm8, %v2657_v50  ;;  %v4387_v50 = vld [vmem:[%s6664_s13 + $0x58] sm:$0xff] }
0x1b75   : > { %4935 = vmatprep.subr.mxu1 %v5474_v42 }
0x1b77   : > { %4933 = vmatmul.mubr.msk.f32.vlgmr.msra.gmra.mrb[18].mxu1 %vm1056_vm8, %v2652_v48  ;;  %v2822_v63 = vpop.permute.xlu0 %2821 }
0x1b78   : > { %4937 = vmatprep.mubr.msk.f32.mxu1 %vm5473_vm0, %v5474_v42 }
0x1b7b   : > { %v2820_v1 = vpop.permute.xlu0 %2819 }
0x1c4a   : > { %v2728_v51 = vpop.f32.mrb[18].mxu1 }
0x1c4b   : > { %v2729_v52 = vadd.f32 %v2728_v51, %v5915_v36  ;;  %v4934_v21 = vpop.f32.mrb[19].mxu1  ;;  %v5275_v51 = vpack.c.bf16 %v4387_v50, %v4386_v49 }
0x1c4d   : > { %v2732_v53 = vsel %vm1131_vm10, %v2729_v52, -inf }
0x1c4e   : > { %2733 = vmax.xlane.f32.xlu1 %v2732_v53 }
0x1cdb   : > { %v2734_v54 = vpop.xlane.xlu1 %2733 }
0x1cdc   : > { %v2735_v55 = vsub.f32 %v2729_v52, %v2734_v54 }
0x1cde   : > { %v2736_v56 = vmul.f32 1.442695, %v2735_v55  ;;  %v4382_v55 = vld [vmem:[%s6662_s11 + $0x2] ss:$0 sm:$0xff] }
0x1ce0   : > { %5416 = vpow2.f32 %v2736_v56 }
0x1cea   : > { %v5417_v57 = vpop.eup %5416 }
0x1ceb   : > { %v2738_v59 = vsel %vm1131_vm10, %v5417_v57, 0.0 }
0x1cec   : > { %2739 = vadd.xlane.f32.xlu1 %v2738_v59 }
0x1cfd   : > { %2743 = vrot.lane.b32.xlu1 %v2652_v48, %s6715_s30 }
0x1d79   : > { %v2740_v60 = vpop.xlane.xlu1 %2739 }
0x1d7a   : > { %5418 = vrcp.f32 %v2740_v60 }
0x1d7d   : > { %v2744_v61 = vpop.permute.xlu1 %2743 }
0x1d7e   : > { %4936 = vmatpush3.msra.mxu1 %v2744_v61  ;;  %v4393_v61 = vld [vmem:[%s6666_s15 + $0x100] sm:$0xff] }
0x1d7f   : > { %4940 = vmatprep.subr.mxu1 %v5474_v42 }
0x1d84   : > { %v5419_v62 = vpop.eup %5418 }
0x1d85   : > { %v2742_v0 = vmul.f32 %v5419_v62, %v5417_v57  ;;  %v4383_v57 = vld [vmem:[%s6663_s12 + $0x2] ss:$0 sm:$0xff]  ;;  %v4394_v62 = vld [vmem:[%s6666_s15 + $0x108] sm:$0xff] }
0x1d87   : > { %4938 = vmatmul.mubr.msk.f32.vlgmr.msra.gmra.mrb[20].mxu1 %vm1131_vm10, %v2742_v0  ;;  %v4395_v0 = vld [vmem:[%s6666_s15 + $0x110] sm:$0xff] }
0x1d88   : > { %4941 = vmatpush3.xpose.msk.msra.mxu1 %vm1056_vm8, %v2822_v63  ;;  %4942 = vmatprep.mubr.msk.f32.mxu1 %vm5473_vm0, %v5474_v42  ;;  %v5278_v63 = vpack.c.bf16 %v4394_v62, %v4393_v61 }
0x1d89   : > { %4945 = vmatprep.subr.mxu1 %v5474_v42 }
0x1d8b   : > { %4943 = vmatmul.mubr.msk.f32.vlgmr.msra.gmra.mrb[22].mxu1 %vm1056_vm8, %v2820_v1  ;;  %v4396_v1 = vld [vmem:[%s6666_s15 + $0x118] sm:$0xff] }
0x1d8c   : > { %4947 = vmatprep.mubr.msk.f32.mxu1 %vm5473_vm0, %v5474_v42 }
0x1e5a   : > { %v2815_v45 = vpop.f32.mrb[20].mxu1 }
0x1e5b   : > { %v4939_v2 = vpop.f32.mrb[21].mxu1 }
0x1e5c   : > { %v4397_v2 = vld [vmem:[%s6666_s15 + $0x120] sm:$0xff] }
0x1e5e   : > { %v2893_v3 = vpop.f32.mrb[22].mxu1 }
0x1e5f   : > { %v2894_v4 = vadd.f32 %v2893_v3, %v5915_v36  ;;  %v4944_v6 = vpop.f32.mrb[23].mxu1  ;;  %v4398_v3 = vld [vmem:[%s6666_s15 + $0x128] sm:$0xff] }
0x1e60   : > { %v4399_v6 = vld [vmem:[%s6666_s15 + $0x130] sm:$0xff] }
0x1e61   : > { %v2897_v7 = vsel %vm1131_vm10, %v2894_v4, -inf }
0x1e62   : > { %2898 = vmax.xlane.f32.xlu0 %v2897_v7  ;;  %v4400_v7 = vld [vmem:[%s6666_s15 + $0x138] sm:$0xff] }
0x1e78   : > { %2908 = vrot.lane.b32.xlu0 %v2652_v48, %s6708_s23 }
0x1eef   : > { %v2899_v8 = vpop.xlane.xlu0 %2898 }
0x1ef0   : > { %v2900_v9 = vsub.f32 %v2894_v4, %v2899_v8  ;;  %v5284_v4 = vpack.c.bf16 %v4398_v3, %v4397_v2  ;;  %v5287_v8 = vpack.c.bf16 %v4400_v7, %v4399_v6  ;;  %v4417_v6 = vld [vmem:[%s6657_s6 + $0x60] sm:$0xff] }
0x1ef2   : > { %v2901_v10 = vmul.f32 1.442695, %v2900_v9  ;;  %v4401_v9 = vld [vmem:[%s6666_s15 + $0x140] sm:$0xff] }
0x1ef3   : > { %v2909_v11 = vpop.permute.xlu0 %2908 }
0x1ef4   : > { %5420 = vpow2.f32 %v2901_v10  ;;  %4946 = vmatpush3.msra.mxu1 %v2909_v11  ;;  %v4402_v10 = vld [vmem:[%s6666_s15 + $0x148] sm:$0xff] }
0x1ef5   : > { %5265 = vmatprep.subr.bf16.mxu1 %v5472_v39  ;;  %v5290_v11 = vpack.c.bf16 %v4402_v10, %v4401_v9  ;;  %v4420_v9 = vld [vmem:[%s6657_s6 + $0x78] sm:$0xff] }
0x1efe   : > { %v5421_v12 = vpop.eup %5420 }
0x1eff   : > { %v2903_v13 = vsel %vm1131_vm10, %v5421_v12, 0.0 }
0x1f00   : > { %2904 = vadd.xlane.f32.xlu1 %v2903_v13  ;;  %v4404_v13 = vld [vmem:[%s6666_s15 + $0x158] sm:$0xff] }
0x1f8d   : > { %v2905_v14 = vpop.xlane.xlu1 %2904 }
0x1f8e   : > { %5422 = vrcp.f32 %v2905_v14 }
0x1f98   : > { %v5423_v15 = vpop.eup %5422 }
0x1f99   : > { %v2907_v17 = vmul.f32 %v5423_v15, %v5421_v12  ;;  %v4403_v12 = vld [vmem:[%s6666_s15 + $0x150] sm:$0xff]  ;;  %v4405_v15 = vld [vmem:[%s6666_s15 + $0x160] sm:$0xff] }
0x1f9a   : > { %v5293_v14 = vpack.c.bf16 %v4404_v13, %v4403_v12 }
0x1f9b   : > { %4948 = vmatmul.mubr.msk.f32.vlgmr.msra.gmra.mrb[24].mxu1 %vm1131_vm10, %v2907_v17  ;;  %v4406_v17 = vld [vmem:[%s6666_s15 + $0x168] sm:$0xff] }
0x1f9c   : > { %4958 = vmatprep.mubr.msk.f32.mxu1 %vm5473_vm0, %v5474_v42  ;;  %5267 = vmatpush3.bf16.msra.mxu1 %v5266_v22  ;;  %v5296_v18 = vpack.c.bf16 %v4406_v17, %v4405_v15  ;;  %v5299_v22 = vpack.c.bf16 %v4408_v20, %v4407_v19  ;;  %v4415_v15 = vld [vmem:[%s6707_s24 + $0x3] ss:$0 sm:$0xff] }
0x1f9d   : > { %5268 = vmatprep.subr.bf16.mxu1 %v5472_v39 }
0x1fa0   : > { %5270 = vmatpush3.bf16.msra.mxu1 %v5269_v24 }
0x1fa1   : > { %5277 = vmatprep.subr.bf16.mxu1 %v5472_v39 }
0x206e   : > { %v2980_v58 = vpop.f32.mrb[24].mxu1 }
0x206f   : > { %2985 = vrot.lane.b32.xlu1 %v2980_v58, %s6709_s4  ;;  %v4949_v25 = vpop.f32.mrb[25].mxu1 }
0x20e1   : > { %v2986_v26 = vpop.permute.xlu1 %2985 }
0x20e2   : > { %v2988_v27 = vsel %vm1056_vm8, %v2815_v45, %v2986_v26  ;;  %v5281_v45 = vpack.c.bf16 %v4396_v1, %v4395_v0 }
0x20e3   : > { %4959 = vmatmul.mubr.msk.f32.vlgmr.msra.gmra.mrb[26].mxu1 %vm940_vm7, %v2988_v27 }
0x20e4   : > { %5004 = vmatprep.mubr.msk.f32.mxu1 %vm5473_vm0, %v5474_v42  ;;  %5279 = vmatpush3.bf16.msra.mxu1 %v5278_v63 }
0x20e5   : > { %5280 = vmatprep.subr.bf16.mxu1 %v5472_v39 }
0x20e8   : > { %5282 = vmatpush3.bf16.msra.mxu1 %v5281_v45 }
0x20e9   : > { %5283 = vmatprep.subr.bf16.mxu1 %v5472_v39 }
0x20ec   : > { %5285 = vmatpush3.bf16.msra.mxu1 %v5284_v4 }
0x20ed   : > { %5286 = vmatprep.subr.bf16.mxu1 %v5472_v39 }
0x20f0   : > { %5288 = vmatpush3.bf16.msra.mxu1 %v5287_v8  ;;  %v4419_v8 = vld [vmem:[%s6657_s6 + $0x70] sm:$0xff] }
0x20f1   : > { %5289 = vmatprep.subr.bf16.mxu1 %v5472_v39  ;;  %v5305_v10 = vpack.c.bf16 %v4420_v9, %v4419_v8  ;;  %v4438_v9 = vld [vmem:[%s6661_s10 + $0x3] ss:$0 sm:$0xff] }
0x20f4   : > { %5291 = vmatpush3.bf16.msra.mxu1 %v5290_v11 }
0x20f5   : > { %5292 = vmatprep.subr.bf16.mxu1 %v5472_v39 }
0x20f8   : > { %5294 = vmatpush3.bf16.msra.mxu1 %v5293_v14 }
0x20f9   : > { %5295 = vmatprep.subr.bf16.mxu1 %v5472_v39 }
0x20fc   : > { %5297 = vmatpush3.bf16.msra.mxu1 %v5296_v18  ;;  %v4416_v18 = vld [vmem:[%s6656_s5 + $0x3] ss:$0 sm:$0xff] }
0x20fd   : > { %5298 = vmatprep.subr.bf16.mxu1 %v5472_v39 }
0x2100   : > { %5300 = vmatpush3.bf16.msra.mxu1 %v5299_v22  ;;  %v4422_v22 = vld [vmem:[%s6658_s7 + $0x3] ss:$0 sm:$0xff] }
0x2101   : > { %5313 = vmatprep.subr.bf16.mxu1 %v5472_v39 }
0x21b6   : > { %v3071_v5 = vpop.f32.mrb[26].mxu1 }
0x21b7   : > { %v3072_v31 = vadd.f32 %v4376_v28, %v3071_v5  ;;  %v4960_v32 = vpop.f32.mrb[27].mxu1 }
0x21b9   : > { %v3083_v34 = vmul.f32 %v4379_v29, %v3072_v31 }
0x21bb   : > { %v6350_v35 = vadd.f32 %v3083_v34, %v6246_v16  ;;  %v4385_v16 = vld [vmem:[%s6664_s13 + $0x48] sm:$0xff] }
0x21bc   : > { %v5272_v48 = vpack.c.bf16 %v4385_v16, %v4384_v47 }
0x21bd   : > { %v3089_v38 = vsel %vm940_vm7, %v6350_v35, 0.0 }
0x21be   : > { %3090 = vadd.xlane.f32.xlu0 %v3089_v38  ;;  %5273 = vmatpush3.bf16.msra.mxu0 %v5272_v48 }
0x21bf   : > { %5274 = vmatprep.subr.bf16.mxu0 %v5472_v39 }
0x21c2   : > { %5276 = vmatpush3.bf16.msra.mxu0 %v5275_v51 }
0x21c3   : > { %5301 = vmatprep.subr.bf16.mxu0 %v5472_v39 }
0x224b   : > { %v3091_v40 = vpop.xlane.xlu0 %3090 }
0x224c   : > { %v3092_v41 = vmul.f32 0.03125, %v3091_v40 }
0x224e   : > { %v3093_v43 = vsub.f32 %v6350_v35, %v3092_v41 }
0x2250   : > { %v3094_v44 = vmul.f32 %v3093_v43, %v3093_v43 }
0x2252   : > { %v3095_v46 = vsel %vm940_vm7, %v3094_v44, 0.0 }
0x2253   : > { %3096 = vadd.xlane.f32.xlu1 %v3095_v46 }
0x22e0   : > { %v3097_v52 = vpop.xlane.xlu1 %3096 }
0x22e1   : > { %v3098_v21 = vmul.f32 0.03125, %v3097_v52 }
0x22e3   : > { %v3099_v53 = vadd.f32 1e-06, %v3098_v21 }
0x22e5   : > { %5424 = vrsqrt.f32 %v3099_v53 }
0x22ef   : > { %v5425_v54 = vpop.eup %5424 }
0x22f0   : > { %v3101_v56 = vmul.f32 %v5425_v54, %v3093_v43 }
0x22f2   : > { %v3108_v59 = vmul.f32 %v4382_v55, %v3101_v56  ;;  %v4410_v56 = vld [vmem:[%s6667_s16 + $0x2] ss:$0 sm:$0xff] }
0x22f4   : > { %v3115_v60 = vadd.f32 %v4383_v57, %v3108_v59  ;;  %v4412_v59 = vld [vmem:[%s6668_s17 + $0x2] ss:$0 sm:$0xff] }
0x22f6   : > { %4970 = vmatmul.mubr.msk.f32.vlgmr.msra.gmra.mrb[22].mxu0 %vm940_vm7, %v3115_v60 }
0x22f7   : > { %5015 = vmatprep.mubr.msk.f32.mxu0 %vm5473_vm0, %v5474_v42 }
0x23c9   : > { %v3198_v24 = vpop.f32.mrb[22].mxu0 }
0x23ca   : > { %v3199_v58 = vadd.f32 %v4389_v23, %v3198_v24  ;;  %v4971_v25 = vpop.f32.mrb[23].mxu0 }
0x23cc   : > { %v3203_v26 = vmul.f32 0.70710677, %v3199_v58  ;;  %v3202_v53 = vmul.f32 0.5, %v3199_v58 }
0x23ce   : > { %v3206_v27 = vand.u32 2147483647, %v3203_v26  ;;  %vm3204_vm14 = vcmp.ge.f32.partialorder %v3203_v26, 0.0 }
0x23cf   : > { %v3205_v52 = vsel %vm3204_vm14, 1.0, %v5483_v30 }
0x23d0   : > { %v3207_v28 = vmul.f32 0.3275911, %v3206_v27  ;;  %v3220_v29 = vsub.f32 0.0, %v3206_v27 }
0x23d2   : > { %v3208_v5 = vadd.f32 1.0, %v3207_v28  ;;  %v3221_v32 = vmul.f32 %v3220_v29, %v3206_v27 }
0x23d4   : > { %5426 = vrcp.f32 %v3208_v5  ;;  %v3222_v40 = vmul.f32 1.442695, %v3221_v32 }
0x23d6   : > { %5428 = vpow2.f32 %v3222_v40 }
0x23de   : > { %v5427_v31 = vpop.eup %5426 }
0x23df   : > { %v3211_v34 = vmul.f32 1.0614054, %v5427_v31 }
0x23e0   : > { %v5429_v49 = vpop.eup %5428 }
0x23e1   : > { %v4391_v38 = vadd.f32 -1.4531521, %v3211_v34 }
0x23e3   : > { %v3213_v41 = vmul.f32 %v5427_v31, %v4391_v38 }
0x23e5   : > { %v3214_v43 = vadd.f32 1.4214138, %v3213_v41 }
0x23e7   : > { %v3215_v44 = vmul.f32 %v5427_v31, %v3214_v43 }
0x23e9   : > { %v4392_v46 = vadd.f32 -0.28449672, %v3215_v44 }
0x23eb   : > { %v3217_v47 = vmul.f32 %v5427_v31, %v4392_v46 }
0x23ed   : > { %v3218_v16 = vadd.f32 0.2548296, %v3217_v47 }
0x23ef   : > { %v3219_v48 = vmul.f32 %v5427_v31, %v3218_v16 }
0x23f1   : > { %v3224_v50 = vmul.f32 %v5429_v49, %v3219_v48 }
0x23f3   : > { %v3225_v51 = vsub.f32 1.0, %v3224_v50 }
0x23f5   : > { %v3226_v21 = vmul.f32 %v3225_v51, %v3205_v52 }
0x23f7   : > { %v3227_v54 = vadd.f32 1.0, %v3226_v21 }
0x23f9   : > { %v3228_v55 = vmul.f32 %v3227_v54, %v3202_v53 }
0x23fb   : > { %5005 = vmatmul.mubr.f32.vlgmr.msra.gmra.mrb[28].mxu1 %v3228_v55 }
0x23fc   : > { %5057 = vmatprep.mubr.msk.f32.mxu1 %vm5473_vm0, %v5474_v42 }
0x24ce   : > { %v3320_v57 = vpop.f32.mrb[28].mxu1 }
0x24cf   : > { %v3321_v60 = vadd.f32 %v4410_v56, %v3320_v57  ;;  %v5006_v61 = vpop.f32.mrb[29].mxu1 }
0x24d0   : > { %v4430_v61 = vld [vmem:[%s6659_s8 + $0x60] sm:$0xff] }
0x24d1   : > { %v3332_v62 = vmul.f32 %v4412_v59, %v3321_v60 }
0x24d3   : > { %v6448_v63 = vadd.f32 %v3332_v62, %v6350_v35  ;;  %v4418_v35 = vld [vmem:[%s6657_s6 + $0x68] sm:$0xff] }
0x24d4   : > { %v5302_v7 = vpack.c.bf16 %v4418_v35, %v4417_v6  ;;  %v4431_v62 = vld [vmem:[%s6659_s8 + $0x68] sm:$0xff] }
0x24d5   : > { %v3338_v0 = vsel %vm940_vm7, %v6448_v63, 0.0 }
0x24d6   : > { %3339 = vadd.xlane.f32.xlu0 %v3338_v0  ;;  %5303 = vmatpush3.bf16.msra.mxu0 %v5302_v7  ;;  %v4432_v0 = vld [vmem:[%s6659_s8 + $0x70] sm:$0xff]  ;;  %v4435_v7 = vld [vmem:[%s6660_s9 + $0x3] ss:$0 sm:$0xff] }
0x24d7   : > { %5304 = vmatprep.subr.bf16.mxu0 %v5472_v39 }
0x24da   : > { %5306 = vmatpush3.bf16.msra.mxu0 %v5305_v10 }
0x24db   : > { %5018 = vmatprep.subr.mxu0 %v5474_v42 }
0x2563   : > { %v3340_v1 = vpop.xlane.xlu0 %3339 }
0x2564   : > { %v3341_v45 = vmul.f32 0.03125, %v3340_v1  ;;  %v5308_v1 = vpack.c.bf16 %v4431_v62, %v4430_v61  ;;  %v4467_v61 = vld [vmem:[%s6666_s15 + $0x1f8] sm:$0xff] }
0x2566   : > { %v3342_v2 = vsub.f32 %v6448_v63, %v3341_v45  ;;  %v4433_v45 = vld [vmem:[%s6659_s8 + $0x78] sm:$0xff] }
0x2568   : > { %v3343_v3 = vmul.f32 %v3342_v2, %v3342_v2 }
0x256a   : > { %v3344_v4 = vsel %vm940_vm7, %v3343_v3, 0.0 }
0x256b   : > { %3345 = vadd.xlane.f32.xlu0 %v3344_v4 }
0x25f8   : > { %v3346_v11 = vpop.xlane.xlu0 %3345 }
0x25f9   : > { %v3347_v12 = vmul.f32 0.03125, %v3346_v11 }
0x25fb   : > { %v3348_v13 = vadd.f32 1e-06, %v3347_v12 }
0x25fd   : > { %5430 = vrsqrt.f32 %v3348_v13 }
0x2607   : > { %v5431_v14 = vpop.eup %5430 }
0x2608   : > { %v3350_v17 = vmul.f32 %v5431_v14, %v3342_v2  ;;  %v5311_v2 = vpack.c.bf16 %v4433_v45, %v4432_v0  ;;  %v4448_v0 = vld [vmem:[%s6665_s14 + $0x3] ss:$0 sm:$0xff] }
0x260a   : > { %v3357_v19 = vmul.f32 %v4415_v15, %v3350_v17 }
0x260c   : > { %v3364_v20 = vadd.f32 %v4416_v18, %v3357_v19 }
0x260e   : > { %5016 = vmatmul.mubr.msk.f32.vlgmr.msra.gmra.mrb[24].mxu0 %vm940_vm7, %v3364_v20  ;;  %v4443_v20 = vld [vmem:[%s6664_s13 + $0x60] sm:$0xff] }
0x260f   : > { %5020 = vmatprep.mubr.msk.f32.mxu0 %vm5473_vm0, %v5474_v42 }
0x26e1   : > { %v3447_v23 = vpop.f32.mrb[24].mxu0 }
0x26e2   : > { %v3448_v24 = vadd.f32 %v4422_v22, %v3447_v23  ;;  %v5017_v58 = vpop.f32.mrb[25].mxu0  ;;  %v4445_v23 = vld [vmem:[%s6664_s13 + $0x70] sm:$0xff] }
0x26e4   : > { %3452 = vrot.lane.b32.xlu0 %v3448_v24, %s6712_s21 }
0x26e8   : > { %3617 = vrot.lane.b32.xlu0 %v3448_v24, %s6713_s0 }
0x2756   : > { %v3453_v25 = vpop.permute.xlu0 %3452 }
0x2757   : > { %5019 = vmatpush3.xpose.msk.msra.mxu0 %vm1056_vm8, %v3453_v25 }
0x2758   : > { %5023 = vmatprep.subr.mxu0 %v5474_v42 }
0x275a   : > { %5021 = vmatmul.mubr.msk.f32.vlgmr.msra.gmra.mrb[26].mxu0 %vm1056_vm8, %v3448_v24  ;;  %v3618_v46 = vpop.permute.xlu0 %3617 }
0x275b   : > { %5025 = vmatprep.mubr.msk.f32.mxu0 %vm5473_vm0, %v5474_v42 }
0x282d   : > { %v3524_v26 = vpop.f32.mrb[26].mxu0 }
0x282e   : > { %v3525_v27 = vadd.f32 %v3524_v26, %v5915_v36  ;;  %v5022_v28 = vpop.f32.mrb[27].mxu0 }
0x2830   : > { %v3528_v5 = vsel %vm1131_vm10, %v3525_v27, -inf }
0x2831   : > { %3529 = vmax.xlane.f32.xlu1 %v3528_v5  ;;  %v4441_v5 = vld [vmem:[%s6662_s11 + $0x3] ss:$0 sm:$0xff] }
0x2842   : > { %3539 = vrot.lane.b32.xlu1 %v3448_v24, %s6715_s30 }
0x28be   : > { %v3530_v29 = vpop.xlane.xlu1 %3529 }
0x28bf   : > { %v3531_v31 = vsub.f32 %v3525_v27, %v3530_v29 }
0x28c1   : > { %v3532_v32 = vmul.f32 1.442695, %v3531_v31  ;;  %v4442_v31 = vld [vmem:[%s6663_s12 + $0x3] ss:$0 sm:$0xff] }
0x28c2   : > { %v3540_v34 = vpop.permute.xlu1 %3539 }
0x28c3   : > { %5432 = vpow2.f32 %v3532_v32  ;;  %5024 = vmatpush3.msra.mxu0 %v3540_v34 }
0x28c4   : > { %5028 = vmatprep.subr.mxu0 %v5474_v42 }
0x28cd   : > { %v5433_v38 = vpop.eup %5432 }
0x28ce   : > { %v3534_v40 = vsel %vm1131_vm10, %v5433_v38, 0.0 }
0x28cf   : > { %3535 = vadd.xlane.f32.xlu1 %v3534_v40  ;;  %v4453_v40 = vld [vmem:[%s6666_s15 + $0x188] sm:$0xff] }
0x28e0   : > { %3615 = vrot.lane.b32.xlu1 %v3448_v24, %s6714_s26 }
0x295c   : > { %v3536_v41 = vpop.xlane.xlu1 %3535 }
0x295d   : > { %5434 = vrcp.f32 %v3536_v41 }
0x2960   : > { %v3616_v47 = vpop.permute.xlu1 %3615 }
0x2967   : > { %v5435_v43 = vpop.eup %5434 }
0x2968   : > { %v3538_v44 = vmul.f32 %v5435_v43, %v5433_v38  ;;  %v4452_v38 = vld [vmem:[%s6666_s15 + $0x180] sm:$0xff]  ;;  %v4454_v43 = vld [vmem:[%s6666_s15 + $0x190] sm:$0xff] }
0x2969   : > { %v5320_v41 = vpack.c.bf16 %v4453_v40, %v4452_v38 }
0x296a   : > { %5026 = vmatmul.mubr.msk.f32.vlgmr.msra.gmra.mrb[28].mxu0 %vm1131_vm10, %v3538_v44  ;;  %v4455_v44 = vld [vmem:[%s6666_s15 + $0x198] sm:$0xff] }
0x296b   : > { %5029 = vmatpush3.xpose.msk.msra.mxu0 %vm1056_vm8, %v3618_v46  ;;  %5030 = vmatprep.mubr.msk.f32.mxu0 %vm5473_vm0, %v5474_v42  ;;  %v5323_v46 = vpack.c.bf16 %v4455_v44, %v4454_v43 }
0x296c   : > { %5033 = vmatprep.subr.mxu0 %v5474_v42 }
0x296e   : > { %5031 = vmatmul.mubr.msk.f32.vlgmr.msra.gmra.mrb[30].mxu0 %vm1056_vm8, %v3616_v47  ;;  %v4456_v47 = vld [vmem:[%s6666_s15 + $0x1a0] sm:$0xff] }
0x296f   : > { %5035 = vmatprep.mubr.msk.f32.mxu0 %vm5473_vm0, %v5474_v42 }
0x2a3d   : > { %v3611_v16 = vpop.f32.mrb[28].mxu0 }
0x2a3e   : > { %v5027_v48 = vpop.f32.mrb[29].mxu0 }
0x2a41   : > { %v3689_v49 = vpop.f32.mrb[30].mxu0 }
0x2a42   : > { %v3690_v50 = vadd.f32 %v3689_v49, %v5915_v36  ;;  %v5032_v51 = vpop.f32.mrb[31].mxu0  ;;  %v4458_v49 = vld [vmem:[%s6666_s15 + $0x1b0] sm:$0xff] }
0x2a44   : > { %v3693_v52 = vsel %vm1131_vm10, %v3690_v50, -inf }
0x2a45   : > { %3694 = vmax.xlane.f32.xlu0 %v3693_v52  ;;  %v4460_v52 = vld [vmem:[%s6666_s15 + $0x1c0] sm:$0xff] }
0x2a5b   : > { %3704 = vrot.lane.b32.xlu0 %v3448_v24, %s6708_s23  ;;  %v4446_v24 = vld [vmem:[%s6664_s13 + $0x78] sm:$0xff] }
0x2a5c   : > { %v5317_v58 = vpack.c.bf16 %v4446_v24, %v4445_v23 }
0x2ad2   : > { %v3695_v21 = vpop.xlane.xlu0 %3694 }
0x2ad3   : > { %v3696_v53 = vsub.f32 %v3690_v50, %v3695_v21  ;;  %v4459_v50 = vld [vmem:[%s6666_s15 + $0x1b8] sm:$0xff]  ;;  %v4461_v21 = vld [vmem:[%s6666_s15 + $0x1c8] sm:$0xff] }
0x2ad4   : > { %v5329_v51 = vpack.c.bf16 %v4459_v50, %v4458_v49 }
0x2ad5   : > { %v3697_v54 = vmul.f32 1.442695, %v3696_v53  ;;  %v5332_v53 = vpack.c.bf16 %v4461_v21, %v4460_v52 }
0x2ad6   : > { %v3705_v55 = vpop.permute.xlu0 %3704 }
0x2ad7   : > { %5436 = vpow2.f32 %v3697_v54  ;;  %5034 = vmatpush3.msra.mxu0 %v3705_v55  ;;  %v4462_v54 = vld [vmem:[%s6666_s15 + $0x1d0] sm:$0xff]  ;;  %v4463_v55 = vld [vmem:[%s6666_s15 + $0x1d8] sm:$0xff] }
0x2ad8   : > { %5307 = vmatprep.subr.bf16.mxu0 %v5472_v39 }
0x2ae1   : > { %v5437_v56 = vpop.eup %5436 }
0x2ae2   : > { %v3699_v57 = vsel %vm1131_vm10, %v5437_v56, 0.0 }
0x2ae3   : > { %3700 = vadd.xlane.f32.xlu1 %v3699_v57  ;;  %v4464_v57 = vld [vmem:[%s6666_s15 + $0x1e0] sm:$0xff] }
0x2b70   : > { %v3701_v59 = vpop.xlane.xlu1 %3700 }
0x2b71   : > { %5438 = vrcp.f32 %v3701_v59  ;;  %v4465_v59 = vld [vmem:[%s6666_s15 + $0x1e8] sm:$0xff] }
0x2b7b   : > { %v5439_v36 = vpop.eup %5438 }
0x2b7c   : > { %v3703_v60 = vmul.f32 %v5439_v36, %v5437_v56  ;;  %v5335_v56 = vpack.c.bf16 %v4463_v55, %v4462_v54  ;;  %v5338_v36 = vpack.c.bf16 %v4465_v59, %v4464_v57 }
0x2b7e   : > { %5036 = vmatmul.mubr.msk.f32.vlgmr.msra.gmra.mrb[32].mxu0 %vm1131_vm10, %v3703_v60  ;;  %v4466_v60 = vld [vmem:[%s6666_s15 + $0x1f0] sm:$0xff] }
0x2b7f   : > { %5046 = vmatprep.mubr.msk.f32.mxu0 %vm5473_vm0, %v5474_v42  ;;  %5309 = vmatpush3.bf16.msra.mxu0 %v5308_v1  ;;  %v5341_v62 = vpack.c.bf16 %v4467_v61, %v4466_v60 }
0x2b80   : > { %5310 = vmatprep.subr.bf16.mxu0 %v5472_v39 }
0x2b83   : > { %5312 = vmatpush3.bf16.msra.mxu0 %v5311_v2 }
0x2b84   : > { %5319 = vmatprep.subr.bf16.mxu0 %v5472_v39 }
0x2c51   : > { %v3776_v3 = vpop.f32.mrb[32].mxu0 }
0x2c52   : > { %3781 = vrot.lane.b32.xlu1 %v3776_v3, %s6709_s4  ;;  %v5037_v4 = vpop.f32.mrb[33].mxu0 }
0x2cc4   : > { %v3782_v6 = vpop.permute.xlu1 %3781 }
0x2cc5   : > { %v3784_v35 = vsel %vm1056_vm8, %v3611_v16, %v3782_v6  ;;  %v4457_v16 = vld [vmem:[%s6666_s15 + $0x1a8] sm:$0xff] }
0x2cc6   : > { %5047 = vmatmul.mubr.msk.f32.vlgmr.msra.gmra.mrb[34].mxu0 %vm940_vm7, %v3784_v35  ;;  %v5326_v48 = vpack.c.bf16 %v4457_v16, %v4456_v47 }
0x2cc7   : > { %5092 = vmatprep.mubr.msk.f32.mxu0 %vm5473_vm0, %v5474_v42  ;;  %5321 = vmatpush3.bf16.msra.mxu0 %v5320_v41 }
0x2cc8   : > { %5322 = vmatprep.subr.bf16.mxu0 %v5472_v39 }
0x2ccb   : > { %5324 = vmatpush3.bf16.msra.mxu0 %v5323_v46 }
0x2ccc   : > { %5325 = vmatprep.subr.bf16.mxu0 %v5472_v39 }
0x2ccf   : > { %5327 = vmatpush3.bf16.msra.mxu0 %v5326_v48 }
0x2cd0   : > { %5328 = vmatprep.subr.bf16.mxu0 %v5472_v39 }
0x2cd3   : > { %5330 = vmatpush3.bf16.msra.mxu0 %v5329_v51  ;;  %v4185_v51 = vld [vmem:[%s6285_s1] sm:$0xf] (%p5614_p4) }
0x2cd4   : > { %5331 = vmatprep.subr.bf16.mxu0 %v5472_v39  ;;  %4186 = vst [vmem:[%s4169_s28] sm:$0xf] (%p5614_p4), %v4185_v51 }
0x2cd7   : > { %5333 = vmatpush3.bf16.msra.mxu0 %v5332_v53 }
0x2cd8   : > { %5334 = vmatprep.subr.bf16.mxu0 %v5472_v39 }
0x2cdb   : > { %5336 = vmatpush3.bf16.msra.mxu0 %v5335_v56 }
0x2cdc   : > { %5337 = vmatprep.subr.bf16.mxu0 %v5472_v39 }
0x2cdf   : > { %5339 = vmatpush3.bf16.msra.mxu0 %v5338_v36 }
0x2ce0   : > { %5340 = vmatprep.subr.bf16.mxu0 %v5472_v39 }
0x2ce3   : > { %5342 = vmatpush3.bf16.msra.mxu0 %v5341_v62 }
0x2d99   : > { %v3867_v8 = vpop.f32.mrb[34].mxu0 }
0x2d9a   : > { %v3868_v10 = vadd.f32 %v4435_v7, %v3867_v8  ;;  %v5048_v11 = vpop.f32.mrb[35].mxu0 }
0x2d9c   : > { %v3879_v12 = vmul.f32 %v4438_v9, %v3868_v10 }
0x2d9e   : > { %v6535_v13 = vadd.f32 %v3879_v12, %v6448_v63  ;;  %v4444_v63 = vld [vmem:[%s6664_s13 + $0x68] sm:$0xff] }
0x2d9f   : > { %v5314_v22 = vpack.c.bf16 %v4444_v63, %v4443_v20 }
0x2da0   : > { %v3885_v14 = vsel %vm940_vm7, %v6535_v13, 0.0 }
0x2da1   : > { %3886 = vadd.xlane.f32.xlu0 %v3885_v14  ;;  %5315 = vmatpush3.bf16.msra.mxu1 %v5314_v22 }
0x2da2   : > { %5316 = vmatprep.subr.bf16.mxu1 %v5472_v39 }
0x2da5   : > { %5318 = vmatpush3.bf16.msra.mxu1 %v5317_v58 }
0x2e2e   : > { %v3887_v42 = vpop.xlane.xlu0 %3886 }
0x2e2f   : > { %v3888_v15 = vmul.f32 0.03125, %v3887_v42 }
0x2e31   : > { %v3889_v17 = vsub.f32 %v6535_v13, %v3888_v15 }
0x2e33   : > { %v3890_v18 = vmul.f32 %v3889_v17, %v3889_v17 }
0x2e35   : > { %v3891_v19 = vsel %vm940_vm7, %v3890_v18, 0.0 }
0x2e36   : > { %3892 = vadd.xlane.f32.xlu1 %v3891_v19 }
0x2ec3   : > { %v3893_v25 = vpop.xlane.xlu1 %3892 }
0x2ec4   : > { %v3894_v26 = vmul.f32 0.03125, %v3893_v25 }
0x2ec6   : > { %v3895_v27 = vadd.f32 1e-06, %v3894_v26 }
0x2ec8   : > { %5440 = vrsqrt.f32 %v3895_v27  ;;  %v4469_v27 = vld [vmem:[%s6667_s16 + $0x3] ss:$0 sm:$0xff] }
0x2ed2   : > { %v5441_v28 = vpop.eup %5440 }
0x2ed3   : > { %v3897_v29 = vmul.f32 %v5441_v28, %v3889_v17 }
0x2ed5   : > { %v3904_v32 = vmul.f32 %v4441_v5, %v3897_v29  ;;  %v4471_v5 = vld [vmem:[%s6668_s17 + $0x3] ss:$0 sm:$0xff] }
0x2ed7   : > { %v3911_v34 = vadd.f32 %v4442_v31, %v3904_v32 }
0x2ed9   : > { %5058 = vmatmul.mubr.msk.f32.vlgmr.msra.gmra.mrb[30].mxu1 %vm940_vm7, %v3911_v34 }
0x2fac   : > { %v3994_v1 = vpop.f32.mrb[30].mxu1 }
0x2fad   : > { %v3995_v45 = vadd.f32 %v4448_v0, %v3994_v1  ;;  %v5059_v2 = vpop.f32.mrb[31].mxu1 }
0x2faf   : > { %v3999_v3 = vmul.f32 0.70710677, %v3995_v45  ;;  %v3998_v58 = vmul.f32 0.5, %v3995_v45 }
0x2fb1   : > { %v4002_v4 = vand.u32 2147483647, %v3999_v3  ;;  %vm4000_vm15 = vcmp.ge.f32.partialorder %v3999_v3, 0.0 }
0x2fb2   : > { %v4001_v23 = vsel %vm4000_vm15, 1.0, %v5483_v30 }
0x2fb3   : > { %v4003_v39 = vmul.f32 0.3275911, %v4002_v4  ;;  %v4016_v35 = vsub.f32 0.0, %v4002_v4 }
0x2fb5   : > { %v4004_v6 = vadd.f32 1.0, %v4003_v39  ;;  %v4017_v8 = vmul.f32 %v4016_v35, %v4002_v4 }
0x2fb7   : > { %5442 = vrcp.f32 %v4004_v6  ;;  %v4018_v11 = vmul.f32 1.442695, %v4017_v8 }
0x2fb9   : > { %5444 = vpow2.f32 %v4018_v11 }
0x2fc1   : > { %v5443_v7 = vpop.eup %5442 }
0x2fc2   : > { %v4007_v9 = vmul.f32 1.0614054, %v5443_v7 }
0x2fc3   : > { %v5445_v20 = vpop.eup %5444 }
0x2fc4   : > { %v4450_v10 = vadd.f32 -1.4531521, %v4007_v9 }
0x2fc6   : > { %v4009_v12 = vmul.f32 %v5443_v7, %v4450_v10 }
0x2fc8   : > { %v4010_v14 = vadd.f32 1.4214138, %v4009_v12 }
0x2fca   : > { %v4011_v42 = vmul.f32 %v5443_v7, %v4010_v14 }
0x2fcc   : > { %v4451_v15 = vadd.f32 -0.28449672, %v4011_v42 }
0x2fce   : > { %v4013_v17 = vmul.f32 %v5443_v7, %v4451_v15 }
0x2fd0   : > { %v4014_v18 = vadd.f32 0.2548296, %v4013_v17 }
0x2fd2   : > { %v4015_v19 = vmul.f32 %v5443_v7, %v4014_v18 }
0x2fd4   : > { %v4020_v63 = vmul.f32 %v5445_v20, %v4015_v19 }
0x2fd6   : > { %v4021_v22 = vsub.f32 1.0, %v4020_v63 }
0x2fd8   : > { %v4022_v24 = vmul.f32 %v4021_v22, %v4001_v23 }
0x2fda   : > { %v4023_v25 = vadd.f32 1.0, %v4022_v24 }
0x2fdc   : > { %v4024_v26 = vmul.f32 %v4023_v25, %v3998_v58 }
0x2fde   : > { %5093 = vmatmul.mubr.f32.vlgmr.msra.gmra.mrb[36].mxu0 %v4024_v26 }
0x30b1   : > { %v4116_v28 = vpop.f32.mrb[36].mxu0 }
0x30b2   : > { %v4117_v29 = vadd.f32 %v4469_v27, %v4116_v28  ;;  %v5094_v31 = vpop.f32.mrb[37].mxu0 }
0x30b4   : > { %v4128_v32 = vmul.f32 %v4471_v5, %v4117_v29 }
0x30b6   : > { %v4129_v34 = vadd.f32 %v4128_v32, %v6535_v13 }
0x30b8   : > { %v4132_v30 = vsel %vm940_vm7, %v4129_v34, 0.0 }
0x30b9   : > { %4133 = vadd.xlane.f32.xlu0 %v4132_v30 }
0x3146   : > { %v4134_v38 = vpop.xlane.xlu0 %4133 }
0x3147   : > { %v4135_v40 = vmul.f32 0.03125, %v4134_v38 }
0x3149   : > { %v4136_v41 = vsub.f32 %v4129_v34, %v4135_v40 }
0x314b   : > { %v4137_v43 = vmul.f32 %v4136_v41, %v4136_v41 }
0x314d   : > { %v4138_v44 = vsel %vm940_vm7, %v4137_v43, 0.0 }
0x314e   : > { %4139 = vadd.xlane.f32.xlu0 %v4138_v44 }
0x31db   : > { %v4140_v46 = vpop.xlane.xlu0 %4139 }
0x31dc   : > { %v4141_v47 = vmul.f32 0.03125, %v4140_v46 }
0x31de   : > { %v4142_v16 = vadd.f32 1e-06, %v4141_v47 }
0x31e0   : > { %5446 = vrsqrt.f32 %v4142_v16 }
0x31ea   : > { %v5447_v48 = vpop.eup %5446 }
0x31eb   : > { %v4144_v49 = vmul.f32 %v5447_v48, %v4136_v41  ;;  %4167 = sbr.rel (!%p5614_p4) target bundleno = 12794 (0x31fa), region = 104 }
0x31ed   : > { %v4151_v50 = vmul.f32 %v6270_v33, %v4144_v49 }
0x31ef   : > { %v4158_v13 = vadd.f32 %v6278_v37, %v4151_v50 }
0x31f1   : > { %4474 = vst.msk [vmem:[%s6285_s1 + $0x3] sm:$0x1e] %vm2549_vm13, %v4158_v13 }
0x31f8   : > { %v4187_v52 = vld [vmem:[%s6285_s1 + $0x4] sm:$0xf] }
0x31f9   : > { %4188 = vst [vmem:[%s4169_s28 + $0x8] sm:$0xf] %v4187_v52 }
0x31fa PF: > { %s6718_s23 = sld [smem:[#allocation5_spill]]  ;;  %s6719_s1 = sld [smem:[#allocation3_spill]] }
0x31fb   : > { %s6720_s22 = sld [smem:[#allocation6_spill]] }
0x3200   : > { %p27_p8 = scmp.ge.s32.totalorder %s6718_s23, 4  }
0x3202   :  { %29 = sbr.rel (!%p27_p8) target bundleno = 11 (0xb), region = 214 }

</bundles_post_ra>
